<compile_context>
chip_gen: v5e
topology: v5e:2x2
jax: 0.10.0
libtpu: 0.0.40
codegen_flags: <defaults>
</compile_context>

<pallas_src>
import jax
import jax.numpy as jnp
from jax.experimental import pallas as pl
from jax.experimental.pallas import tpu as pltpu

CHANNELS = 1
IMG_SIZE = 32
IMG_SHAPE = (CHANNELS, IMG_SIZE, IMG_SIZE)
LATENT_DIM = 10
HIDDEN = 512
OUT_DIM = CHANNELS * IMG_SIZE * IMG_SIZE  # 1024
BN_EPS = 1e-5
LRELU_SLOPE = 0.2


def _leaky_relu(x, slope):
    return jnp.where(x >= 0, x, slope * x)


def decoder_kernel(z_ref,
                   w1_ref, w2_ref, w3_ref,   # bf16 weights
                   vecs_ref,                 # (3, 512) f32: [b1; gamma; beta]
                   b3_ref,                   # (1, 1024) f32
                   out_ref):
    z = z_ref[...]                            # (B, 10) f32

    b1 = vecs_ref[0:1, :]                     # (1, 512)
    gamma = vecs_ref[1:2, :]                  # (1, 512)
    beta = vecs_ref[2:3, :]                   # (1, 512)

    # --- Linear(latent_dim, 512) + LeakyReLU(0.2) ---------------------------
    # bf16 operands, f32 accumulation on the MXU.
    h1 = jnp.dot(z.astype(jnp.bfloat16), w1_ref[...],
                 preferred_element_type=jnp.float32) + b1
    h1 = _leaky_relu(h1, LRELU_SLOPE)

    # --- Linear(512, 512) (bias dropped: cancelled by BN mean subtraction) --
    h2 = jnp.dot(h1.astype(jnp.bfloat16), w2_ref[...],
                 preferred_element_type=jnp.float32)

    # --- BatchNorm1d(512), training-mode semantics (batch stats, biased var)
    # Fused affine: h2n = h2 * scale + shift, one FMA per element.
    mean = jnp.mean(h2, axis=0, keepdims=True)            # (1, 512)
    centered = h2 - mean
    var = jnp.mean(centered * centered, axis=0, keepdims=True)
    scale = gamma * jax.lax.rsqrt(var + BN_EPS)            # (1, 512)
    shift = beta - mean * scale                            # (1, 512)

    # --- LeakyReLU(0.2) -------------------------------------------------------
    h3 = _leaky_relu(h2 * scale + shift, LRELU_SLOPE)

    # --- Linear(512, 1024) + Tanh --------------------------------------------
    o = jnp.dot(h3.astype(jnp.bfloat16), w3_ref[...],
                preferred_element_type=jnp.float32) + b3_ref[...]
    out_ref[...] = jnp.tanh(o)


def decoder_forward(z, params):
    """z: (B, LATENT_DIM) f32  ->  img: (B, 1, 32, 32) f32"""
    B = z.shape[0]
    (w1, b1, w2, b2, gamma, beta, w3, b3) = params
    # b2 is intentionally unused: bias before training-mode BatchNorm is a no-op.
    del b2

    # Stream the (dominant) weight bytes as bf16.
    w1b = w1.astype(jnp.bfloat16)
    w2b = w2.astype(jnp.bfloat16)
    w3b = w3.astype(jnp.bfloat16)

    # Pack small per-feature vectors into one input (one DMA instead of three).
    vecs = jnp.concatenate([b1, gamma, beta], axis=0)      # (3, 512) f32

    full = lambda shape: pl.BlockSpec(shape, lambda: tuple(0 for _ in shape))

    img_flat = pl.pallas_call(
        decoder_kernel,
        out_shape=jax.ShapeDtypeStruct((B, OUT_DIM), jnp.float32),
        grid=(),
        in_specs=[
            full((B, LATENT_DIM)),
            full((LATENT_DIM, HIDDEN)),
            full((HIDDEN, HIDDEN)),
            full((HIDDEN, OUT_DIM)),
            full((3, HIDDEN)),
            full((1, OUT_DIM)),
        ],
        out_specs=full((B, OUT_DIM)),
        compiler_params=pltpu.CompilerParams(vmem_limit_bytes=16 << 20),
    )(z, w1b, w2b, w3b, vecs, b3)

    return img_flat.reshape(B, *IMG_SHAPE)


def init_params(key):
    """Deterministic init mimicking PyTorch Linear default (U[-1/sqrt(fan_in), ..])."""
    ks = jax.random.split(key, 6)

    def linear(kw, kb, fan_in, fan_out):
        bound = 1.0 / jnp.sqrt(fan_in)
        w = jax.random.uniform(kw, (fan_in, fan_out), jnp.float32, -bound, bound)
        b = jax.random.uniform(kb, (1, fan_out), jnp.float32, -bound, bound)
        return w, b

    w1, b1 = linear(ks[0], ks[1], LATENT_DIM, HIDDEN)
    w2, b2 = linear(ks[2], ks[3], HIDDEN, HIDDEN)   # b2 kept for interface parity; unused in kernel
    w3, b3 = linear(ks[4], ks[5], HIDDEN, OUT_DIM)
    gamma = jnp.ones((1, HIDDEN), jnp.float32)      # BatchNorm1d weight init
    beta = jnp.zeros((1, HIDDEN), jnp.float32)      # BatchNorm1d bias init
    return (w1, b1, w2, b2, gamma, beta, w3, b3)


if __name__ == "__main__":
    key = jax.random.PRNGKey(0)
    k_params, k_z = jax.random.split(key)

    B = 8  # small batch; BatchNorm (training mode) needs B > 1
    params = init_params(k_params)
    z = jax.random.normal(k_z, (B, LATENT_DIM), jnp.float32)

    img = decoder_forward(z, params)
    img = jax.block_until_ready(img)

    assert img.shape == (B, CHANNELS, IMG_SIZE, IMG_SIZE), img.shape
    assert img.dtype == jnp.float32
    print("KERNEL_OK")
</pallas_src>

<mosaic_0001>
module attributes {stable_mosaic.version = 11 : i64} {
  func.func @decoder_kernel(%arg0: memref<8x10xf32, #tpu.memory_space<vmem>>, %arg1: memref<10x512xbf16, #tpu.memory_space<vmem>>, %arg2: memref<512x512xbf16, #tpu.memory_space<vmem>>, %arg3: memref<512x1024xbf16, #tpu.memory_space<vmem>>, %arg4: memref<3x512xf32, #tpu.memory_space<vmem>>, %arg5: memref<1x1024xf32, #tpu.memory_space<vmem>>, %arg6: memref<8x1024xf32, #tpu.memory_space<vmem>>) attributes {dimension_semantics = [], scalar_prefetch = 0 : i64, scratch_operands = 0 : i64, tpu.core_type = #tpu.core_type<tc>} {
    %c0 = arith.constant 0 : index
    %c0_0 = arith.constant 0 : index
    %0 = vector.load %arg0[%c0, %c0_0] : memref<8x10xf32, #tpu.memory_space<vmem>>, vector<8x10xf32>
    %c0_1 = arith.constant 0 : index
    %c0_2 = arith.constant 0 : index
    %1 = vector.load %arg4[%c0_1, %c0_2] : memref<3x512xf32, #tpu.memory_space<vmem>>, vector<1x512xf32>
    %c1 = arith.constant 1 : index
    %c0_3 = arith.constant 0 : index
    %2 = vector.load %arg4[%c1, %c0_3] : memref<3x512xf32, #tpu.memory_space<vmem>>, vector<1x512xf32>
    %c2 = arith.constant 2 : index
    %c0_4 = arith.constant 0 : index
    %3 = vector.load %arg4[%c2, %c0_4] : memref<3x512xf32, #tpu.memory_space<vmem>>, vector<1x512xf32>
    %4 = arith.truncf %0 : vector<8x10xf32> to vector<8x10xbf16>
    %c0_5 = arith.constant 0 : index
    %c0_6 = arith.constant 0 : index
    %5 = vector.load %arg1[%c0_5, %c0_6] : memref<10x512xbf16, #tpu.memory_space<vmem>>, vector<10x512xbf16>
    %cst = arith.constant dense<0.000000e+00> : vector<8x512xf32>
    %6 = tpu.matmul %4, %5, %cst {dimension_numbers = #tpu.dot_dimension_numbers<[1], [0], [0], [1], [0, 0, 1, 1], [], []>} : vector<8x10xbf16>, vector<10x512xbf16>, vector<8x512xf32> -> vector<8x512xf32>
    %7 = vector.broadcast %1 : vector<1x512xf32> to vector<8x512xf32>
    %8 = arith.addf %6, %7 : vector<8x512xf32>
    %cst_7 = arith.constant 0.000000e+00 : f32
    %9 = vector.broadcast %cst_7 : f32 to vector<8x512xf32>
    %10 = arith.cmpf oge, %8, %9 : vector<8x512xf32>
    %cst_8 = arith.constant 2.000000e-01 : f32
    %11 = vector.broadcast %cst_8 : f32 to vector<8x512xf32>
    %12 = arith.mulf %11, %8 : vector<8x512xf32>
    %13 = arith.select %10, %8, %12 : vector<8x512xi1>, vector<8x512xf32>
    %14 = arith.truncf %13 : vector<8x512xf32> to vector<8x512xbf16>
    %c0_9 = arith.constant 0 : index
    %c0_10 = arith.constant 0 : index
    %15 = vector.load %arg2[%c0_9, %c0_10] : memref<512x512xbf16, #tpu.memory_space<vmem>>, vector<512x512xbf16>
    %cst_11 = arith.constant dense<0.000000e+00> : vector<8x512xf32>
    %16 = tpu.matmul %14, %15, %cst_11 {dimension_numbers = #tpu.dot_dimension_numbers<[1], [0], [0], [1], [0, 0, 1, 1], [], []>} : vector<8x512xbf16>, vector<512x512xbf16>, vector<8x512xf32> -> vector<8x512xf32>
    %cst_12 = arith.constant dense<0.000000e+00> : vector<512xf32>
    %17 = vector.multi_reduction <add>, %16, %cst_12 [0] : vector<8x512xf32> to vector<512xf32>
    %18 = vector.shape_cast %17 : vector<512xf32> to vector<1x512xf32>
    %cst_13 = arith.constant 8.000000e+00 : f32
    %19 = vector.broadcast %cst_13 : f32 to vector<1x512xf32>
    %20 = arith.divf %18, %19 : vector<1x512xf32>
    %21 = vector.broadcast %20 : vector<1x512xf32> to vector<8x512xf32>
    %22 = arith.subf %16, %21 : vector<8x512xf32>
    %23 = arith.mulf %22, %22 : vector<8x512xf32>
    %cst_14 = arith.constant dense<0.000000e+00> : vector<512xf32>
    %24 = vector.multi_reduction <add>, %23, %cst_14 [0] : vector<8x512xf32> to vector<512xf32>
    %25 = vector.shape_cast %24 : vector<512xf32> to vector<1x512xf32>
    %cst_15 = arith.constant 8.000000e+00 : f32
    %26 = vector.broadcast %cst_15 : f32 to vector<1x512xf32>
    %27 = arith.divf %25, %26 : vector<1x512xf32>
    %cst_16 = arith.constant 9.99999974E-6 : f32
    %28 = vector.broadcast %cst_16 : f32 to vector<1x512xf32>
    %29 = arith.addf %27, %28 : vector<1x512xf32>
    %30 = math.rsqrt %29 : vector<1x512xf32>
    %31 = arith.mulf %2, %30 : vector<1x512xf32>
    %32 = arith.mulf %20, %31 : vector<1x512xf32>
    %33 = arith.subf %3, %32 : vector<1x512xf32>
    %34 = vector.broadcast %31 : vector<1x512xf32> to vector<8x512xf32>
    %35 = arith.mulf %16, %34 : vector<8x512xf32>
    %36 = vector.broadcast %33 : vector<1x512xf32> to vector<8x512xf32>
    %37 = arith.addf %35, %36 : vector<8x512xf32>
    %cst_17 = arith.constant 0.000000e+00 : f32
    %38 = vector.broadcast %cst_17 : f32 to vector<8x512xf32>
    %39 = arith.cmpf oge, %37, %38 : vector<8x512xf32>
    %cst_18 = arith.constant 2.000000e-01 : f32
    %40 = vector.broadcast %cst_18 : f32 to vector<8x512xf32>
    %41 = arith.mulf %40, %37 : vector<8x512xf32>
    %42 = arith.select %39, %37, %41 : vector<8x512xi1>, vector<8x512xf32>
    %43 = arith.truncf %42 : vector<8x512xf32> to vector<8x512xbf16>
    %c0_19 = arith.constant 0 : index
    %c0_20 = arith.constant 0 : index
    %44 = vector.load %arg3[%c0_19, %c0_20] : memref<512x1024xbf16, #tpu.memory_space<vmem>>, vector<512x1024xbf16>
    %cst_21 = arith.constant dense<0.000000e+00> : vector<8x1024xf32>
    %45 = tpu.matmul %43, %44, %cst_21 {dimension_numbers = #tpu.dot_dimension_numbers<[1], [0], [0], [1], [0, 0, 1, 1], [], []>} : vector<8x512xbf16>, vector<512x1024xbf16>, vector<8x1024xf32> -> vector<8x1024xf32>
    %c0_22 = arith.constant 0 : index
    %c0_23 = arith.constant 0 : index
    %46 = vector.load %arg5[%c0_22, %c0_23] : memref<1x1024xf32, #tpu.memory_space<vmem>>, vector<1x1024xf32>
    %47 = vector.broadcast %46 : vector<1x1024xf32> to vector<8x1024xf32>
    %48 = arith.addf %45, %47 : vector<8x1024xf32>
    %49 = math.tanh %48 : vector<8x1024xf32>
    %c0_24 = arith.constant 0 : index
    %c0_25 = arith.constant 0 : index
    %50 = vector.load %arg6[%c0_24, %c0_25] : memref<8x1024xf32, #tpu.memory_space<vmem>>, vector<8x1024xf32>
    tpu.vector_store %arg6[%c0_24, %c0_25], %49 {strides = array<i32>} : memref<8x1024xf32, #tpu.memory_space<vmem>>, vector<8x1024xf32>,
    return
  }
}

</mosaic_0001>

<bundles_post_ra>
// kernel: tpu_custom_call.1
= control target key start
LH: loop header
LB: loop body
LE: loop exit
PB: predicated region body
PF: predicated region fallthrough
CT: control target
= control target key end

     0   :  { %11 = vsyncpa [#allocation3], 0  ;;  %s5827_s0 = inlined_call_operand.hbm [shape: f32[8,10], index: 0, kind: input, shape index: {}]   ;;  %s5828_s1 = inlined_call_operand.hbm [shape: bf16[10,512], index: 1, kind: input, shape index: {}]   ;;  %s5829_s2 = inlined_call_operand.hbm [shape: bf16[512,512], index: 2, kind: input, shape index: {}]   ;;  %s5830_s3 = inlined_call_operand.hbm [shape: bf16[512,1024], index: 3, kind: input, shape index: {}]   ;;  %s5831_s4 = inlined_call_operand.hbm [shape: f32[3,512], index: 4, kind: input, shape index: {}]   ;;  %s5832_s5 = inlined_call_operand.hbm [shape: f32[1,1024], index: 5, kind: input, shape index: {}]   ;;  %s5833_s6 = inlined_call_operand.hbm [shape: f32[8,1024], index: 6, kind: output, shape index: {}]  }
   0x1   :  { %12 = vsyncpa [#allocation6], 0 }
   0x2   :  { %13 = vsyncpa [#allocation9], 0 }
   0x3   :  { %14 = vsyncpa [#allocation12], 0  ;;  %s31_s23 = sshll.u32 %s5828_s1, 4  ;;  %s32_s23 = int_to_ptr.hbm [resolvable:$true] %s31_s23 }
   0x4   :  { %15 = vsyncpa [#allocation4], 0  ;;  %s5564_s24 = smov [#allocation5]   ;;  %s57_s28 = sshll.u32 %s5830_s3, 4  ;;  %s58_s28 = int_to_ptr.hbm [resolvable:$true] %s57_s28 }
   0x5   :  { %s33_s25 = sshll.u32 %s5564_s24, 4  ;;  %s5565_s29 = smov 256   ;;  %s34_s25 = int_to_ptr.vmem [resolvable:$true] %s33_s25 }
   0x6   :  { %s5566_s30 = smov 16   ;;  %s5567_s7 = smov [#allocation8]  }
   0x7   :  { %39 = dma.hbm_to_vmem [thread:$0]  %s32_s23, 512, %s34_s25, [#allocation6], %s5565_s29, %s5565_s29, %s5566_s30  }
   0x8   :  { %s59_s8 = sshll.u32 %s5567_s7, 4  ;;  %s5568_s9 = smov 512   ;;  %s60_s8 = int_to_ptr.vmem [resolvable:$true] %s59_s8 }
   0x9   :  { %s5569_s10 = smov 32   ;;  %s21_s12 = sshll.u32 %s5827_s0, 4  ;;  %s22_s12 = int_to_ptr.hbm [resolvable:$true] %s21_s12 }
   0xa   :  { %65 = dma.hbm_to_vmem [thread:$0]  %s58_s28, 32768, %s60_s8, [#allocation9], %s5568_s9, %s5568_s9, %s5569_s10  }
   0xb   :  { %s5570_s13 = smov [#allocation2]   ;;  %s44_s16 = sshll.u32 %s5829_s2, 4  ;;  %s45_s16 = int_to_ptr.hbm [resolvable:$true] %s44_s16 }
   0xc   :  { %s23_s14 = sshll.u32 %s5570_s13, 4  ;;  %s5571_s17 = smov [#allocation7]   ;;  %s24_s14 = int_to_ptr.vmem [resolvable:$true] %s23_s14 }
   0xd   :  { %26 = dma.hbm_to_vmem [thread:$0]  %s22_s12, 128, %s24_s14, [#allocation3]  }
   0xe   :  { %s46_s18 = sshll.u32 %s5571_s17, 4  ;;  %s71_s21 = sshll.u32 %s5831_s4, 4  ;;  %s47_s18 = int_to_ptr.vmem [resolvable:$true] %s46_s18  ;;  %s72_s21 = int_to_ptr.hbm [resolvable:$true] %s71_s21 }
   0xf   :  { %52 = dma.hbm_to_vmem [thread:$0]  %s45_s16, 16384, %s47_s18, [#allocation6], %s5565_s29, %s5565_s29, %s5566_s30  }
  0x10   :  { %s82_s23 = sshll.u32 %s5832_s5, 4  ;;  %s5572_s24 = smov [#allocation10]   ;;  %s83_s23 = int_to_ptr.hbm [resolvable:$true] %s82_s23 }
  0x11   :  { %s73_s25 = sshll.u32 %s5572_s24, 4  ;;  %s5573_s2 = smov [#allocation11]   ;;  %s74_s25 = int_to_ptr.vmem [resolvable:$true] %s73_s25 }
  0x12   :  { %76 = dma.hbm_to_vmem [thread:$0]  %s72_s21, 256, %s74_s25, [#allocation9]  }
  0x13   :  { %s84_s26 = sshll.u32 %s5573_s2, 4  ;;  %s85_s26 = int_to_ptr.vmem [resolvable:$true] %s84_s26 }
  0x14   :  { %87 = dma.hbm_to_vmem [thread:$0]  %s83_s23, 128, %s85_s26, [#allocation12]  }
  0x15   :  { %5554 = dma.done.wait [#allocation3], 128  }
  0x16   :  { %5555 = vsyncadd [#allocation3], 4294967168 }
  0x17   :  { %5556 = dma.done.wait [#allocation6], 16896  }
  0x18   :  { %5557 = vsyncadd [#allocation6], 4294950400 }
  0x19   :  { %5558 = dma.done.wait [#allocation9], 33024  }
  0x1a   :  { %5559 = vsyncadd [#allocation9], 4294934272 }
  0x1b   :  { %5560 = dma.done.wait [#allocation12], 128  }
  0x1c   :  { %5561 = vsyncadd [#allocation12], 4294967168  ;;  %vm153_vm0 = vcmask 1044480   ;;  %v3406_v0 = vld [vmem:[#allocation5] sm:$0xf]  ;;  %v113_v11 = vld [vmem:[#allocation2] sm:$0xff] }
  0x1d   :  { %v4962_v1 = vld [vmem:[#allocation5 + $0xc] sm:$0x10]  ;;  %v4960_v2 = vld [vmem:[#allocation5 + $0x4] sm:$0xf]  ;;  %v3408_v4 = vld [vmem:[#allocation5 + $0x10] sm:$0x10]  ;;  %v119_v14 = vpack.c.bf16 %v113_v11, %v113_v11 }
  0x1e   :  { %v3407_v3 = vor.u32 %v4962_v1, %v3406_v0  ;;  %v3414_v5 = vld [vmem:[#allocation5 + $0x8] sm:$0xf]  ;;  %v4963_v6 = vld [vmem:[#allocation5 + $0x14] sm:$0x10]  ;;  %v3411_v7 = vor.u32 %v4960_v2, %v3408_v4  ;;  %v4961_v9 = vld [vmem:[#allocation5 + $0xc] sm:$0xf] }
  0x1f   :  { %v3415_v8 = vor.u32 %v4963_v6, %v3414_v5  ;;  %v3416_v10 = vld [vmem:[#allocation5 + $0x18] sm:$0x10]  ;;  %vm149_vm1 = vcmask 80896   ;;  %v3538_v15 = vld [vmem:[#allocation7 + $0xe0] sm:$0xf]  ;;  %s5575_s4 = smov [#allocation13]  }
  0x20   :  { %v155_v12 = vsel %vm153_vm0, %v3407_v3, 0  ;;  %v3419_v13 = vor.u32 %v4961_v9, %v3416_v10  ;;  %v4994_v16 = vld [vmem:[#allocation7 + $0xec] sm:$0xf0]  ;;  %v158_v17 = vsel %vm153_vm0, %v3411_v7, 0  ;;  %v3666_v20 = vld [vmem:[#allocation7 + $0x1e0] sm:$0xf] }
  0x21   :  { %173 = vmatpush.bf16.msra.mxu0 %v155_v12  ;;  %v161_v18 = vsel %vm153_vm0, %v3415_v8, 0  ;;  %v3539_v19 = vor.u32 %v4994_v16, %v3538_v15  ;;  %v5026_v21 = vld [vmem:[#allocation7 + $0x1ec] sm:$0xf0]  ;;  %186 = vmatpush.bf16.msra.mxu1 %v158_v17  ;;  %v3522_v24 = vld [vmem:[#allocation7 + $0xc0] sm:$0xf]  ;;  %s3389_s5 = sshll.u32 %s5575_s4, 4  ;;  %s3390_s5 = int_to_ptr.vmem [resolvable:$true] %s3389_s5 }
  0x22   :  { %199 = vmatpush.bf16.msra.mxu2 %v161_v18  ;;  %v164_v22 = vsel %vm153_vm0, %v3419_v13, 0  ;;  %v3667_v23 = vor.u32 %v5026_v21, %v3666_v20  ;;  %v4990_v25 = vld [vmem:[#allocation7 + $0xcc] sm:$0xf0]  ;;  %v3650_v27 = vld [vmem:[#allocation7 + $0x1c0] sm:$0xf]  ;;  %s3391_s29 = sshll.u32 %s5833_s6, 4  ;;  %s3392_s29 = int_to_ptr.hbm [resolvable:$true] %s3391_s29 }
  0x23   :  { %212 = vmatpush.bf16.msra.mxu3 %v164_v22  ;;  %v3523_v26 = vor.u32 %v4990_v25, %v3522_v24  ;;  %v5022_v28 = vld [vmem:[#allocation7 + $0x1cc] sm:$0xf0]  ;;  %v3794_v29 = vld [vmem:[#allocation7 + $0x2e0] sm:$0xf] }
  0x24   :  { %3420 = vmatmul.msk.bf16.vlgmr.msra.gmra.mxu0 %vm149_vm1, %v119_v14  ;;  %v3651_v30 = vor.u32 %v5022_v28, %v3650_v27  ;;  %v5058_v31 = vld [vmem:[#allocation7 + $0x2ec] sm:$0xf0]  ;;  %v3922_v32 = vld [vmem:[#allocation7 + $0x3e0] sm:$0xf]  ;;  %3421 = vmatmul.msk.bf16.vlgmr.msra.gmra.mxu1 %vm149_vm1, %v119_v14 }
  0x25   :  { %1002 = vmatpush.bf16.msrb.mxu0 %v3539_v19  ;;  %1015 = vmatpush.bf16.msrb.mxu1 %v3667_v23  ;;  %v5090_v33 = vld [vmem:[#allocation7 + $0x3ec] sm:$0xf0]  ;;  %v3795_v34 = vor.u32 %v5058_v31, %v3794_v29  ;;  %v3506_v36 = vld [vmem:[#allocation7 + $0xa0] sm:$0xf] }
  0x26   :  { %3422 = vmatmul.msk.bf16.vlgmr.msra.gmra.mxu2 %vm149_vm1, %v119_v14  ;;  %v3923_v35 = vor.u32 %v5090_v33, %v3922_v32  ;;  %v4986_v37 = vld [vmem:[#allocation7 + $0xac] sm:$0xf0]  ;;  %v3634_v38 = vld [vmem:[#allocation7 + $0x1a0] sm:$0xf]  ;;  %3423 = vmatmul.msk.bf16.vlgmr.msra.gmra.mxu3 %vm149_vm1, %v119_v14 }
  0x27   :  { %v5018_v39 = vld [vmem:[#allocation7 + $0x1ac] sm:$0xf0]  ;;  %v3778_v40 = vld [vmem:[#allocation7 + $0x2c0] sm:$0xf]  ;;  %1028 = vmatpush.bf16.msrb.mxu2 %v3795_v34  ;;  %v3507_v42 = vor.u32 %v4986_v37, %v3506_v36 }
  0x28   :  { %v5054_v41 = vld [vmem:[#allocation7 + $0x2cc] sm:$0xf0]  ;;  %v3906_v44 = vld [vmem:[#allocation7 + $0x3c0] sm:$0xf]  ;;  %1041 = vmatpush.bf16.msrb.mxu3 %v3923_v35  ;;  %v3635_v47 = vor.u32 %v5018_v39, %v3634_v38  ;;  %v4992_v38 = vld [vmem:[#allocation7 + $0xe4] sm:$0xf] }
  0x29   :  { %1003 = vmatpush.bf16.msrb.mxu0 %v3523_v26  ;;  %v3779_v43 = vor.u32 %v5054_v41, %v3778_v40  ;;  %v5086_v45 = vld [vmem:[#allocation7 + $0x3cc] sm:$0xf0]  ;;  %v3490_v46 = vld [vmem:[#allocation7 + $0x80] sm:$0xf]  ;;  %1016 = vmatpush.bf16.msrb.mxu1 %v3651_v30  ;;  %v3540_v39 = vld [vmem:[#allocation7 + $0xf0] sm:$0xf0] }
  0x2a   :  { %v3907_v48 = vor.u32 %v5086_v45, %v3906_v44  ;;  %v4982_v49 = vld [vmem:[#allocation7 + $0x8c] sm:$0xf0]  ;;  %v3618_v50 = vld [vmem:[#allocation7 + $0x180] sm:$0xf]  ;;  %v5024_v40 = vld [vmem:[#allocation7 + $0x1e4] sm:$0xf] }
  0x2b   :  { %v5014_v51 = vld [vmem:[#allocation7 + $0x18c] sm:$0xf0]  ;;  %v3762_v52 = vld [vmem:[#allocation7 + $0x2a0] sm:$0xf]  ;;  %1029 = vmatpush.bf16.msrb.mxu2 %v3779_v43  ;;  %v3491_v56 = vor.u32 %v4982_v49, %v3490_v46  ;;  %v3668_v41 = vld [vmem:[#allocation7 + $0x1f0] sm:$0xf0] }
  0x2c   :  { %v5050_v53 = vld [vmem:[#allocation7 + $0x2ac] sm:$0xf0]  ;;  %v3890_v54 = vld [vmem:[#allocation7 + $0x3a0] sm:$0xf]  ;;  %1042 = vmatpush.bf16.msrb.mxu3 %v3907_v48  ;;  %v3619_v60 = vor.u32 %v5014_v51, %v3618_v50  ;;  %v4988_v46 = vld [vmem:[#allocation7 + $0xc4] sm:$0xf]  ;;  %v3543_v48 = vor.u32 %v4992_v38, %v3540_v39 }
  0x2d   :  { %v5082_v55 = vld [vmem:[#allocation7 + $0x3ac] sm:$0xf0]  ;;  %1004 = vmatpush.bf16.msrb.mxu0 %v3507_v42  ;;  %v3763_v57 = vor.u32 %v5050_v53, %v3762_v52  ;;  %v3474_v58 = vld [vmem:[#allocation7 + $0x60] sm:$0xf]  ;;  %1017 = vmatpush.bf16.msrb.mxu1 %v3635_v47  ;;  %v3524_v49 = vld [vmem:[#allocation7 + $0xd0] sm:$0xf0]  ;;  %v3671_v52 = vor.u32 %v5024_v40, %v3668_v41 }
  0x2e   :  { %v4978_v59 = vld [vmem:[#allocation7 + $0x6c] sm:$0xf0]  ;;  %v3891_v61 = vor.u32 %v5082_v55, %v3890_v54  ;;  %v3602_v62 = vld [vmem:[#allocation7 + $0x160] sm:$0xf]  ;;  %v5020_v54 = vld [vmem:[#allocation7 + $0x1c4] sm:$0xf] }
  0x2f   :  { %v3746_v63 = vld [vmem:[#allocation7 + $0x280] sm:$0xf]  ;;  %v5046_v0 = vld [vmem:[#allocation7 + $0x28c] sm:$0xf0]  ;;  %1030 = vmatpush.bf16.msrb.mxu2 %v3763_v57  ;;  %v3475_v4 = vor.u32 %v4978_v59, %v3474_v58  ;;  %v5056_v55 = vld [vmem:[#allocation7 + $0x2e4] sm:$0xf] }
  0x30   :  { %v5010_v1 = vld [vmem:[#allocation7 + $0x16c] sm:$0xf0]  ;;  %v3874_v2 = vld [vmem:[#allocation7 + $0x380] sm:$0xf]  ;;  %v3747_v5 = vor.u32 %v5046_v0, %v3746_v63  ;;  %1043 = vmatpush.bf16.msrb.mxu3 %v3891_v61  ;;  %v3652_v57 = vld [vmem:[#allocation7 + $0x1d0] sm:$0xf0]  ;;  %v3527_v63 = vor.u32 %v4988_v46, %v3524_v49 }
  0x31   :  { %v5078_v3 = vld [vmem:[#allocation7 + $0x38c] sm:$0xf0]  ;;  %1005 = vmatpush.bf16.msrb.mxu0 %v3491_v56  ;;  %v3458_v6 = vld [vmem:[#allocation7 + $0x40] sm:$0xf]  ;;  %1018 = vmatpush.bf16.msrb.mxu1 %v3619_v60  ;;  %v3603_v8 = vor.u32 %v5010_v1, %v3602_v62  ;;  %v3796_v56 = vld [vmem:[#allocation7 + $0x2f0] sm:$0xf0] }
  0x32   :  { %v4974_v7 = vld [vmem:[#allocation7 + $0x4c] sm:$0xf0]  ;;  %v3875_v9 = vor.u32 %v5078_v3, %v3874_v2  ;;  %v3586_v10 = vld [vmem:[#allocation7 + $0x140] sm:$0xf]  ;;  %v5088_v61 = vld [vmem:[#allocation7 + $0x3e4] sm:$0xf]  ;;  %v3799_v0 = vor.u32 %v5056_v55, %v3796_v56  ;;  %v3655_v2 = vor.u32 %v5020_v54, %v3652_v57 }
  0x33   :  { %v3730_v11 = vld [vmem:[#allocation7 + $0x260] sm:$0xf]  ;;  %v5042_v12 = vld [vmem:[#allocation7 + $0x26c] sm:$0xf0]  ;;  %1031 = vmatpush.bf16.msrb.mxu2 %v3747_v5  ;;  %v3459_v16 = vor.u32 %v4974_v7, %v3458_v6  ;;  %v3924_v62 = vld [vmem:[#allocation7 + $0x3f0] sm:$0xf0] }
  0x34   :  { %v5006_v13 = vld [vmem:[#allocation7 + $0x14c] sm:$0xf0]  ;;  %v3858_v14 = vld [vmem:[#allocation7 + $0x360] sm:$0xf]  ;;  %v3731_v17 = vor.u32 %v5042_v12, %v3730_v11  ;;  %1044 = vmatpush.bf16.msrb.mxu3 %v3875_v9  ;;  %v4984_v1 = vld [vmem:[#allocation7 + $0xa4] sm:$0xf]  ;;  %v3927_v7 = vor.u32 %v5088_v61, %v3924_v62 }
  0x35   :  { %v5074_v15 = vld [vmem:[#allocation7 + $0x36c] sm:$0xf0]  ;;  %1006 = vmatpush.bf16.msrb.mxu0 %v3475_v4  ;;  %v3442_v18 = vld [vmem:[#allocation7 + $0x20] sm:$0xf]  ;;  %1019 = vmatpush.bf16.msrb.mxu1 %v3603_v8  ;;  %v3587_v20 = vor.u32 %v5006_v13, %v3586_v10  ;;  %v3508_v4 = vld [vmem:[#allocation7 + $0xb0] sm:$0xf0] }
  0x36   :  { %v4970_v19 = vld [vmem:[#allocation7 + $0x2c] sm:$0xf0]  ;;  %v3859_v21 = vor.u32 %v5074_v15, %v3858_v14  ;;  %v3570_v22 = vld [vmem:[#allocation7 + $0x120] sm:$0xf]  ;;  %v5052_v5 = vld [vmem:[#allocation7 + $0x2c4] sm:$0xf]  ;;  %v3511_v12 = vor.u32 %v4984_v1, %v3508_v4 }
  0x37   :  { %v3714_v23 = vld [vmem:[#allocation7 + $0x240] sm:$0xf]  ;;  %v5038_v24 = vld [vmem:[#allocation7 + $0x24c] sm:$0xf0]  ;;  %1032 = vmatpush.bf16.msrb.mxu2 %v3731_v17  ;;  %v3443_v28 = vor.u32 %v4970_v19, %v3442_v18  ;;  %v3780_v6 = vld [vmem:[#allocation7 + $0x2d0] sm:$0xf0] }
  0x38   :  { %v5002_v25 = vld [vmem:[#allocation7 + $0x12c] sm:$0xf0]  ;;  %v3842_v26 = vld [vmem:[#allocation7 + $0x340] sm:$0xf]  ;;  %v3715_v29 = vor.u32 %v5038_v24, %v3714_v23  ;;  %1045 = vmatpush.bf16.msrb.mxu3 %v3859_v21  ;;  %v5016_v8 = vld [vmem:[#allocation7 + $0x1a4] sm:$0xf]  ;;  %v3783_v13 = vor.u32 %v5052_v5, %v3780_v6 }
  0x39   :  { %v5070_v27 = vld [vmem:[#allocation7 + $0x34c] sm:$0xf0]  ;;  %1007 = vmatpush.bf16.msrb.mxu0 %v3459_v16  ;;  %v3426_v30 = vld [vmem:[#allocation7] sm:$0xf]  ;;  %1020 = vmatpush.bf16.msrb.mxu1 %v3587_v20  ;;  %v3571_v33 = vor.u32 %v5002_v25, %v3570_v22  ;;  %v3636_v9 = vld [vmem:[#allocation7 + $0x1b0] sm:$0xf0] }
  0x3a   :  { %v4966_v31 = vld [vmem:[#allocation7 + $0xc] sm:$0xf0]  ;;  %v3554_v32 = vld [vmem:[#allocation7 + $0x100] sm:$0xf]  ;;  %v3843_v34 = vor.u32 %v5070_v27, %v3842_v26  ;;  %v5084_v10 = vld [vmem:[#allocation7 + $0x3c4] sm:$0xf]  ;;  %v3639_v15 = vor.u32 %v5016_v8, %v3636_v9 }
  0x3b   :  { %v4998_v35 = vld [vmem:[#allocation7 + $0x10c] sm:$0xf0]  ;;  %v3698_v36 = vld [vmem:[#allocation7 + $0x220] sm:$0xf]  ;;  %1033 = vmatpush.bf16.msrb.mxu2 %v3715_v29  ;;  %v3427_v44 = vor.u32 %v4966_v31, %v3426_v30  ;;  %v3908_v11 = vld [vmem:[#allocation7 + $0x3d0] sm:$0xf0] }
  0x3c   :  { %v5034_v37 = vld [vmem:[#allocation7 + $0x22c] sm:$0xf0]  ;;  %v3826_v42 = vld [vmem:[#allocation7 + $0x320] sm:$0xf]  ;;  %1046 = vmatpush.bf16.msrb.mxu3 %v3843_v34  ;;  %v3555_v47 = vor.u32 %v4998_v35, %v3554_v32  ;;  %v4980_v14 = vld [vmem:[#allocation7 + $0x84] sm:$0xf]  ;;  %v3911_v19 = vor.u32 %v5084_v10, %v3908_v11 }
  0x3d   :  { %v5066_v43 = vld [vmem:[#allocation7 + $0x32c] sm:$0xf0]  ;;  %1008 = vmatpush.bf16.msrb.mxu0 %v3443_v28  ;;  %v3699_v45 = vor.u32 %v5034_v37, %v3698_v36  ;;  %1021 = vmatpush.bf16.msrb.mxu1 %v3571_v33  ;;  %v3682_v50 = vld [vmem:[#allocation7 + $0x200] sm:$0xf]  ;;  %v3492_v16 = vld [vmem:[#allocation7 + $0x90] sm:$0xf0] }
  0x3e   :  { %v5030_v51 = vld [vmem:[#allocation7 + $0x20c] sm:$0xf0]  ;;  %v3827_v53 = vor.u32 %v5066_v43, %v3826_v42  ;;  %v3810_v58 = vld [vmem:[#allocation7 + $0x300] sm:$0xf]  ;;  %v5048_v17 = vld [vmem:[#allocation7 + $0x2a4] sm:$0xf]  ;;  %v3495_v24 = vor.u32 %v4980_v14, %v3492_v16 }
  0x3f   :  { %v5062_v59 = vld [vmem:[#allocation7 + $0x30c] sm:$0xf0]  ;;  %1034 = vmatpush.bf16.msrb.mxu2 %v3699_v45  ;;  %v3683_v60 = vor.u32 %v5030_v51, %v3682_v50  ;;  %v3764_v18 = vld [vmem:[#allocation7 + $0x2b0] sm:$0xf0]  ;;  %v5012_v20 = vld [vmem:[#allocation7 + $0x184] sm:$0xf] }
  0x40   :  { %1047 = vmatpush.bf16.msrb.mxu3 %v3827_v53  ;;  %v3811_v3 = vor.u32 %v5062_v59, %v3810_v58  ;;  %v3620_v21 = vld [vmem:[#allocation7 + $0x190] sm:$0xf0]  ;;  %v5080_v22 = vld [vmem:[#allocation7 + $0x3a4] sm:$0xf]  ;;  %v3767_v25 = vor.u32 %v5048_v17, %v3764_v18 }
  0x41   :  { %1009 = vmatpush.bf16.msrb.mxu0 %v3427_v44  ;;  %1022 = vmatpush.bf16.msrb.mxu1 %v3555_v47  ;;  %v3892_v23 = vld [vmem:[#allocation7 + $0x3b0] sm:$0xf0]  ;;  %v4976_v26 = vld [vmem:[#allocation7 + $0x64] sm:$0xf]  ;;  %v3623_v27 = vor.u32 %v5012_v20, %v3620_v21 }
  0x42   :  { %v3476_v28 = vld [vmem:[#allocation7 + $0x70] sm:$0xf0]  ;;  %v5044_v29 = vld [vmem:[#allocation7 + $0x284] sm:$0xf]  ;;  %v3895_v31 = vor.u32 %v5080_v22, %v3892_v23 }
  0x43   :  { %1035 = vmatpush.bf16.msrb.mxu2 %v3683_v60  ;;  %v3748_v30 = vld [vmem:[#allocation7 + $0x290] sm:$0xf0]  ;;  %v5008_v32 = vld [vmem:[#allocation7 + $0x164] sm:$0xf]  ;;  %v3479_v36 = vor.u32 %v4976_v26, %v3476_v28  ;;  %v4995_v26 = vld [vmem:[#allocation7 + $0xf4] sm:$0xf0] }
  0x44   :  { %1048 = vmatpush.bf16.msrb.mxu3 %v3811_v3  ;;  %v3604_v33 = vld [vmem:[#allocation7 + $0x170] sm:$0xf0]  ;;  %v5076_v34 = vld [vmem:[#allocation7 + $0x384] sm:$0xf]  ;;  %v3751_v37 = vor.u32 %v5044_v29, %v3748_v30  ;;  %v5027_v29 = vld [vmem:[#allocation7 + $0x1f4] sm:$0xf0] }
  0x45   :  { %1054 = vmatpush.bf16.msra.mxu0 %v3543_v48  ;;  %1067 = vmatpush.bf16.msra.mxu1 %v3671_v52  ;;  %v3876_v35 = vld [vmem:[#allocation7 + $0x390] sm:$0xf0]  ;;  %v3607_v38 = vor.u32 %v5008_v32, %v3604_v33  ;;  %v4972_v39 = vld [vmem:[#allocation7 + $0x44] sm:$0xf] }
  0x46   :  { %v3460_v40 = vld [vmem:[#allocation7 + $0x50] sm:$0xf0]  ;;  %v3879_v41 = vor.u32 %v5076_v34, %v3876_v35  ;;  %v5004_v42 = vld [vmem:[#allocation7 + $0x144] sm:$0xf] }
  0x47   :  { %1080 = vmatpush.bf16.msra.mxu2 %v3799_v0  ;;  %v3588_v43 = vld [vmem:[#allocation7 + $0x150] sm:$0xf0]  ;;  %v3463_v44 = vor.u32 %v4972_v39, %v3460_v40  ;;  %v5040_v46 = vld [vmem:[#allocation7 + $0x264] sm:$0xf]  ;;  %v4991_v39 = vld [vmem:[#allocation7 + $0xd4] sm:$0xf0] }
  0x48   :  { %1093 = vmatpush.bf16.msra.mxu3 %v3927_v7  ;;  %v3591_v45 = vor.u32 %v5004_v42, %v3588_v43  ;;  %v3732_v47 = vld [vmem:[#allocation7 + $0x270] sm:$0xf0]  ;;  %v5072_v48 = vld [vmem:[#allocation7 + $0x364] sm:$0xf]  ;;  %v3658_v42 = vld [vmem:[#allocation7 + $0x1c8] sm:$0xf] }
  0x49   :  { %1055 = vmatpush.bf16.msra.mxu0 %v3527_v63  ;;  %1068 = vmatpush.bf16.msra.mxu1 %v3655_v2  ;;  %v3735_v49 = vor.u32 %v5040_v46, %v3732_v47  ;;  %v3860_v50 = vld [vmem:[#allocation7 + $0x370] sm:$0xf0]  ;;  %v4968_v52 = vld [vmem:[#allocation7 + $0x24] sm:$0xf]  ;;  %v5023_v43 = vld [vmem:[#allocation7 + $0x1d4] sm:$0xf0] }
  0x4a   :  { %v3863_v51 = vor.u32 %v5072_v48, %v3860_v50  ;;  %v3444_v53 = vld [vmem:[#allocation7 + $0x30] sm:$0xf0]  ;;  %v5000_v54 = vld [vmem:[#allocation7 + $0x124] sm:$0xf]  ;;  %v3802_v47 = vld [vmem:[#allocation7 + $0x2e8] sm:$0xf] }
  0x4b   :  { %1081 = vmatpush.bf16.msra.mxu2 %v3783_v13  ;;  %v3447_v55 = vor.u32 %v4968_v52, %v3444_v53  ;;  %v3572_v56 = vld [vmem:[#allocation7 + $0x130] sm:$0xf0]  ;;  %v5036_v58 = vld [vmem:[#allocation7 + $0x244] sm:$0xf]  ;;  %v5059_v48 = vld [vmem:[#allocation7 + $0x2f4] sm:$0xf0] }
  0x4c   :  { %1094 = vmatpush.bf16.msra.mxu3 %v3911_v19  ;;  %v3575_v57 = vor.u32 %v5000_v54, %v3572_v56  ;;  %v3716_v59 = vld [vmem:[#allocation7 + $0x250] sm:$0xf0]  ;;  %v5068_v60 = vld [vmem:[#allocation7 + $0x344] sm:$0xf]  ;;  %v5091_v53 = vld [vmem:[#allocation7 + $0x3f4] sm:$0xf0] }
  0x4d   :  { %1056 = vmatpush.bf16.msra.mxu0 %v3511_v12  ;;  %1069 = vmatpush.bf16.msra.mxu1 %v3639_v15  ;;  %v3719_v61 = vor.u32 %v5036_v58, %v3716_v59  ;;  %v3844_v62 = vld [vmem:[#allocation7 + $0x350] sm:$0xf0]  ;;  %v4964_v0 = vld [vmem:[#allocation7 + $0x4] sm:$0xf]  ;;  %v3514_v54 = vld [vmem:[#allocation7 + $0xa8] sm:$0xf] }
  0x4e   :  { %v3847_v63 = vor.u32 %v5068_v60, %v3844_v62  ;;  %v3428_v1 = vld [vmem:[#allocation7 + $0x10] sm:$0xf0]  ;;  %v4996_v2 = vld [vmem:[#allocation7 + $0x104] sm:$0xf]  ;;  %v3642_v58 = vld [vmem:[#allocation7 + $0x1a8] sm:$0xf]  ;;  %v3803_v62 = vor.u32 %v5059_v48, %v3802_v47 }
  0x4f   :  { %1082 = vmatpush.bf16.msra.mxu2 %v3767_v25  ;;  %v3431_v3 = vor.u32 %v4964_v0, %v3428_v1  ;;  %v3556_v4 = vld [vmem:[#allocation7 + $0x110] sm:$0xf0]  ;;  %v5032_v6 = vld [vmem:[#allocation7 + $0x224] sm:$0xf]  ;;  %v3546_v25 = vld [vmem:[#allocation7 + $0xe8] sm:$0xf] }
  0x50   :  { %1095 = vmatpush.bf16.msra.mxu3 %v3895_v31  ;;  %v3559_v5 = vor.u32 %v4996_v2, %v3556_v4  ;;  %v3700_v7 = vld [vmem:[#allocation7 + $0x230] sm:$0xf0]  ;;  %v5064_v8 = vld [vmem:[#allocation7 + $0x324] sm:$0xf]  ;;  %v3547_v34 = vor.u32 %v4995_v26, %v3546_v25  ;;  %v5019_v60 = vld [vmem:[#allocation7 + $0x1b4] sm:$0xf0] }
  0x51   :  { %1057 = vmatpush.bf16.msra.mxu0 %v3495_v24  ;;  %1070 = vmatpush.bf16.msra.mxu1 %v3623_v27  ;;  %v3703_v9 = vor.u32 %v5032_v6, %v3700_v7  ;;  %v3828_v10 = vld [vmem:[#allocation7 + $0x330] sm:$0xf0]  ;;  %v5028_v12 = vld [vmem:[#allocation7 + $0x204] sm:$0xf]  ;;  %v3674_v27 = vld [vmem:[#allocation7 + $0x1e8] sm:$0xf]  ;;  %v3643_v7 = vor.u32 %v5019_v60, %v3642_v58 }
  0x52   :  { %v3831_v11 = vor.u32 %v5064_v8, %v3828_v10  ;;  %v3684_v13 = vld [vmem:[#allocation7 + $0x210] sm:$0xf0]  ;;  %v5060_v15 = vld [vmem:[#allocation7 + $0x304] sm:$0xf]  ;;  %v5055_v4 = vld [vmem:[#allocation7 + $0x2d4] sm:$0xf0] }
  0x53   :  { %1083 = vmatpush.bf16.msra.mxu2 %v3751_v37  ;;  %v3687_v14 = vor.u32 %v5028_v12, %v3684_v13  ;;  %v3812_v16 = vld [vmem:[#allocation7 + $0x310] sm:$0xf0]  ;;  %v114_v18 = vld [vmem:[#allocation10] ss:$4 sm:$0xf]  ;;  %v3675_v37 = vor.u32 %v5027_v29, %v3674_v27 }
  0x54   :  { %1096 = vmatpush.bf16.msra.mxu3 %v3879_v41  ;;  %v3815_v17 = vor.u32 %v5060_v15, %v3812_v16  ;;  %v125_v19 = vperm.slane %v114_v18, 0  ;;  %v126_v20 = vperm.slane %v114_v18, 1  ;;  %v127_v31 = vperm.slane %v114_v18, 2  ;;  %v5087_v8 = vld [vmem:[#allocation7 + $0x3d4] sm:$0xf0] }
  0x55   :  { %1058 = vmatpush.bf16.msra.mxu0 %v3479_v36  ;;  %1071 = vmatpush.bf16.msra.mxu1 %v3607_v38  ;;  %v128_v33 = vperm.slane %v114_v18, 3  ;;  %v3530_v38 = vld [vmem:[#allocation7 + $0xc8] sm:$0xf]  ;;  %v4983_v10 = vld [vmem:[#allocation7 + $0x94] sm:$0xf0] }
  0x56   :  { %v3531_v52 = vor.u32 %v4991_v39, %v3530_v38  ;;  %v3626_v12 = vld [vmem:[#allocation7 + $0x188] sm:$0xf]  ;;  %v5015_v13 = vld [vmem:[#allocation7 + $0x194] sm:$0xf0] }
  0x57   :  { %1084 = vmatpush.bf16.msra.mxu2 %v3735_v49  ;;  %v3930_v49 = vld [vmem:[#allocation7 + $0x3e8] sm:$0xf]  ;;  %v5011_v26 = vld [vmem:[#allocation7 + $0x174] sm:$0xf0] }
  0x58   :  { %1097 = vmatpush.bf16.msra.mxu3 %v3863_v51  ;;  %v3931_v1 = vor.u32 %v5091_v53, %v3930_v49  ;;  %v3770_v18 = vld [vmem:[#allocation7 + $0x2a8] sm:$0xf]  ;;  %v5007_v39 = vld [vmem:[#allocation7 + $0x154] sm:$0xf0] }
  0x59   :  { %1059 = vmatpush.bf16.msra.mxu0 %v3463_v44  ;;  %1072 = vmatpush.bf16.msra.mxu1 %v3591_v45  ;;  %v3610_v25 = vld [vmem:[#allocation7 + $0x168] sm:$0xf]  ;;  %v5075_v48 = vld [vmem:[#allocation7 + $0x374] sm:$0xf0] }
  0x5a   :  { %v3754_v29 = vld [vmem:[#allocation7 + $0x288] sm:$0xf]  ;;  %v5071_v60 = vld [vmem:[#allocation7 + $0x354] sm:$0xf0] }
  0x5b   :  { %1085 = vmatpush.bf16.msra.mxu2 %v3719_v61  ;;  %v3594_v38 = vld [vmem:[#allocation7 + $0x148] sm:$0xf] }
  0x5c   :  { %1098 = vmatpush.bf16.msra.mxu3 %v3847_v63  ;;  %v3866_v47 = vld [vmem:[#allocation7 + $0x368] sm:$0xf] }
  0x5d   :  { %1060 = vmatpush.bf16.msra.mxu0 %v3447_v55  ;;  %1073 = vmatpush.bf16.msra.mxu1 %v3575_v57  ;;  %v4987_v55 = vld [vmem:[#allocation7 + $0xb4] sm:$0xf0]  ;;  %v3659_v57 = vor.u32 %v5023_v43, %v3658_v42  ;;  %v3738_v43 = vld [vmem:[#allocation7 + $0x268] sm:$0xf] }
  0x5e   :  { %v3515_v2 = vor.u32 %v4987_v55, %v3514_v54  ;;  %v3450_v49 = vld [vmem:[#allocation7 + $0x28] sm:$0xf]  ;;  %v3867_v54 = vor.u32 %v5075_v48, %v3866_v47  ;;  %v5085_v47 = vld [vmem:[#allocation7 + $0x3cc] sm:$0xf]  ;;  %v3916_v48 = vld [vmem:[#allocation7 + $0x3d8] sm:$0xf0] }
  0x5f   :  { %1086 = vmatpush.bf16.msra.mxu2 %v3703_v9  ;;  %v3498_v9 = vld [vmem:[#allocation7 + $0x88] sm:$0xf] }
  0x60   :  { %1099 = vmatpush.bf16.msra.mxu3 %v3831_v11  ;;  %v3722_v55 = vld [vmem:[#allocation7 + $0x248] sm:$0xf] }
  0x61   :  { %1061 = vmatpush.bf16.msra.mxu0 %v3431_v3  ;;  %1074 = vmatpush.bf16.msra.mxu1 %v3559_v5  ;;  %v3786_v3 = vld [vmem:[#allocation7 + $0x2c8] sm:$0xf] }
  0x62   :  { %v3914_v5 = vld [vmem:[#allocation7 + $0x3c8] sm:$0xf]  ;;  %v3787_v15 = vor.u32 %v5055_v4, %v3786_v3  ;;  %v3548_v4 = vld [vmem:[#allocation7 + $0xf8] sm:$0xf0] }
  0x63   :  { %1087 = vmatpush.bf16.msra.mxu2 %v3687_v14  ;;  %v3915_v16 = vor.u32 %v5087_v8, %v3914_v5  ;;  %v5025_v5 = vld [vmem:[#allocation7 + $0x1ec] sm:$0xf] }
  0x64   :  { %1100 = vmatpush.bf16.msra.mxu3 %v3815_v17  ;;  %v3499_v17 = vor.u32 %v4983_v10, %v3498_v9  ;;  %v3706_v9 = vld [vmem:[#allocation7 + $0x228] sm:$0xf]  ;;  %v5035_v10 = vld [vmem:[#allocation7 + $0x234] sm:$0xf0] }
  0xa1   :  { %v175_v21 = vpop.f32.mrf.mxu0  ;;  %v188_v23 = vpop.f32.mrf.mxu1 }
  0xa2   :  { %v176_v22 = vadd.f32 %v175_v21, %v125_v19  ;;  %v189_v24 = vadd.f32 %v188_v23, %v126_v20  ;;  %v5051_v19 = vld [vmem:[#allocation7 + $0x2b4] sm:$0xf0]  ;;  %v3627_v20 = vor.u32 %v5015_v13, %v3626_v12  ;;  %v3898_v21 = vld [vmem:[#allocation7 + $0x3a8] sm:$0xf] }
  0xa3   :  { %v3482_v23 = vld [vmem:[#allocation7 + $0x68] sm:$0xf]  ;;  %v3771_v27 = vor.u32 %v5051_v19, %v3770_v18  ;;  %v3707_v18 = vor.u32 %v5035_v10, %v3706_v9  ;;  %v3532_v19 = vld [vmem:[#allocation7 + $0xd8] sm:$0xf0]  ;;  %v5077_v9 = vld [vmem:[#allocation7 + $0x38c] sm:$0xf] }
  0xa4   :  { %vm218_vm2 = vcmp.ge.f32.partialorder %v176_v22, 0.0  ;;  %v222_v28 = vmul.f32 0.2, %v176_v22  ;;  %vm219_vm3 = vcmp.ge.f32.partialorder %v189_v24, 0.0  ;;  %v223_v30 = vmul.f32 0.2, %v189_v24 }
  0xa5   :  { %v3834_v13 = vld [vmem:[#allocation7 + $0x328] sm:$0xf]  ;;  %v3884_v10 = vld [vmem:[#allocation7 + $0x398] sm:$0xf0] }
  0xa6   :  { %v226_v32 = vsel %vm218_vm2, %v176_v22, %v222_v28  ;;  %v227_v36 = vsel %vm219_vm3, %v189_v24, %v223_v30  ;;  %v5083_v22 = vld [vmem:[#allocation7 + $0x3b4] sm:$0xf0]  ;;  %vm1332_vm2 = vcmask 1040384   ;;  %vm1334_vm3 = vcmask 1042434  }
  0xa7   :  { %v5637_v35 = vpack.c.bf16 %v226_v32, %v226_v32  ;;  %v5639_v40 = vpack.c.bf16 %v227_v36, %v227_v36  ;;  %v4979_v24 = vld [vmem:[#allocation7 + $0x74] sm:$0xf0]  ;;  %v3899_v28 = vor.u32 %v5083_v22, %v3898_v21  ;;  %v3611_v32 = vor.u32 %v5011_v26, %v3610_v25  ;;  %v3466_v36 = vld [vmem:[#allocation7 + $0x48] sm:$0xf]  ;;  %v3660_v21 = vld [vmem:[#allocation7 + $0x1d8] sm:$0xf0] }
  0xa8   :  { %v5047_v30 = vld [vmem:[#allocation7 + $0x294] sm:$0xf0]  ;;  %v3818_v25 = vld [vmem:[#allocation7 + $0x308] sm:$0xf] }
  0xa9   :  { %v201_v41 = vpop.f32.mrf.mxu2  ;;  %v214_v45 = vpop.f32.mrf.mxu3  ;;  %1010 = vmatmul.bf16.vlgmr.msrb.gmra.mxu0 %v5637_v35  ;;  %1023 = vmatmul.bf16.vlgmr.msrb.gmra.mxu1 %v5639_v40  ;;  %v5063_v26 = vld [vmem:[#allocation7 + $0x314] sm:$0xf0] }
  0xaa   :  { %v202_v44 = vadd.f32 %v201_v41, %v127_v31  ;;  %v177_v46 = vpop.f32.mrf.mxu0  ;;  %v215_v50 = vadd.f32 %v214_v45, %v128_v33  ;;  %1106 = vmatpush.bf16.msrb.mxu0 %v3547_v34  ;;  %v190_v51 = vpop.f32.mrf.mxu1  ;;  %1119 = vmatpush.bf16.msrb.mxu1 %v3675_v37  ;;  %v3483_v31 = vor.u32 %v4979_v24, %v3482_v23  ;;  %v3882_v33 = vld [vmem:[#allocation7 + $0x388] sm:$0xf]  ;;  %v5079_v34 = vld [vmem:[#allocation7 + $0x394] sm:$0xf0] }
  0xab   :  { %v4975_v37 = vld [vmem:[#allocation7 + $0x54] sm:$0xf0]  ;;  %v3755_v41 = vor.u32 %v5047_v30, %v3754_v29  ;;  %v3883_v42 = vor.u32 %v5079_v34, %v3882_v33  ;;  %v3595_v46 = vor.u32 %v5007_v39, %v3594_v38  ;;  %v3578_v51 = vld [vmem:[#allocation7 + $0x128] sm:$0xf]  ;;  %v4985_v33 = vld [vmem:[#allocation7 + $0xac] sm:$0xf]  ;;  %v3819_v39 = vor.u32 %v5063_v26, %v3818_v25 }
  0xac   :  { %vm220_vm4 = vcmp.ge.f32.partialorder %v202_v44, 0.0  ;;  %v224_v56 = vmul.f32 0.2, %v202_v44  ;;  %vm221_vm5 = vcmp.ge.f32.partialorder %v215_v50, 0.0  ;;  %v225_v59 = vmul.f32 0.2, %v215_v50 }
  0xad   :  { %v3467_v45 = vor.u32 %v4975_v37, %v3466_v36  ;;  %v3690_v23 = vld [vmem:[#allocation7 + $0x208] sm:$0xf]  ;;  %v5031_v24 = vld [vmem:[#allocation7 + $0x214] sm:$0xf0]  ;;  %v3516_v36 = vld [vmem:[#allocation7 + $0xb8] sm:$0xf0] }
  0xae   :  { %v228_v61 = vsel %vm220_vm4, %v202_v44, %v224_v56  ;;  %v229_v0 = vsel %vm221_vm5, %v215_v50, %v225_v59  ;;  %1107 = vmatpush.bf16.msrb.mxu0 %v3531_v52  ;;  %1120 = vmatpush.bf16.msrb.mxu1 %v3659_v57  ;;  %v5043_v44 = vld [vmem:[#allocation7 + $0x274] sm:$0xf0]  ;;  %v3850_v57 = vld [vmem:[#allocation7 + $0x348] sm:$0xf]  ;;  %v3691_v34 = vor.u32 %v5031_v24, %v3690_v23  ;;  %v5017_v37 = vld [vmem:[#allocation7 + $0x1ac] sm:$0xf] }
  0xaf   :  { %v5643_v63 = vpack.c.bf16 %v228_v61, %v228_v61  ;;  %v5645_v6 = vpack.c.bf16 %v229_v0, %v229_v0  ;;  %v4971_v50 = vld [vmem:[#allocation7 + $0x34] sm:$0xf0]  ;;  %v3739_v53 = vor.u32 %v5043_v44, %v3738_v43  ;;  %v3434_v61 = vld [vmem:[#allocation7 + $0x8] sm:$0xf]  ;;  %v3851_v8 = vor.u32 %v5071_v60, %v3850_v57  ;;  %v3644_v38 = vld [vmem:[#allocation7 + $0x1b8] sm:$0xf0] }
  0xb0   :  { %v5003_v52 = vld [vmem:[#allocation7 + $0x134] sm:$0xf0]  ;;  %v3451_v58 = vor.u32 %v4971_v50, %v3450_v49  ;;  %v3562_v0 = vld [vmem:[#allocation7 + $0x108] sm:$0xf]  ;;  %v5053_v43 = vld [vmem:[#allocation7 + $0x2cc] sm:$0xf] }
  0xb1   :  { %v203_v11 = vpop.f32.mrf.mxu2  ;;  %1036 = vmatmul.bf16.vlgmr.msrb.gmra.mxu2 %v5643_v63  ;;  %v216_v14 = vpop.f32.mrf.mxu3  ;;  %1049 = vmatmul.bf16.vlgmr.msrb.gmra.mxu3 %v5645_v6  ;;  %v5039_v56 = vld [vmem:[#allocation7 + $0x254] sm:$0xf0]  ;;  %v3579_v59 = vor.u32 %v5003_v52, %v3578_v51  ;;  %v3788_v44 = vld [vmem:[#allocation7 + $0x2d8] sm:$0xf0]  ;;  %v4981_v49 = vld [vmem:[#allocation7 + $0x8c] sm:$0xf] }
  0xb2   :  { %1132 = vmatpush.bf16.msrb.mxu2 %v3803_v62  ;;  %1145 = vmatpush.bf16.msrb.mxu3 %v3931_v1  ;;  %v4967_v62 = vld [vmem:[#allocation7 + $0x14] sm:$0xf0]  ;;  %v3723_v3 = vor.u32 %v5039_v56, %v3722_v55  ;;  %v3500_v50 = vld [vmem:[#allocation7 + $0x98] sm:$0xf0]  ;;  %v5013_v51 = vld [vmem:[#allocation7 + $0x18c] sm:$0xf] }
  0xb3   :  { %1108 = vmatpush.bf16.msrb.mxu0 %v3515_v2  ;;  %1121 = vmatpush.bf16.msrb.mxu1 %v3643_v7  ;;  %v4999_v1 = vld [vmem:[#allocation7 + $0x114] sm:$0xf0]  ;;  %v4993_v2 = vld [vmem:[#allocation7 + $0xec] sm:$0xf]  ;;  %v3676_v7 = vld [vmem:[#allocation7 + $0x1f8] sm:$0xf0]  ;;  %v3435_v11 = vor.u32 %v4967_v62, %v3434_v61  ;;  %v3503_v57 = vor.u32 %v4981_v49, %v3500_v50 }
  0xb4   :  { %v3563_v12 = vor.u32 %v4999_v1, %v3562_v0  ;;  %v5067_v14 = vld [vmem:[#allocation7 + $0x334] sm:$0xf0]  ;;  %v3628_v52 = vld [vmem:[#allocation7 + $0x198] sm:$0xf0]  ;;  %v5049_v55 = vld [vmem:[#allocation7 + $0x2ac] sm:$0xf] }
  0xb5   :  { %v3835_v22 = vor.u32 %v5067_v14, %v3834_v13  ;;  %v3772_v56 = vld [vmem:[#allocation7 + $0x2b8] sm:$0xf0]  ;;  %v4977_v61 = vld [vmem:[#allocation7 + $0x6c] sm:$0xf]  ;;  %vm1336_vm5 = vcmask 1041408  }
  0xb6   :  { %1133 = vmatpush.bf16.msrb.mxu2 %v3787_v15  ;;  %1146 = vmatpush.bf16.msrb.mxu3 %v3915_v16  ;;  %v3551_v15 = vor.u32 %v4993_v2, %v3548_v4  ;;  %v3679_v16 = vor.u32 %v5025_v5, %v3676_v7  ;;  %v3900_v60 = vld [vmem:[#allocation7 + $0x3b8] sm:$0xf0]  ;;  %v5009_v0 = vld [vmem:[#allocation7 + $0x16c] sm:$0xf]  ;;  %v3775_v2 = vor.u32 %v5049_v55, %v3772_v56 }
  0xb7   :  { %1109 = vmatpush.bf16.msrb.mxu0 %v3499_v17  ;;  %1122 = vmatpush.bf16.msrb.mxu1 %v3627_v20  ;;  %v4989_v17 = vld [vmem:[#allocation7 + $0xcc] sm:$0xf]  ;;  %v3484_v62 = vld [vmem:[#allocation7 + $0x78] sm:$0xf0] }
  0xb8   :  { %v5021_v20 = vld [vmem:[#allocation7 + $0x1cc] sm:$0xf]  ;;  %v3535_v29 = vor.u32 %v4989_v17, %v3532_v19  ;;  %v3612_v1 = vld [vmem:[#allocation7 + $0x178] sm:$0xf0]  ;;  %v3487_v7 = vor.u32 %v4977_v61, %v3484_v62 }
  0xb9   :  { %1062 = vmatmul.bf16.vlgmr.msra.gmra.mxu0 %v5637_v35  ;;  %1075 = vmatmul.bf16.vlgmr.msra.gmra.mxu1 %v5639_v40  ;;  %v3663_v30 = vor.u32 %v5021_v20, %v3660_v21  ;;  %v5045_v4 = vld [vmem:[#allocation7 + $0x28c] sm:$0xf]  ;;  %v3756_v5 = vld [vmem:[#allocation7 + $0x298] sm:$0xf0] }
  0xba   :  { %1134 = vmatpush.bf16.msrb.mxu2 %v3771_v27  ;;  %1147 = vmatpush.bf16.msrb.mxu3 %v3899_v28  ;;  %v5057_v27 = vld [vmem:[#allocation7 + $0x2ec] sm:$0xf]  ;;  %v3804_v28 = vld [vmem:[#allocation7 + $0x2f8] sm:$0xf0] }
  0xbb   :  { %1110 = vmatpush.bf16.msrb.mxu0 %v3483_v31  ;;  %1123 = vmatpush.bf16.msrb.mxu1 %v3611_v32  ;;  %v5089_v31 = vld [vmem:[#allocation7 + $0x3ec] sm:$0xf]  ;;  %v3932_v32 = vld [vmem:[#allocation7 + $0x3f8] sm:$0xf0] }
  0xbc   :  { %v5005_v13 = vld [vmem:[#allocation7 + $0x14c] sm:$0xf]  ;;  %v3596_v14 = vld [vmem:[#allocation7 + $0x158] sm:$0xf0] }
  0xbd   :  { %v5041_v17 = vld [vmem:[#allocation7 + $0x26c] sm:$0xf]  ;;  %v3599_v20 = vor.u32 %v5005_v13, %v3596_v14  ;;  %v3452_v24 = vld [vmem:[#allocation7 + $0x38] sm:$0xf0] }
  0xbe   :  { %1135 = vmatpush.bf16.msrb.mxu2 %v3755_v41  ;;  %1148 = vmatpush.bf16.msrb.mxu3 %v3883_v42  ;;  %v3807_v41 = vor.u32 %v5057_v27, %v3804_v28  ;;  %v3935_v42 = vor.u32 %v5089_v31, %v3932_v32  ;;  %v5073_v21 = vld [vmem:[#allocation7 + $0x36c] sm:$0xf]  ;;  %v3580_v26 = vld [vmem:[#allocation7 + $0x138] sm:$0xf0] }
  0xbf   :  { %1111 = vmatpush.bf16.msrb.mxu0 %v3467_v45  ;;  %1124 = vmatpush.bf16.msrb.mxu1 %v3595_v46  ;;  %v3519_v45 = vor.u32 %v4985_v33, %v3516_v36  ;;  %v3647_v46 = vor.u32 %v5017_v37, %v3644_v38  ;;  %v4969_v23 = vld [vmem:[#allocation7 + $0x2c] sm:$0xf]  ;;  %v3436_v37 = vld [vmem:[#allocation7 + $0x18] sm:$0xf0] }
  0xc0   :  { %v5001_v25 = vld [vmem:[#allocation7 + $0x12c] sm:$0xf]  ;;  %v3455_v31 = vor.u32 %v4969_v23, %v3452_v24 }
  0xc1   :  { %1088 = vmatmul.bf16.vlgmr.msra.gmra.mxu2 %v5643_v63  ;;  %1101 = vmatmul.bf16.vlgmr.msra.gmra.mxu3 %v5645_v6  ;;  %v3583_v32 = vor.u32 %v5001_v25, %v3580_v26  ;;  %v5069_v33 = vld [vmem:[#allocation7 + $0x34c] sm:$0xf] }
  0xc2   :  { %1136 = vmatpush.bf16.msrb.mxu2 %v3739_v53  ;;  %1149 = vmatpush.bf16.msrb.mxu3 %v3867_v54  ;;  %v3791_v53 = vor.u32 %v5053_v43, %v3788_v44  ;;  %v3919_v54 = vor.u32 %v5085_v47, %v3916_v48  ;;  %v4965_v36 = vld [vmem:[#allocation7 + $0xc] sm:$0xf]  ;;  %v3708_v44 = vld [vmem:[#allocation7 + $0x238] sm:$0xf0] }
  0xc3   :  { %1112 = vmatpush.bf16.msrb.mxu0 %v3451_v58  ;;  %1125 = vmatpush.bf16.msrb.mxu1 %v3579_v59  ;;  %v3631_v58 = vor.u32 %v5013_v51, %v3628_v52  ;;  %v5081_v59 = vld [vmem:[#allocation7 + $0x3ac] sm:$0xf]  ;;  %v3836_v48 = vld [vmem:[#allocation7 + $0x338] sm:$0xf0] }
  0xc4   :  { %v4997_v38 = vld [vmem:[#allocation7 + $0x10c] sm:$0xf]  ;;  %v3692_v52 = vld [vmem:[#allocation7 + $0x218] sm:$0xf0] }
  0xc5   :  { %v5033_v43 = vld [vmem:[#allocation7 + $0x22c] sm:$0xf] }
  0xc6   :  { %1137 = vmatpush.bf16.msrb.mxu2 %v3723_v3  ;;  %1150 = vmatpush.bf16.msrb.mxu3 %v3851_v8  ;;  %v3903_v3 = vor.u32 %v5081_v59, %v3900_v60  ;;  %v3615_v8 = vor.u32 %v5009_v0, %v3612_v1  ;;  %v5065_v47 = vld [vmem:[#allocation7 + $0x32c] sm:$0xf]  ;;  %v3711_v49 = vor.u32 %v5033_v43, %v3708_v44 }
  0xc7   :  { %1113 = vmatpush.bf16.msrb.mxu0 %v3435_v11  ;;  %1126 = vmatpush.bf16.msrb.mxu1 %v3563_v12  ;;  %v4973_v11 = vld [vmem:[#allocation7 + $0x4c] sm:$0xf]  ;;  %v3468_v12 = vld [vmem:[#allocation7 + $0x58] sm:$0xf0]  ;;  %v3839_v50 = vor.u32 %v5065_v47, %v3836_v48 }
  0xc8   :  { %v3471_v19 = vor.u32 %v4973_v11, %v3468_v12  ;;  %v5029_v51 = vld [vmem:[#allocation7 + $0x20c] sm:$0xf] }
  0xc9   :  { %v3695_v55 = vor.u32 %v5029_v51, %v3692_v52 }
  0xca   :  { %1138 = vmatpush.bf16.msrb.mxu2 %v3707_v18  ;;  %1151 = vmatpush.bf16.msrb.mxu3 %v3835_v22  ;;  %v3740_v18 = vld [vmem:[#allocation7 + $0x278] sm:$0xf0] }
  0xcb   :  { %1158 = vmatpush.bf16.msra.mxu0 %v3551_v15  ;;  %1171 = vmatpush.bf16.msra.mxu1 %v3679_v16  ;;  %v3759_v15 = vor.u32 %v5045_v4, %v3756_v5  ;;  %v3887_v16 = vor.u32 %v5077_v9, %v3884_v10  ;;  %v3868_v22 = vld [vmem:[#allocation7 + $0x378] sm:$0xf0]  ;;  %v3743_v27 = vor.u32 %v5041_v17, %v3740_v18  ;;  %v5574_v4 = vmov 8.0  }
  0xcc   :  { %1114 = vmatmul.bf16.vlgmr.msrb.gmra.mxu0 %v5637_v35  ;;  %1127 = vmatmul.bf16.vlgmr.msrb.gmra.mxu1 %v5639_v40  ;;  %v3871_v28 = vor.u32 %v5073_v21, %v3868_v22  ;;  %5360 = vrcp.f32 %v5574_v4 }
  0xce   :  { %1139 = vmatpush.bf16.msrb.mxu2 %v3691_v34  ;;  %1152 = vmatpush.bf16.msrb.mxu3 %v3819_v39  ;;  %v3852_v34 = vld [vmem:[#allocation7 + $0x358] sm:$0xf0] }
  0xcf   :  { %1159 = vmatpush.bf16.msra.mxu0 %v3535_v29  ;;  %1172 = vmatpush.bf16.msra.mxu1 %v3663_v30  ;;  %v5037_v29 = vld [vmem:[#allocation7 + $0x24c] sm:$0xf]  ;;  %v3724_v30 = vld [vmem:[#allocation7 + $0x258] sm:$0xf0] }
  0xd0   :  { %v3564_v39 = vld [vmem:[#allocation7 + $0x118] sm:$0xf0] }
  0xd1   :  { %1140 = vmatmul.bf16.vlgmr.msrb.gmra.mxu2 %v5643_v63  ;;  %1153 = vmatmul.bf16.vlgmr.msrb.gmra.mxu3 %v5645_v6 }
  0xd2   :  { %1184 = vmatpush.bf16.msra.mxu2 %v3807_v41  ;;  %1197 = vmatpush.bf16.msra.mxu3 %v3935_v42  ;;  %v3727_v41 = vor.u32 %v5037_v29, %v3724_v30  ;;  %v3855_v42 = vor.u32 %v5069_v33, %v3852_v34 }
  0xd3   :  { %1160 = vmatpush.bf16.msra.mxu0 %v3519_v45  ;;  %1173 = vmatpush.bf16.msra.mxu1 %v3647_v46  ;;  %v3439_v45 = vor.u32 %v4965_v36, %v3436_v37  ;;  %v3567_v46 = vor.u32 %v4997_v38, %v3564_v39 }
  0xd6   :  { %1185 = vmatpush.bf16.msra.mxu2 %v3791_v53  ;;  %1198 = vmatpush.bf16.msra.mxu3 %v3919_v54  ;;  %v5061_v53 = vld [vmem:[#allocation7 + $0x30c] sm:$0xf]  ;;  %v3820_v54 = vld [vmem:[#allocation7 + $0x318] sm:$0xf0] }
  0xd7   :  { %1161 = vmatpush.bf16.msra.mxu0 %v3503_v57  ;;  %1174 = vmatpush.bf16.msra.mxu1 %v3631_v58  ;;  %v3823_v56 = vor.u32 %v5061_v53, %v3820_v54 }
  0xda   :  { %1186 = vmatpush.bf16.msra.mxu2 %v3775_v2  ;;  %1199 = vmatpush.bf16.msra.mxu3 %v3903_v3 }
  0xdb   :  { %1162 = vmatpush.bf16.msra.mxu0 %v3487_v7  ;;  %1175 = vmatpush.bf16.msra.mxu1 %v3615_v8  ;;  %v5361_v8 = vpop.eup %5360 }
  0xdc   :  { %v1235_v12 = vmul.f32 8.0, %v5361_v8  ;;  %vm1239_vm6 = vweird.f32 %v5361_v8 }
  0xde   :  { %1187 = vmatpush.bf16.msra.mxu2 %v3759_v15  ;;  %1200 = vmatpush.bf16.msra.mxu3 %v3887_v16  ;;  %v1236_v18 = vsub.f32 1.0, %v1235_v12 }
  0xdf   :  { %1163 = vmatpush.bf16.msra.mxu0 %v3471_v19  ;;  %1176 = vmatpush.bf16.msra.mxu1 %v3599_v20 }
  0xe0   :  { %v1237_v24 = vmul.f32 %v5361_v8, %v1236_v18 }
  0xe2   :  { %1188 = vmatpush.bf16.msra.mxu2 %v3743_v27  ;;  %1201 = vmatpush.bf16.msra.mxu3 %v3871_v28  ;;  %v1238_v30 = vadd.f32 %v5361_v8, %v1237_v24  ;;  %v5272_v24 = vld [vmem:[#allocation8 + $0x59c] sm:$0xf0] }
  0xe3   :  { %1164 = vmatpush.bf16.msra.mxu0 %v3455_v31  ;;  %1177 = vmatpush.bf16.msra.mxu1 %v3583_v32 }
  0xe4   :  { %v5669_v36 = vsel %vm1239_vm6, %v5361_v8, %v1238_v30 }
  0xe6   :  { %1189 = vmatpush.bf16.msra.mxu2 %v3727_v41  ;;  %1202 = vmatpush.bf16.msra.mxu3 %v3855_v42 }
  0xe7   :  { %1165 = vmatpush.bf16.msra.mxu0 %v3439_v45  ;;  %1178 = vmatpush.bf16.msra.mxu1 %v3567_v46 }
  0xea   :  { %1190 = vmatpush.bf16.msra.mxu2 %v3711_v49  ;;  %1203 = vmatpush.bf16.msra.mxu3 %v3839_v50 }
  0xeb   :  { %1166 = vmatmul.bf16.vlgmr.msra.gmra.mxu0 %v5637_v35  ;;  %1179 = vmatmul.bf16.vlgmr.msra.gmra.mxu1 %v5639_v40 }
  0xee   :  { %1191 = vmatpush.bf16.msra.mxu2 %v3695_v55  ;;  %1204 = vmatpush.bf16.msra.mxu3 %v3823_v56 }
  0xf1   :  { %1192 = vmatmul.bf16.vlgmr.msra.gmra.mxu2 %v5643_v63  ;;  %1205 = vmatmul.bf16.vlgmr.msra.gmra.mxu3 %v5645_v6 }
 0x126   :  { %v1011_v57 = vpop.f32.mrf.mxu0  ;;  %v1024_v58 = vpop.f32.mrf.mxu1 }
 0x127   :  { %v1025_v59 = vadd.f32 %v1024_v58, %v1011_v57 }
 0x12e   :  { %v1013_v60 = vpop.f32.mrf.mxu0  ;;  %v1026_v61 = vpop.f32.mrf.mxu1 }
 0x134   :  { %v1037_v62 = vpop.f32.mrf.mxu2  ;;  %v1050_v1 = vpop.f32.mrf.mxu3 }
 0x135   :  { %v1038_v0 = vadd.f32 %v1037_v62, %v1025_v59  ;;  %v4162_v62 = vld [vmem:[#allocation8 + $0x1c0] sm:$0xf] }
 0x136   :  { %v1063_v35 = vpop.f32.mrf.mxu0  ;;  %v1076_v3 = vpop.f32.mrf.mxu1 }
 0x137   :  { %v5661_v2 = vadd.f32 %v1050_v1, %v1038_v0  ;;  %v1077_v9 = vadd.f32 %v1076_v3, %v1063_v35  ;;  %v5152_v0 = vld [vmem:[#allocation8 + $0x1dc] sm:$0xf0] }
 0x138   :  { %v4418_v1 = vld [vmem:[#allocation8 + $0x3c0] sm:$0xf]  ;;  %v4163_v4 = vor.u32 %v5152_v0, %v4162_v62 }
 0x139   :  { %v1210_v63 = vrot.slane %v5661_v2, 4  ;;  %v4322_v0 = vld [vmem:[#allocation8 + $0x300] sm:$0xf] }
 0x13a   :  { %2952 = vmatpush.bf16.msrb.mxu0 %v4163_v4  ;;  %v4578_v4 = vld [vmem:[#allocation8 + $0x500] sm:$0xf] }
 0x13b   :  { %v1211_v10 = vadd.f32 %v1210_v63, %v5661_v2  ;;  %v5280_v63 = vld [vmem:[#allocation8 + $0x5dc] sm:$0xf0] }
 0x13c   :  { %v1039_v40 = vpop.f32.mrf.mxu2  ;;  %v1052_v5 = vpop.f32.mrf.mxu3 }
 0x13d   :  { %v1212_v16 = vrot.slane %v1211_v10, 2  ;;  %v5216_v40 = vld [vmem:[#allocation8 + $0x3dc] sm:$0xf0] }
 0x13e   :  { %v1065_v7 = vpop.f32.mrf.mxu0  ;;  %v1078_v6 = vpop.f32.mrf.mxu1  ;;  %v4674_v5 = vld [vmem:[#allocation8 + $0x5c0] sm:$0xf] }
 0x13f   :  { %v1213_v22 = vadd.f32 %v1212_v16, %v1211_v10  ;;  %v4419_v7 = vor.u32 %v5216_v40, %v4418_v1  ;;  %v4930_v6 = vld [vmem:[#allocation8 + $0x7c0] sm:$0xf]  ;;  %v4675_v10 = vor.u32 %v5280_v63, %v4674_v5 }
 0x140   :  { %v4386_v16 = vld [vmem:[#allocation8 + $0x380] sm:$0xf] }
 0x141   :  { %v1214_v28 = vrot.slane %v1213_v22, 1  ;;  %2965 = vmatpush.bf16.msrb.mxu1 %v4419_v7  ;;  %2978 = vmatpush.bf16.msrb.mxu2 %v4675_v10  ;;  %v5192_v1 = vld [vmem:[#allocation8 + $0x31c] sm:$0xf0] }
 0x142   :  { %v4834_v40 = vld [vmem:[#allocation8 + $0x700] sm:$0xf] }
 0x143   :  { %v1215_v33 = vadd.f32 %v1214_v28, %v1213_v22  ;;  %v4034_v10 = vld [vmem:[#allocation8 + $0xc0] sm:$0xf] }
 0x144   :  { %v1089_v11 = vpop.f32.mrf.mxu2  ;;  %v1102_v14 = vpop.f32.mrf.mxu3 }
 0x145   :  { %v1090_v13 = vadd.f32 %v1089_v11, %v1077_v9  ;;  %v5672_v42 = vmul.f32 %v5669_v36, %v1215_v33  ;;  %v5344_v11 = vld [vmem:[#allocation8 + $0x7dc] sm:$0xf0] }
 0x146   :  { %v4931_v12 = vor.u32 %v5344_v11, %v4930_v6  ;;  %v5136_v33 = vld [vmem:[#allocation8 + $0x15c] sm:$0xf0] }
 0x147   :  { %v5665_v15 = vadd.f32 %v1102_v14, %v1090_v13  ;;  %v1245_v46 = vsub.f32 %v5661_v2, %v5672_v42  ;;  %v4130_v13 = vld [vmem:[#allocation8 + $0x180] sm:$0xf] }
 0x148   :  { %v5144_v14 = vld [vmem:[#allocation8 + $0x19c] sm:$0xf0]  ;;  %2991 = vmatpush.bf16.msrb.mxu3 %v4931_v12 }
 0x149   :  { %v1115_v17 = vpop.f32.mrf.mxu0  ;;  %v1216_v19 = vrot.slane %v5665_v15, 4  ;;  %v1128_v20 = vpop.f32.mrf.mxu1  ;;  %v1249_v52 = vmul.f32 %v1245_v46, %v1245_v46  ;;  %v5120_v11 = vld [vmem:[#allocation8 + $0xdc] sm:$0xf0] }
 0x14a   :  { %v1129_v34 = vadd.f32 %v1128_v20, %v1115_v17  ;;  %v5208_v20 = vld [vmem:[#allocation8 + $0x39c] sm:$0xf0] }
 0x14b   :  { %v1217_v21 = vadd.f32 %v1216_v19, %v5665_v15  ;;  %v1253_v56 = vrot.slane %v1249_v52, 4  ;;  %v4131_v19 = vor.u32 %v5144_v14, %v4130_v13  ;;  %v4290_v12 = vld [vmem:[#allocation8 + $0x2c0] sm:$0xf] }
 0x14c   :  { %v1091_v23 = vpop.f32.mrf.mxu2  ;;  %v1104_v26 = vpop.f32.mrf.mxu3 }
 0x14d   :  { %v1218_v25 = vrot.slane %v1217_v21, 2  ;;  %v1254_v35 = vadd.f32 %v1253_v56, %v1249_v52  ;;  %v4387_v23 = vor.u32 %v5208_v20, %v4386_v16  ;;  %v5336_v26 = vld [vmem:[#allocation8 + $0x79c] sm:$0xf0]  ;;  %2953 = vmatpush.bf16.msrb.mxu0 %v4131_v19  ;;  %v4035_v16 = vor.u32 %v5120_v11, %v4034_v10 }
 0x14f   :  { %v1219_v27 = vadd.f32 %v1218_v25, %v1217_v21  ;;  %v1255_v17 = vrot.slane %v1254_v35, 2  ;;  %v4642_v21 = vld [vmem:[#allocation8 + $0x580] sm:$0xf]  ;;  %2966 = vmatpush.bf16.msrb.mxu1 %v4387_v23 }
 0x150   :  { %v4898_v25 = vld [vmem:[#allocation8 + $0x780] sm:$0xf]  ;;  %v4643_v30 = vor.u32 %v5272_v24, %v4642_v21 }
 0x151   :  { %v1117_v29 = vpop.f32.mrf.mxu0  ;;  %v1130_v31 = vpop.f32.mrf.mxu1  ;;  %v1220_v32 = vrot.slane %v1219_v27, 1  ;;  %v5248_v21 = vld [vmem:[#allocation8 + $0x4dc] sm:$0xf0] }
 0x152   :  { %v4899_v31 = vor.u32 %v5336_v26, %v4898_v25  ;;  %2979 = vmatpush.bf16.msrb.mxu2 %v4643_v30  ;;  %v5312_v23 = vld [vmem:[#allocation8 + $0x6dc] sm:$0xf0] }
 0x153   :  { %v1221_v39 = vadd.f32 %v1220_v32, %v1219_v27  ;;  %v4098_v32 = vld [vmem:[#allocation8 + $0x140] sm:$0xf] }
 0x154   :  { %v1141_v37 = vpop.f32.mrf.mxu2  ;;  %v1154_v38 = vpop.f32.mrf.mxu3  ;;  %2992 = vmatpush.bf16.msrb.mxu3 %v4899_v31  ;;  %v4002_v30 = vld [vmem:[#allocation8 + $0x80] sm:$0xf] }
 0x155   :  { %v1142_v41 = vadd.f32 %v1141_v37, %v1129_v34  ;;  %v5677_v44 = vmul.f32 %v5669_v36, %v1221_v39  ;;  %v4354_v34 = vld [vmem:[#allocation8 + $0x340] sm:$0xf]  ;;  %v4099_v39 = vor.u32 %v5136_v33, %v4098_v32 }
 0x156   :  { %v5112_v31 = vld [vmem:[#allocation8 + $0x9c] sm:$0xf0] }
 0x157   :  { %v5674_v43 = vadd.f32 %v1154_v38, %v1142_v41  ;;  %v1246_v50 = vsub.f32 %v5665_v15, %v5677_v44  ;;  %v5200_v41 = vld [vmem:[#allocation8 + $0x35c] sm:$0xf0]  ;;  %2954 = vmatpush.bf16.msrb.mxu0 %v4099_v39 }
 0x158   :  { %v4258_v32 = vld [vmem:[#allocation8 + $0x280] sm:$0xf] }
 0x159   :  { %v1222_v45 = vrot.slane %v5674_v43, 4  ;;  %v1250_v54 = vmul.f32 %v1246_v50, %v1246_v50  ;;  %v5328_v50 = vld [vmem:[#allocation8 + $0x75c] sm:$0xf0] }
 0x15a   :  { %v5240_v39 = vld [vmem:[#allocation8 + $0x49c] sm:$0xf0] }
 0x15b   :  { %v1223_v47 = vadd.f32 %v1222_v45, %v5674_v43  ;;  %v1259_v59 = vrot.slane %v1250_v54, 4  ;;  %v4610_v45 = vld [vmem:[#allocation8 + $0x540] sm:$0xf] }
 0x15c   :  { %v1143_v48 = vpop.f32.mrf.mxu2  ;;  %v1156_v49 = vpop.f32.mrf.mxu3 }
 0x15d   :  { %v1224_v51 = vrot.slane %v1223_v47, 2  ;;  %v1260_v8 = vadd.f32 %v1259_v59, %v1250_v54  ;;  %v5264_v48 = vld [vmem:[#allocation8 + $0x55c] sm:$0xf0] }
 0x15e   :  { %v4866_v49 = vld [vmem:[#allocation8 + $0x740] sm:$0xf] }
 0x15f   :  { %v1225_v53 = vadd.f32 %v1224_v51, %v1223_v47  ;;  %v1261_v27 = vrot.slane %v1260_v8, 2  ;;  %v4355_v47 = vor.u32 %v5200_v41, %v4354_v34  ;;  %v1256_v51 = vadd.f32 %v1255_v17, %v1254_v35  ;;  %v5256_v35 = vld [vmem:[#allocation8 + $0x51c] sm:$0xf0] }
 0x160   :  { %v4867_v56 = vor.u32 %v5328_v50, %v4866_v49  ;;  %v4579_v6 = vor.u32 %v5256_v35, %v4578_v4  ;;  %v5184_v17 = vld [vmem:[#allocation8 + $0x2dc] sm:$0xf0]  ;;  %v4003_v41 = vor.u32 %v5112_v31, %v4002_v30  ;;  %v4676_v31 = vld [vmem:[#allocation8 + $0x5e0] sm:$0xf0] }
 0x161   :  { %v1226_v55 = vrot.slane %v1225_v53, 1  ;;  %v1262_v52 = vadd.f32 %v1261_v27, %v1260_v8  ;;  %2967 = vmatpush.bf16.msrb.mxu1 %v4355_v47  ;;  %v1257_v5 = vrot.slane %v1256_v51, 1  ;;  %v5320_v8 = vld [vmem:[#allocation8 + $0x71c] sm:$0xf0]  ;;  %v4291_v20 = vor.u32 %v5184_v17, %v4290_v12 }
 0x162   :  { %2993 = vmatpush.bf16.msrb.mxu3 %v4867_v56  ;;  %v4770_v47 = vld [vmem:[#allocation8 + $0x680] sm:$0xf] }
 0x163   :  { %v1227_v57 = vadd.f32 %v1226_v55, %v1225_v53  ;;  %v4611_v55 = vor.u32 %v5264_v48, %v4610_v45  ;;  %v1263_v7 = vrot.slane %v1262_v52, 1  ;;  %v1258_v24 = vadd.f32 %v1257_v5, %v1256_v51  ;;  %v5304_v48 = vld [vmem:[#allocation8 + $0x69c] sm:$0xf0] }
 0x164   :  { %v4738_v4 = vld [vmem:[#allocation8 + $0x640] sm:$0xf] }
 0x165   :  { %v5686_v60 = vmul.f32 %v5669_v36, %v1227_v57  ;;  %v4066_v57 = vld [vmem:[#allocation8 + $0x100] sm:$0xf]  ;;  %2980 = vmatpush.bf16.msrb.mxu2 %v4611_v55  ;;  %v1264_v25 = vadd.f32 %v1263_v7, %v1262_v52  ;;  %v1277_v49 = vmul.f32 %v1258_v24, %v5669_v36  ;;  %v4771_v52 = vor.u32 %v5304_v48, %v4770_v47  ;;  %v4164_v24 = vld [vmem:[#allocation8 + $0x1e0] sm:$0xf0] }
 0x166   :  { %v4226_v55 = vld [vmem:[#allocation8 + $0x240] sm:$0xf]  ;;  %v4388_v47 = vld [vmem:[#allocation8 + $0x3a0] sm:$0xf0] }
 0x167   :  { %v1247_v3 = vsub.f32 %v5674_v43, %v5686_v60  ;;  %v1278_v50 = vmul.f32 %v1264_v25, %v5669_v36  ;;  %v5296_v35 = vld [vmem:[#allocation8 + $0x65c] sm:$0xf0]  ;;  %v5212_v25 = vld [vmem:[#allocation8 + $0x3c4] sm:$0xf] }
 0x168   :  { %v1167_v58 = vpop.f32.mrf.mxu0  ;;  %v1180_v61 = vpop.f32.mrf.mxu1  ;;  %v5224_v17 = vld [vmem:[#allocation8 + $0x41c] sm:$0xf0]  ;;  %v5268_v48 = vld [vmem:[#allocation8 + $0x584] sm:$0xf] }
 0x169   :  { %v1251_v9 = vmul.f32 %v1247_v3, %v1247_v3  ;;  %v1181_v38 = vadd.f32 %v1180_v61, %v1167_v58  ;;  %v5128_v58 = vld [vmem:[#allocation8 + $0x11c] sm:$0xf0]  ;;  %v4323_v3 = vor.u32 %v5192_v1, %v4322_v0  ;;  %2981 = vmatpush.bf16.msrb.mxu2 %v4579_v6  ;;  %v5699_v5 = vadd.f32 1e-05, %v1278_v50 }
 0x16a   :  { %v4067_v62 = vor.u32 %v5128_v58, %v4066_v57  ;;  %v5232_v0 = vld [vmem:[#allocation8 + $0x45c] sm:$0xf0] }
 0x16b   :  { %v1265_v18 = vrot.slane %v1251_v9, 4  ;;  %2968 = vmatpush.bf16.msrb.mxu1 %v4323_v3  ;;  %v3938_v6 = vld [vmem:[#allocation8] sm:$0xf]  ;;  %5362 = vrsqrt.f32 %v5699_v5  ;;  %vm1301_vm8 = vweird.f32 %v5699_v5 }
 0x16c   :  { %2955 = vmatpush.bf16.msrb.mxu0 %v4067_v62  ;;  %v4482_v62 = vld [vmem:[#allocation8 + $0x440] sm:$0xf] }
 0x16d   :  { %v1266_v28 = vadd.f32 %v1265_v18, %v1251_v9  ;;  %v4835_v9 = vor.u32 %v5320_v8, %v4834_v40  ;;  %v4546_v18 = vld [vmem:[#allocation8 + $0x4c0] sm:$0xf]  ;;  %v4483_v3 = vor.u32 %v5232_v0, %v4482_v62  ;;  %v5697_v40 = vadd.f32 1e-05, %v1277_v49  ;;  %v4644_v49 = vld [vmem:[#allocation8 + $0x5a0] sm:$0xf0] }
 0x16e   :  { %v5096_v8 = vld [vmem:[#allocation8 + $0x1c] sm:$0xf0] }
 0x16f   :  { %v1267_v37 = vrot.slane %v1266_v28, 2  ;;  %2994 = vmatpush.bf16.msrb.mxu3 %v4835_v9  ;;  %2969 = vmatpush.bf16.msrb.mxu1 %v4291_v20  ;;  %v4194_v9 = vld [vmem:[#allocation8 + $0x200] sm:$0xf]  ;;  %v3939_v12 = vor.u32 %v5096_v8, %v3938_v6  ;;  %5364 = vrsqrt.f32 %v5697_v40  ;;  %v4612_v6 = vld [vmem:[#allocation8 + $0x560] sm:$0xf0]  ;;  %vm1291_vm1 = vweird.f32 %v5697_v40 }
 0x170   :  { %v1169_v22 = vpop.f32.mrf.mxu0  ;;  %v1182_v29 = vpop.f32.mrf.mxu1  ;;  %2956 = vmatpush.bf16.msrb.mxu0 %v4035_v16  ;;  %v5324_v8 = vld [vmem:[#allocation8 + $0x744] sm:$0xf] }
 0x171   :  { %v1268_v59 = vadd.f32 %v1267_v37, %v1266_v28  ;;  %v4802_v22 = vld [vmem:[#allocation8 + $0x6c0] sm:$0xf]  ;;  %v4547_v28 = vor.u32 %v5248_v21, %v4546_v18  ;;  %v5711_v50 = vpop.eup %5362 }
 0x172   :  { %v4803_v29 = vor.u32 %v5312_v23, %v4802_v22  ;;  %v5176_v37 = vld [vmem:[#allocation8 + $0x29c] sm:$0xf0]  ;;  %v5148_v23 = vld [vmem:[#allocation8 + $0x1c4] sm:$0xf]  ;;  %vm1302_vm7 = vweird.f32 %v5711_v50 }
 0x173   :  { %v1269_v13 = vrot.slane %v1268_v59, 1  ;;  %2982 = vmatpush.bf16.msrb.mxu2 %v4547_v28  ;;  %v4259_v45 = vor.u32 %v5176_v37, %v4258_v32  ;;  %v4706_v18 = vld [vmem:[#allocation8 + $0x600] sm:$0xf]  ;;  %v5276_v28 = vld [vmem:[#allocation8 + $0x5c4] sm:$0xf]  ;;  %vm5738_vm10 = vmor %vm1301_vm8, %vm1302_vm7 }
 0x174   :  { %v1193_v46 = vpop.f32.mrf.mxu2  ;;  %v1206_v54 = vpop.f32.mrf.mxu3  ;;  %2995 = vmatpush.bf16.msrb.mxu3 %v4803_v29  ;;  %2957 = vmatpush.bf16.msrb.mxu0 %v4003_v41  ;;  %v5340_v32 = vld [vmem:[#allocation8 + $0x7c4] sm:$0xf] }
 0x175   :  { %v1194_v53 = vadd.f32 %v1193_v46, %v1181_v38  ;;  %v1270_v33 = vadd.f32 %v1269_v13, %v1268_v59  ;;  %v4514_v38 = vld [vmem:[#allocation8 + $0x480] sm:$0xf]  ;;  %2970 = vmatpush.bf16.msrb.mxu1 %v4259_v45  ;;  %v5140_v37 = vld [vmem:[#allocation8 + $0x184] sm:$0xf] }
 0x176   :  { %v4515_v46 = vor.u32 %v5240_v39, %v4514_v38  ;;  %v5168_v59 = vld [vmem:[#allocation8 + $0x25c] sm:$0xf0]  ;;  %v4132_v41 = vld [vmem:[#allocation8 + $0x1a0] sm:$0xf0] }
 0x177   :  { %v5690_v61 = vadd.f32 %v1206_v54, %v1194_v53  ;;  %v3970_v53 = vld [vmem:[#allocation8 + $0x40] sm:$0xf]  ;;  %v1279_v56 = vmul.f32 %v1270_v33, %v5669_v36  ;;  %v4227_v1 = vor.u32 %v5168_v59, %v4226_v55  ;;  %v4679_v33 = vor.u32 %v5276_v28, %v4676_v31  ;;  %v5204_v45 = vld [vmem:[#allocation8 + $0x384] sm:$0xf] }
 0x178   :  { %v5104_v54 = vld [vmem:[#allocation8 + $0x5c] sm:$0xf0]  ;;  %2983 = vmatpush.bf16.msrb.mxu2 %v4515_v46  ;;  %2996 = vmatpush.bf16.msrb.mxu3 %v4771_v52  ;;  %v4135_v46 = vor.u32 %v5140_v37, %v4132_v41  ;;  %v4391_v52 = vor.u32 %v5204_v45, %v4388_v47  ;;  %v4900_v55 = vld [vmem:[#allocation8 + $0x7a0] sm:$0xf0] }
 0x179   :  { %v1228_v63 = vrot.slane %v5690_v61, 4  ;;  %v3971_v58 = vor.u32 %v5104_v54, %v3970_v53  ;;  %2971 = vmatpush.bf16.msrb.mxu1 %v4227_v1  ;;  %v5704_v10 = vadd.f32 1e-05, %v1279_v56  ;;  %v5160_v13 = vld [vmem:[#allocation8 + $0x21c] sm:$0xf0]  ;;  %v4647_v53 = vor.u32 %v5268_v48, %v4644_v49 }
 0x17a   :  { %v4195_v16 = vor.u32 %v5160_v13, %v4194_v9  ;;  %v5332_v54 = vld [vmem:[#allocation8 + $0x784] sm:$0xf] }
 0x17b   :  { %v1229_v14 = vadd.f32 %v1228_v63, %v5690_v61  ;;  %v4739_v63 = vor.u32 %v5296_v35, %v4738_v4  ;;  %2958 = vmatpush.bf16.msrb.mxu0 %v3971_v58  ;;  %5366 = vrsqrt.f32 %v5704_v10  ;;  %v4903_v56 = vor.u32 %v5332_v54, %v4900_v55  ;;  %v4100_v58 = vld [vmem:[#allocation8 + $0x160] sm:$0xf0]  ;;  %v5713_v4 = vpop.eup %5364 }
 0x17c   :  { %v1195_v19 = vpop.f32.mrf.mxu2  ;;  %v1208_v27 = vpop.f32.mrf.mxu3  ;;  %2984 = vmatpush.bf16.msrb.mxu2 %v4483_v3  ;;  %v5196_v59 = vld [vmem:[#allocation8 + $0x344] sm:$0xf]  ;;  %v1296_v35 = vmul.f32 %v5711_v50, %v5699_v5  ;;  %vm1311_vm11 = vweird.f32 %v5704_v10  ;;  %vm1292_vm13 = vweird.f32 %v5713_v4 }
 0x17d   :  { %v1230_v26 = vrot.slane %v1229_v14, 2  ;;  %2997 = vmatpush.bf16.msrb.mxu3 %v4739_v63  ;;  %v5288_v19 = vld [vmem:[#allocation8 + $0x61c] sm:$0xf0]  ;;  %2972 = vmatpush.bf16.msrb.mxu1 %v4195_v16  ;;  %v4420_v27 = vld [vmem:[#allocation8 + $0x3e0] sm:$0xf0]  ;;  %vm1293_vm4 = vmor %vm1291_vm1, %vm1292_vm13 }
 0x17e   :  { %v4707_v22 = vor.u32 %v5288_v19, %v4706_v18  ;;  %v4423_v30 = vor.u32 %v5212_v25, %v4420_v27  ;;  %v4356_v1 = vld [vmem:[#allocation8 + $0x360] sm:$0xf0]  ;;  %v1286_v27 = vmul.f32 %v5713_v4, %v5697_v40  ;;  %v1297_v28 = vmul.f32 %v5711_v50, %v1296_v35 }
 0x17f   :  { %v1231_v34 = vadd.f32 %v1230_v26, %v1229_v14  ;;  %v4450_v14 = vld [vmem:[#allocation8 + $0x400] sm:$0xf]  ;;  %2959 = vmatpush.bf16.msrb.mxu0 %v3939_v12  ;;  %v4167_v26 = vor.u32 %v5148_v23, %v4164_v24  ;;  %v5260_v3 = vld [vmem:[#allocation8 + $0x544] sm:$0xf]  ;;  %v4359_v63 = vor.u32 %v5196_v59, %v4356_v1 }
 0x180   :  { %v4451_v21 = vor.u32 %v5224_v17, %v4450_v14  ;;  %v4868_v9 = vld [vmem:[#allocation8 + $0x760] sm:$0xf0]  ;;  %v4615_v13 = vor.u32 %v5260_v3, %v4612_v6 }
 0x181   :  { %v1232_v51 = vrot.slane %v1231_v34, 1  ;;  %2998 = vmatpush.bf16.msrb.mxu3 %v4707_v22  ;;  %3017 = vmatpush.bf16.msra.mxu1 %v4423_v30  ;;  %v4871_v14 = vor.u32 %v5324_v8, %v4868_v9  ;;  %v5124_v16 = vld [vmem:[#allocation8 + $0x104] sm:$0xf] }
 0x182   :  { %2985 = vmatpush.bf16.msrb.mxu2 %v4451_v21  ;;  %v4068_v17 = vld [vmem:[#allocation8 + $0x120] sm:$0xf0] }
 0x183   :  { %v1233_v57 = vadd.f32 %v1232_v51, %v1231_v34  ;;  %v4932_v34 = vld [vmem:[#allocation8 + $0x7e0] sm:$0xf0]  ;;  %3004 = vmatpush.bf16.msra.mxu0 %v4167_v26  ;;  %v4071_v22 = vor.u32 %v5124_v16, %v4068_v17 }
 0x184   :  { %v4935_v39 = vor.u32 %v5340_v32, %v4932_v34  ;;  %v5188_v18 = vld [vmem:[#allocation8 + $0x304] sm:$0xf] }
 0x185   :  { %v5702_v7 = vmul.f32 %v5669_v36, %v1233_v57  ;;  %v5132_v57 = vld [vmem:[#allocation8 + $0x144] sm:$0xf]  ;;  %3018 = vmatpush.bf16.msra.mxu1 %v4391_v52  ;;  %v1298_v52 = vmul.f32 0.5, %v1297_v28 }
 0x186   :  { %3030 = vmatpush.bf16.msra.mxu2 %v4679_v33  ;;  %3043 = vmatpush.bf16.msra.mxu3 %v4935_v39  ;;  %v4103_v0 = vor.u32 %v5132_v57, %v4100_v58  ;;  %v4324_v19 = vld [vmem:[#allocation8 + $0x320] sm:$0xf0] }
 0x187   :  { %v1248_v11 = vsub.f32 %v5690_v61, %v5702_v7  ;;  %3005 = vmatpush.bf16.msra.mxu0 %v4135_v46  ;;  %v4327_v23 = vor.u32 %v5188_v18, %v4324_v19  ;;  %v4580_v24 = vld [vmem:[#allocation8 + $0x520] sm:$0xf0]  ;;  %v1299_v6 = vsub.f32 1.5, %v1298_v52 }
 0x188   :  { %v5316_v25 = vld [vmem:[#allocation8 + $0x704] sm:$0xf] }
 0x189   :  { %v1252_v20 = vmul.f32 %v1248_v11, %v1248_v11  ;;  %v5717_v11 = vpop.eup %5366  ;;  %3019 = vmatpush.bf16.msra.mxu1 %v4359_v63  ;;  %v4836_v26 = vld [vmem:[#allocation8 + $0x720] sm:$0xf0] }
 0x18a   :  { %3031 = vmatpush.bf16.msra.mxu2 %v4647_v53  ;;  %3044 = vmatpush.bf16.msra.mxu3 %v4903_v56  ;;  %v4839_v32 = vor.u32 %v5316_v25, %v4836_v26  ;;  %v5116_v33 = vld [vmem:[#allocation8 + $0xc4] sm:$0xf]  ;;  %vm1312_vm9 = vweird.f32 %v5717_v11 }
 0x18b   :  { %v1271_v29 = vrot.slane %v1252_v20, 4  ;;  %3006 = vmatpush.bf16.msra.mxu0 %v4103_v0  ;;  %v4036_v34 = vld [vmem:[#allocation8 + $0xe0] sm:$0xf0]  ;;  %vm5747_vm14 = vmor %vm1311_vm11, %vm1312_vm9 }
 0x18c   :  { %v5180_v37 = vld [vmem:[#allocation8 + $0x2c4] sm:$0xf]  ;;  %v4039_v46 = vor.u32 %v5116_v33, %v4036_v34 }
 0x18d   :  { %v1272_v38 = vadd.f32 %v1271_v29, %v1252_v20  ;;  %v5252_v20 = vld [vmem:[#allocation8 + $0x504] sm:$0xf]  ;;  %v1306_v29 = vmul.f32 %v5717_v11, %v5704_v10  ;;  %3020 = vmatpush.bf16.msra.mxu1 %v4327_v23 }
 0x18e   :  { %3032 = vmatpush.bf16.msra.mxu2 %v4615_v13  ;;  %v4583_v30 = vor.u32 %v5252_v20, %v4580_v24  ;;  %3045 = vmatpush.bf16.msra.mxu3 %v4871_v14  ;;  %v5244_v39 = vld [vmem:[#allocation8 + $0x4c4] sm:$0xf] }
 0x18f   :  { %v1273_v51 = vrot.slane %v1272_v38, 2  ;;  %v4548_v41 = vld [vmem:[#allocation8 + $0x4e0] sm:$0xf0]  ;;  %3007 = vmatpush.bf16.msra.mxu0 %v4071_v22 }
 0x190   :  { %v5308_v48 = vld [vmem:[#allocation8 + $0x6c4] sm:$0xf]  ;;  %v4551_v53 = vor.u32 %v5244_v39, %v4548_v41 }
 0x191   :  { %v1274_v62 = vadd.f32 %v1273_v51, %v1272_v38  ;;  %v4292_v38 = vld [vmem:[#allocation8 + $0x2e0] sm:$0xf0]  ;;  %v1287_v51 = vmul.f32 %v5713_v4, %v1286_v27 }
 0x192   :  { %v4295_v47 = vor.u32 %v5180_v37, %v4292_v38  ;;  %v4804_v49 = vld [vmem:[#allocation8 + $0x6e0] sm:$0xf0]  ;;  %3033 = vmatpush.bf16.msra.mxu2 %v4583_v30  ;;  %3046 = vmatpush.bf16.msra.mxu3 %v4839_v32  ;;  %v1300_v32 = vmul.f32 %v5711_v50, %v1299_v6 }
 0x193   :  { %v1275_v12 = vrot.slane %v1274_v62, 1  ;;  %v4807_v54 = vor.u32 %v5308_v48, %v4804_v49  ;;  %v5108_v55 = vld [vmem:[#allocation8 + $0x84] sm:$0xf]  ;;  %3008 = vmatpush.bf16.msra.mxu0 %v4039_v46  ;;  %v1288_v63 = vmul.f32 0.5, %v1287_v51 }
 0x194   :  { %v4004_v56 = vld [vmem:[#allocation8 + $0xa0] sm:$0xf0]  ;;  %3021 = vmatpush.bf16.msra.mxu1 %v4295_v47 }
 0x195   :  { %v1276_v21 = vadd.f32 %v1275_v12, %v1274_v62  ;;  %v5172_v57 = vld [vmem:[#allocation8 + $0x284] sm:$0xf]  ;;  %v4007_v0 = vor.u32 %v5108_v55, %v4004_v56  ;;  %v1289_v28 = vsub.f32 1.5, %v1288_v63 }
 0x196   :  { %v4260_v58 = vld [vmem:[#allocation8 + $0x2a0] sm:$0xf0]  ;;  %3034 = vmatpush.bf16.msra.mxu2 %v4551_v53  ;;  %3047 = vmatpush.bf16.msra.mxu3 %v4807_v54  ;;  %v1304_v53 = vsel %vm5738_vm10, %v5711_v50, %v1300_v32  ;;  %v5153_v32 = vld [vmem:[#allocation8 + $0x1e4] sm:$0xf0] }
 0x197   :  { %v1280_v31 = vmul.f32 %v1276_v21, %v5669_v36  ;;  %v1307_v36 = vmul.f32 %v5717_v11, %v1306_v29  ;;  %v5236_v59 = vld [vmem:[#allocation8 + $0x484] sm:$0xf]  ;;  %v4263_v1 = vor.u32 %v5172_v57, %v4260_v58  ;;  %3009 = vmatpush.bf16.msra.mxu0 %v4007_v0  ;;  %v1290_v56 = vmul.f32 %v5713_v4, %v1289_v28 }
 0x198   :  { %v4516_v62 = vld [vmem:[#allocation8 + $0x4a0] sm:$0xf0]  ;;  %v1329_v10 = vrot.slane %v1304_v53, 7  ;;  %v4138_v53 = vld [vmem:[#allocation8 + $0x188] sm:$0xf] }
 0x199   :  { %v5725_v45 = vadd.f32 1e-05, %v1280_v31  ;;  %v5300_v3 = vld [vmem:[#allocation8 + $0x684] sm:$0xf]  ;;  %v1308_v8 = vmul.f32 0.5, %v1307_v36  ;;  %v4519_v9 = vor.u32 %v5236_v59, %v4516_v62  ;;  %3022 = vmatpush.bf16.msra.mxu1 %v4263_v1 }
 0x19a   :  { %v4772_v35 = vld [vmem:[#allocation8 + $0x6a0] sm:$0xf0] }
 0x19b   :  { %5368 = vrsqrt.f32 %v5725_v45  ;;  %v4775_v12 = vor.u32 %v5300_v3, %v4772_v35  ;;  %v5100_v13 = vld [vmem:[#allocation8 + $0x44] sm:$0xf]  ;;  %v1309_v25 = vsub.f32 1.5, %v1308_v8  ;;  %3035 = vmatpush.bf16.msra.mxu2 %v4519_v9  ;;  %vm1321_vm15 = vweird.f32 %v5725_v45 }
 0x19c   :  { %v3972_v14 = vld [vmem:[#allocation8 + $0x60] sm:$0xf0] }
 0x19d   :  { %v5164_v16 = vld [vmem:[#allocation8 + $0x244] sm:$0xf]  ;;  %v3975_v21 = vor.u32 %v5100_v13, %v3972_v14  ;;  %3048 = vmatpush.bf16.msra.mxu3 %v4775_v12  ;;  %v1310_v49 = vmul.f32 %v5717_v11, %v1309_v25 }
 0x19e   :  { %v4228_v17 = vld [vmem:[#allocation8 + $0x260] sm:$0xf0] }
 0x19f   :  { %v5228_v18 = vld [vmem:[#allocation8 + $0x444] sm:$0xf]  ;;  %v4231_v22 = vor.u32 %v5164_v16, %v4228_v17  ;;  %3010 = vmatpush.bf16.msra.mxu0 %v3975_v21  ;;  %v1314_v57 = vsel %vm5747_vm14, %v5717_v11, %v1310_v49  ;;  %v1294_v11 = vsel %vm1293_vm4, %v5713_v4, %v1290_v56 }
 0x1a0   :  { %v4484_v19 = vld [vmem:[#allocation8 + $0x460] sm:$0xf0]  ;;  %v1330_v59 = vrot.slane %v1314_v57, 6 }
 0x1a1   :  { %v5369_v20 = vpop.eup %5368  ;;  %v5292_v23 = vld [vmem:[#allocation8 + $0x644] sm:$0xf]  ;;  %v4487_v27 = vor.u32 %v5228_v18, %v4484_v19  ;;  %3023 = vmatpush.bf16.msra.mxu1 %v4231_v22 }
 0x1a2   :  { %v4740_v24 = vld [vmem:[#allocation8 + $0x660] sm:$0xf0]  ;;  %v1316_v26 = vmul.f32 %v5369_v20, %v5725_v45  ;;  %vm1322_vm12 = vweird.f32 %v5369_v20  ;;  %v1333_v45 = vsel %vm1332_vm2, %v1294_v11, %v1329_v10  ;;  %v4394_v10 = vld [vmem:[#allocation8 + $0x388] sm:$0xf] }
 0x1a3   :  { %v4743_v29 = vor.u32 %v5292_v23, %v4740_v24  ;;  %v5092_v30 = vld [vmem:[#allocation8 + $0x4] sm:$0xf]  ;;  %3036 = vmatpush.bf16.msra.mxu2 %v4487_v27  ;;  %vm1323_vm0 = vmor %vm1321_vm15, %vm1322_vm12  ;;  %v4170_v27 = vld [vmem:[#allocation8 + $0x1c8] sm:$0xf] }
 0x1a4   :  { %v3940_v31 = vld [vmem:[#allocation8 + $0x20] sm:$0xf0]  ;;  %v1317_v33 = vmul.f32 %v5369_v20, %v1316_v26  ;;  %v5337_v11 = vld [vmem:[#allocation8 + $0x7a4] sm:$0xf0] }
 0x1a5   :  { %v5156_v34 = vld [vmem:[#allocation8 + $0x204] sm:$0xf]  ;;  %v3943_v39 = vor.u32 %v5092_v30, %v3940_v31  ;;  %3049 = vmatpush.bf16.msra.mxu3 %v4743_v29 }
 0x1a6   :  { %v4196_v37 = vld [vmem:[#allocation8 + $0x220] sm:$0xf0]  ;;  %v1318_v51 = vmul.f32 0.5, %v1317_v33  ;;  %v4426_v33 = vld [vmem:[#allocation8 + $0x3c8] sm:$0xf] }
 0x1a7   :  { %v5220_v38 = vld [vmem:[#allocation8 + $0x404] sm:$0xf]  ;;  %v4199_v41 = vor.u32 %v5156_v34, %v4196_v37  ;;  %3011 = vmatpush.bf16.msra.mxu0 %v3943_v39  ;;  %v5217_v34 = vld [vmem:[#allocation8 + $0x3e4] sm:$0xf0] }
 0x1a8   :  { %v4452_v46 = vld [vmem:[#allocation8 + $0x420] sm:$0xf0]  ;;  %v1319_v54 = vsub.f32 1.5, %v1318_v51  ;;  %v4682_v37 = vld [vmem:[#allocation8 + $0x5c8] sm:$0xf]  ;;  %v4427_v49 = vor.u32 %v5217_v34, %v4426_v33 }
 0x1a9   :  { %v5284_v47 = vld [vmem:[#allocation8 + $0x604] sm:$0xf]  ;;  %v4455_v52 = vor.u32 %v5220_v38, %v4452_v46  ;;  %3024 = vmatpush.bf16.msra.mxu1 %v4199_v41  ;;  %v4938_v38 = vld [vmem:[#allocation8 + $0x7c8] sm:$0xf] }
 0x1aa   :  { %v4708_v48 = vld [vmem:[#allocation8 + $0x620] sm:$0xf0]  ;;  %v1320_v58 = vmul.f32 %v5369_v20, %v1319_v54  ;;  %v5145_v54 = vld [vmem:[#allocation8 + $0x1a4] sm:$0xf0] }
 0x1ab   :  { %v4711_v5 = vor.u32 %v5284_v47, %v4708_v48  ;;  %3037 = vmatpush.bf16.msra.mxu2 %v4455_v52  ;;  %v116_v0 = vld [vmem:[#allocation10 + $0x1] ss:$4 sm:$0xf]  ;;  %v118_v18 = vld [vmem:[#allocation10 + $0x2] ss:$4 sm:$0xf]  ;;  %v4171_v48 = vor.u32 %v5153_v32, %v4170_v27 }
 0x1ac   :  { %v1324_v50 = vsel %vm1323_vm0, %v5369_v20, %v1320_v58  ;;  %v5249_v32 = vld [vmem:[#allocation8 + $0x4e4] sm:$0xf0] }
 0x1ad   :  { %3050 = vmatpush.bf16.msra.mxu3 %v4711_v5  ;;  %v1331_v62 = vrot.slane %v1324_v50, 5  ;;  %v5209_v50 = vld [vmem:[#allocation8 + $0x3a4] sm:$0xf0] }
 0x1ae   :  { %v4810_v33 = vld [vmem:[#allocation8 + $0x6c8] sm:$0xf] }
 0x1af   :  { %v1335_v1 = vsel %vm1334_vm3, %v1330_v59, %v1331_v62  ;;  %v4650_v59 = vld [vmem:[#allocation8 + $0x588] sm:$0xf] }
 0x1b0   :  { %v1337_v3 = vsel %vm1336_vm5, %v1333_v45, %v1335_v1  ;;  %v5273_v62 = vld [vmem:[#allocation8 + $0x5a4] sm:$0xf0]  ;;  %v4139_v45 = vor.u32 %v5145_v54, %v4138_v53  ;;  %v4395_v1 = vor.u32 %v5209_v50, %v4394_v10 }
 0x1b1   :  { %v1339_v35 = vmul.f32 %v1337_v3, %v116_v0  ;;  %v4906_v0 = vld [vmem:[#allocation8 + $0x788] sm:$0xf] }
 0x1b2   :  { %v4106_v3 = vld [vmem:[#allocation8 + $0x148] sm:$0xf] }
 0x1b3   :  { %v1341_v40 = vperm.slane %v1339_v35, 0  ;;  %v1342_v63 = vperm.slane %v1339_v35, 1  ;;  %v1343_v6 = vperm.slane %v1339_v35, 2  ;;  %v1344_v8 = vperm.slane %v1339_v35, 3  ;;  %v5137_v35 = vld [vmem:[#allocation8 + $0x164] sm:$0xf0] }
 0x1b4   :  { %v5313_v34 = vld [vmem:[#allocation8 + $0x6e4] sm:$0xf0] }
 0x1b5   :  { %v1350_v9 = vmul.f32 %v1342_v63, %v5677_v44  ;;  %v1351_v12 = vmul.f32 %v1343_v6, %v5686_v60  ;;  %v1352_v13 = vmul.f32 %v1344_v8, %v5702_v7  ;;  %v1349_v14 = vmul.f32 %v1341_v40, %v5672_v42  ;;  %v3978_v53 = vld [vmem:[#allocation8 + $0x48] sm:$0xf] }
 0x1b6   :  { %v1365_v23 = vmul.f32 %v1341_v40, %v5661_v2  ;;  %v1366_v44 = vmul.f32 %v1342_v63, %v5665_v15  ;;  %v1367_v60 = vmul.f32 %v1343_v6, %v5674_v43  ;;  %v1368_v7 = vmul.f32 %v1344_v8, %v5690_v61  ;;  %v5281_v2 = vld [vmem:[#allocation8 + $0x5e4] sm:$0xf0] }
 0x1b7   :  { %v1357_v4 = vrot.slane %v1350_v9, 7  ;;  %v1358_v16 = vrot.slane %v1351_v12, 6  ;;  %v1359_v17 = vrot.slane %v1352_v13, 5  ;;  %v5345_v15 = vld [vmem:[#allocation8 + $0x7e4] sm:$0xf0]  ;;  %v4683_v57 = vor.u32 %v5281_v2, %v4682_v37 }
 0x1b8   :  { %v4939_v58 = vor.u32 %v5345_v15, %v4938_v38  ;;  %v4651_v40 = vor.u32 %v5273_v62, %v4650_v59  ;;  %v4907_v63 = vor.u32 %v5337_v11, %v4906_v0  ;;  %v4362_v6 = vld [vmem:[#allocation8 + $0x348] sm:$0xf] }
 0x1b9   :  { %v1360_v19 = vsel %vm1332_vm2, %v1349_v14, %v1357_v4  ;;  %v1361_v20 = vsel %vm1334_vm3, %v1358_v16, %v1359_v17  ;;  %v5201_v8 = vld [vmem:[#allocation8 + $0x364] sm:$0xf0]  ;;  %v4107_v4 = vor.u32 %v5137_v35, %v4106_v3 }
 0x1ba   :  { %v1362_v21 = vsel %vm1336_vm5, %v1360_v19, %v1361_v20  ;;  %v4618_v9 = vld [vmem:[#allocation8 + $0x548] sm:$0xf]  ;;  %v4363_v16 = vor.u32 %v5201_v8, %v4362_v6 }
 0x1bb   :  { %v1364_v22 = vsub.f32 %v118_v18, %v1362_v21  ;;  %v5265_v12 = vld [vmem:[#allocation8 + $0x564] sm:$0xf0] }
 0x1bc   :  { %v4874_v13 = vld [vmem:[#allocation8 + $0x748] sm:$0xf]  ;;  %v4619_v19 = vor.u32 %v5265_v12, %v4618_v9 }
 0x1bd   :  { %v1370_v42 = vperm.slane %v1364_v22, 0  ;;  %v1371_v24 = vperm.slane %v1364_v22, 1  ;;  %v1372_v25 = vperm.slane %v1364_v22, 2  ;;  %v1373_v26 = vperm.slane %v1364_v22, 3  ;;  %v5329_v14 = vld [vmem:[#allocation8 + $0x764] sm:$0xf0] }
 0x1be   :  { %v4074_v17 = vld [vmem:[#allocation8 + $0x108] sm:$0xf]  ;;  %v4875_v20 = vor.u32 %v5329_v14, %v4874_v13 }
 0x1bf   :  { %v1378_v28 = vadd.f32 %v1370_v42, %v1365_v23  ;;  %v1379_v29 = vadd.f32 %v1371_v24, %v1366_v44  ;;  %v1380_v30 = vadd.f32 %v1372_v25, %v1367_v60  ;;  %v1381_v31 = vadd.f32 %v1373_v26, %v1368_v7  ;;  %v5129_v18 = vld [vmem:[#allocation8 + $0x124] sm:$0xf0] }
 0x1c0   :  { %v4330_v21 = vld [vmem:[#allocation8 + $0x308] sm:$0xf]  ;;  %v4075_v42 = vor.u32 %v5129_v18, %v4074_v17  ;;  %v5213_v17 = vld [vmem:[#allocation8 + $0x3cc] sm:$0xf] }
 0x1c1   :  { %vm1384_vm6 = vcmp.ge.f32.partialorder %v1380_v30, 0.0  ;;  %vm1385_vm7 = vcmp.ge.f32.partialorder %v1381_v31, 0.0  ;;  %v1386_v43 = vmul.f32 0.2, %v1378_v28  ;;  %v1387_v61 = vmul.f32 0.2, %v1379_v29 }
 0x1c2   :  { %v1388_v39 = vmul.f32 0.2, %v1380_v30  ;;  %v1389_v41 = vmul.f32 0.2, %v1381_v31  ;;  %vm1382_vm8 = vcmp.ge.f32.partialorder %v1378_v28, 0.0  ;;  %vm1383_vm9 = vcmp.ge.f32.partialorder %v1379_v29, 0.0 }
 0x1c3   :  { %v1390_v46 = vsel %vm1382_vm8, %v1378_v28, %v1386_v43  ;;  %v1391_v47 = vsel %vm1383_vm9, %v1379_v29, %v1387_v61  ;;  %v5193_v22 = vld [vmem:[#allocation8 + $0x324] sm:$0xf0]  ;;  %v4811_v61 = vor.u32 %v5313_v34, %v4810_v33  ;;  %v4428_v18 = vld [vmem:[#allocation8 + $0x3e8] sm:$0xf0] }
 0x1c4   :  { %v1393_v51 = vsel %vm1385_vm7, %v1381_v31, %v1389_v41  ;;  %v5774_v52 = vpack.c.bf16 %v1390_v46, %v1390_v46  ;;  %v5776_v36 = vpack.c.bf16 %v1391_v47, %v1391_v47  ;;  %v1392_v5 = vsel %vm1384_vm6, %v1380_v30, %v1388_v39  ;;  %v4586_v23 = vld [vmem:[#allocation8 + $0x508] sm:$0xf]  ;;  %v5333_v33 = vld [vmem:[#allocation8 + $0x78c] sm:$0xf] }
 0x1c5   :  { %v5778_v55 = vpack.c.bf16 %v1393_v51, %v1393_v51  ;;  %v5780_v56 = vpack.c.bf16 %v1392_v5, %v1392_v5  ;;  %v5257_v44 = vld [vmem:[#allocation8 + $0x524] sm:$0xf0]  ;;  %v4331_v24 = vor.u32 %v5193_v22, %v4330_v21  ;;  %v4684_v22 = vld [vmem:[#allocation8 + $0x5e8] sm:$0xf0] }
 0x1c6   :  { %2960 = vmatmul.bf16.vlgmr.msrb.gmra.mxu0 %v5774_v52  ;;  %2973 = vmatmul.bf16.vlgmr.msrb.gmra.mxu1 %v5776_v36  ;;  %v4842_v60 = vld [vmem:[#allocation8 + $0x708] sm:$0xf]  ;;  %v4587_v27 = vor.u32 %v5257_v44, %v4586_v23  ;;  %v5341_v23 = vld [vmem:[#allocation8 + $0x7cc] sm:$0xf] }
 0x1c7   :  { %2986 = vmatmul.bf16.vlgmr.msrb.gmra.mxu2 %v5780_v56  ;;  %2999 = vmatmul.bf16.vlgmr.msrb.gmra.mxu3 %v5778_v55  ;;  %v5321_v7 = vld [vmem:[#allocation8 + $0x724] sm:$0xf0]  ;;  %v4940_v44 = vld [vmem:[#allocation8 + $0x7e8] sm:$0xf0] }
 0x1c8   :  { %3056 = vmatpush.bf16.msrb.mxu0 %v4171_v48  ;;  %3069 = vmatpush.bf16.msrb.mxu1 %v4427_v49  ;;  %v4042_v25 = vld [vmem:[#allocation8 + $0xc8] sm:$0xf]  ;;  %v4843_v28 = vor.u32 %v5321_v7, %v4842_v60  ;;  %v4908_v34 = vld [vmem:[#allocation8 + $0x7a8] sm:$0xf0] }
 0x1c9   :  { %3082 = vmatpush.bf16.msrb.mxu2 %v4683_v57  ;;  %3095 = vmatpush.bf16.msrb.mxu3 %v4939_v58  ;;  %v5121_v26 = vld [vmem:[#allocation8 + $0xe4] sm:$0xf0] }
 0x1ca   :  { %v4298_v29 = vld [vmem:[#allocation8 + $0x2c8] sm:$0xf]  ;;  %v4043_v37 = vor.u32 %v5121_v26, %v4042_v25  ;;  %v5141_v25 = vld [vmem:[#allocation8 + $0x18c] sm:$0xf] }
 0x1cb   :  { %v5185_v30 = vld [vmem:[#allocation8 + $0x2e4] sm:$0xf0]  ;;  %v4140_v26 = vld [vmem:[#allocation8 + $0x1a8] sm:$0xf0] }
 0x1cc   :  { %3057 = vmatpush.bf16.msrb.mxu0 %v4139_v45  ;;  %3070 = vmatpush.bf16.msrb.mxu1 %v4395_v1  ;;  %v4554_v31 = vld [vmem:[#allocation8 + $0x4c8] sm:$0xf]  ;;  %v4299_v2 = vor.u32 %v5185_v30, %v4298_v29  ;;  %v5205_v29 = vld [vmem:[#allocation8 + $0x38c] sm:$0xf] }
 0x1cd   :  { %3083 = vmatpush.bf16.msrb.mxu2 %v4651_v40  ;;  %3096 = vmatpush.bf16.msrb.mxu3 %v4907_v63  ;;  %v4010_v38 = vld [vmem:[#allocation8 + $0x88] sm:$0xf]  ;;  %v4555_v43 = vor.u32 %v5249_v32, %v4554_v31  ;;  %v4396_v30 = vld [vmem:[#allocation8 + $0x3a8] sm:$0xf0] }
 0x1ce   :  { %v5113_v15 = vld [vmem:[#allocation8 + $0xa4] sm:$0xf0]  ;;  %v5269_v31 = vld [vmem:[#allocation8 + $0x58c] sm:$0xf] }
 0x1cf   :  { %v4266_v39 = vld [vmem:[#allocation8 + $0x288] sm:$0xf]  ;;  %v4011_v51 = vor.u32 %v5113_v15, %v4010_v38  ;;  %v4652_v32 = vld [vmem:[#allocation8 + $0x5a8] sm:$0xf0] }
 0x1d0   :  { %3058 = vmatpush.bf16.msrb.mxu0 %v4107_v4  ;;  %3071 = vmatpush.bf16.msrb.mxu1 %v4363_v16  ;;  %v5177_v41 = vld [vmem:[#allocation8 + $0x2a4] sm:$0xf0]  ;;  %v5149_v4 = vld [vmem:[#allocation8 + $0x1cc] sm:$0xf] }
 0x1d1   :  { %3084 = vmatpush.bf16.msrb.mxu2 %v4619_v19  ;;  %3097 = vmatpush.bf16.msrb.mxu3 %v4875_v20  ;;  %v4522_v46 = vld [vmem:[#allocation8 + $0x488] sm:$0xf]  ;;  %v4267_v5 = vor.u32 %v5177_v41, %v4266_v39  ;;  %v4172_v16 = vld [vmem:[#allocation8 + $0x1e8] sm:$0xf0] }
 0x1d2   :  { %v5241_v47 = vld [vmem:[#allocation8 + $0x4a4] sm:$0xf0]  ;;  %v5277_v19 = vld [vmem:[#allocation8 + $0x5cc] sm:$0xf] }
 0x1d3   :  { %v4778_v48 = vld [vmem:[#allocation8 + $0x688] sm:$0xf]  ;;  %v4523_v57 = vor.u32 %v5241_v47, %v4522_v46  ;;  %v5133_v38 = vld [vmem:[#allocation8 + $0x14c] sm:$0xf] }
 0x1d4   :  { %3059 = vmatpush.bf16.msrb.mxu0 %v4075_v42  ;;  %3072 = vmatpush.bf16.msrb.mxu1 %v4331_v24  ;;  %v5305_v49 = vld [vmem:[#allocation8 + $0x6a4] sm:$0xf0]  ;;  %v4175_v42 = vor.u32 %v5149_v4, %v4172_v16  ;;  %v4431_v24 = vor.u32 %v5213_v17, %v4428_v18  ;;  %v4108_v15 = vld [vmem:[#allocation8 + $0x168] sm:$0xf0] }
 0x1d5   :  { %3085 = vmatpush.bf16.msrb.mxu2 %v4587_v27  ;;  %3098 = vmatpush.bf16.msrb.mxu3 %v4843_v28  ;;  %v5105_v54 = vld [vmem:[#allocation8 + $0x64] sm:$0xf0]  ;;  %v4779_v58 = vor.u32 %v5305_v49, %v4778_v48  ;;  %v4687_v27 = vor.u32 %v5277_v19, %v4684_v22  ;;  %v4943_v28 = vor.u32 %v5341_v23, %v4940_v44  ;;  %v5197_v39 = vld [vmem:[#allocation8 + $0x34c] sm:$0xf] }
 0x1d6   :  { %3012 = vmatmul.bf16.vlgmr.msra.gmra.mxu0 %v5774_v52  ;;  %3025 = vmatmul.bf16.vlgmr.msra.gmra.mxu1 %v5776_v36  ;;  %v4234_v10 = vld [vmem:[#allocation8 + $0x248] sm:$0xf]  ;;  %v3979_v1 = vor.u32 %v5105_v54, %v3978_v53  ;;  %v4364_v41 = vld [vmem:[#allocation8 + $0x368] sm:$0xf0] }
 0x1d7   :  { %3038 = vmatmul.bf16.vlgmr.msra.gmra.mxu2 %v5780_v56  ;;  %3051 = vmatmul.bf16.vlgmr.msra.gmra.mxu3 %v5778_v55  ;;  %v5169_v50 = vld [vmem:[#allocation8 + $0x264] sm:$0xf0]  ;;  %v5261_v46 = vld [vmem:[#allocation8 + $0x54c] sm:$0xf] }
 0x1d8   :  { %3060 = vmatpush.bf16.msrb.mxu0 %v4043_v37  ;;  %3073 = vmatpush.bf16.msrb.mxu1 %v4299_v2  ;;  %v4490_v59 = vld [vmem:[#allocation8 + $0x448] sm:$0xf]  ;;  %v4235_v3 = vor.u32 %v5169_v50, %v4234_v10  ;;  %v4143_v37 = vor.u32 %v5141_v25, %v4140_v26  ;;  %v4399_v2 = vor.u32 %v5205_v29, %v4396_v30  ;;  %v4620_v47 = vld [vmem:[#allocation8 + $0x568] sm:$0xf0] }
 0x1d9   :  { %3086 = vmatpush.bf16.msrb.mxu2 %v4555_v43  ;;  %3099 = vmatpush.bf16.msrb.mxu3 %v4811_v61  ;;  %v5233_v62 = vld [vmem:[#allocation8 + $0x464] sm:$0xf0]  ;;  %v4655_v43 = vor.u32 %v5269_v31, %v4652_v32  ;;  %v4911_v61 = vor.u32 %v5333_v33, %v4908_v34  ;;  %v5325_v48 = vld [vmem:[#allocation8 + $0x74c] sm:$0xf] }
 0x1da   :  { %v4746_v0 = vld [vmem:[#allocation8 + $0x648] sm:$0xf]  ;;  %v4491_v6 = vor.u32 %v5233_v62, %v4490_v59  ;;  %v4876_v49 = vld [vmem:[#allocation8 + $0x768] sm:$0xf0] }
 0x1db   :  { %v5297_v11 = vld [vmem:[#allocation8 + $0x664] sm:$0xf0]  ;;  %v5125_v53 = vld [vmem:[#allocation8 + $0x10c] sm:$0xf] }
 0x1dc   :  { %v3946_v45 = vld [vmem:[#allocation8 + $0x8] sm:$0xf]  ;;  %3061 = vmatpush.bf16.msrb.mxu0 %v4011_v51  ;;  %3074 = vmatpush.bf16.msrb.mxu1 %v4267_v5  ;;  %v4747_v8 = vor.u32 %v5297_v11, %v4746_v0  ;;  %v4111_v51 = vor.u32 %v5133_v38, %v4108_v15  ;;  %v4367_v5 = vor.u32 %v5197_v39, %v4364_v41  ;;  %v4076_v54 = vld [vmem:[#allocation8 + $0x128] sm:$0xf0] }
 0x1dd   :  { %v5097_v35 = vld [vmem:[#allocation8 + $0x24] sm:$0xf0]  ;;  %3087 = vmatpush.bf16.msrb.mxu2 %v4523_v57  ;;  %3100 = vmatpush.bf16.msrb.mxu3 %v4779_v58  ;;  %v4623_v57 = vor.u32 %v5261_v46, %v4620_v47  ;;  %v4879_v58 = vor.u32 %v5325_v48, %v4876_v49  ;;  %v5189_v10 = vld [vmem:[#allocation8 + $0x30c] sm:$0xf] }
 0x1de   :  { %v4202_v40 = vld [vmem:[#allocation8 + $0x208] sm:$0xf]  ;;  %v3947_v20 = vor.u32 %v5097_v35, %v3946_v45  ;;  %v4332_v50 = vld [vmem:[#allocation8 + $0x328] sm:$0xf0]  ;;  %v4079_v45 = vor.u32 %v5125_v53, %v4076_v54  ;;  %v4434_v53 = vld [vmem:[#allocation8 + $0x3d0] sm:$0xf] }
 0x1df   :  { %v5161_v63 = vld [vmem:[#allocation8 + $0x224] sm:$0xf0]  ;;  %v5253_v59 = vld [vmem:[#allocation8 + $0x50c] sm:$0xf]  ;;  %v5218_v54 = vld [vmem:[#allocation8 + $0x3ec] sm:$0xf0] }
 0x1e0   :  { %v4458_v9 = vld [vmem:[#allocation8 + $0x408] sm:$0xf]  ;;  %3062 = vmatpush.bf16.msrb.mxu0 %v3979_v1  ;;  %3075 = vmatpush.bf16.msrb.mxu1 %v4235_v3  ;;  %v4203_v21 = vor.u32 %v5161_v63, %v4202_v40  ;;  %v4588_v62 = vld [vmem:[#allocation8 + $0x528] sm:$0xf0]  ;;  %v4335_v1 = vor.u32 %v5189_v10, %v4332_v50  ;;  %v5282_v50 = vld [vmem:[#allocation8 + $0x5ec] sm:$0xf0] }
 0x1e1   :  { %v5225_v12 = vld [vmem:[#allocation8 + $0x424] sm:$0xf0]  ;;  %3088 = vmatpush.bf16.msrb.mxu2 %v4491_v6  ;;  %3101 = vmatpush.bf16.msrb.mxu3 %v4747_v8  ;;  %v5317_v0 = vld [vmem:[#allocation8 + $0x70c] sm:$0xf]  ;;  %v4591_v40 = vor.u32 %v5253_v59, %v4588_v62  ;;  %v4946_v59 = vld [vmem:[#allocation8 + $0x7d0] sm:$0xf] }
 0x1e2   :  { %v4714_v13 = vld [vmem:[#allocation8 + $0x608] sm:$0xf]  ;;  %v4459_v60 = vor.u32 %v5225_v12, %v4458_v9  ;;  %v4844_v11 = vld [vmem:[#allocation8 + $0x728] sm:$0xf0]  ;;  %v5346_v62 = vld [vmem:[#allocation8 + $0x7ec] sm:$0xf0] }
 0x1e3   :  { %v5289_v14 = vld [vmem:[#allocation8 + $0x624] sm:$0xf0]  ;;  %v5117_v3 = vld [vmem:[#allocation8 + $0xcc] sm:$0xf]  ;;  %v4847_v63 = vor.u32 %v5317_v0, %v4844_v11 }
 0x1e4   :  { %v4715_v7 = vor.u32 %v5289_v14, %v4714_v13  ;;  %3063 = vmatpush.bf16.msrb.mxu0 %v3947_v20  ;;  %3076 = vmatpush.bf16.msrb.mxu1 %v4203_v21  ;;  %v4044_v35 = vld [vmem:[#allocation8 + $0xe8] sm:$0xf0] }
 0x1e5   :  { %3089 = vmatpush.bf16.msrb.mxu2 %v4459_v60  ;;  %v5181_v6 = vld [vmem:[#allocation8 + $0x2cc] sm:$0xf]  ;;  %v4047_v4 = vor.u32 %v5117_v3, %v4044_v35  ;;  %v4146_v3 = vld [vmem:[#allocation8 + $0x190] sm:$0xf] }
 0x1e6   :  { %3102 = vmatpush.bf16.msrb.mxu3 %v4715_v7  ;;  %v4300_v8 = vld [vmem:[#allocation8 + $0x2e8] sm:$0xf0]  ;;  %v5146_v35 = vld [vmem:[#allocation8 + $0x1ac] sm:$0xf0] }
 0x1e7   :  { %3064 = vmatmul.bf16.vlgmr.msrb.gmra.mxu0 %v5774_v52  ;;  %3077 = vmatmul.bf16.vlgmr.msrb.gmra.mxu1 %v5776_v36  ;;  %v5245_v9 = vld [vmem:[#allocation8 + $0x4cc] sm:$0xf]  ;;  %v4303_v16 = vor.u32 %v5181_v6, %v4300_v8  ;;  %v4402_v6 = vld [vmem:[#allocation8 + $0x390] sm:$0xf] }
 0x1e8   :  { %3108 = vmatpush.bf16.msra.mxu0 %v4175_v42  ;;  %3121 = vmatpush.bf16.msra.mxu1 %v4431_v24  ;;  %v4556_v12 = vld [vmem:[#allocation8 + $0x4e8] sm:$0xf0]  ;;  %v5210_v8 = vld [vmem:[#allocation8 + $0x3ac] sm:$0xf0] }
 0x1e9   :  { %3134 = vmatpush.bf16.msra.mxu2 %v4687_v27  ;;  %3103 = vmatmul.bf16.vlgmr.msrb.gmra.mxu3 %v5778_v55  ;;  %v5309_v13 = vld [vmem:[#allocation8 + $0x6cc] sm:$0xf]  ;;  %v4559_v19 = vor.u32 %v5245_v9, %v4556_v12  ;;  %v4658_v9 = vld [vmem:[#allocation8 + $0x590] sm:$0xf] }
 0x1ea   :  { %3147 = vmatpush.bf16.msra.mxu3 %v4943_v28  ;;  %3090 = vmatmul.bf16.vlgmr.msrb.gmra.mxu2 %v5780_v56  ;;  %v4812_v14 = vld [vmem:[#allocation8 + $0x6e8] sm:$0xf0]  ;;  %v5274_v12 = vld [vmem:[#allocation8 + $0x5ac] sm:$0xf0] }
 0x1eb   :  { %v5109_v17 = vld [vmem:[#allocation8 + $0x8c] sm:$0xf]  ;;  %v4815_v20 = vor.u32 %v5309_v13, %v4812_v14  ;;  %v4914_v13 = vld [vmem:[#allocation8 + $0x790] sm:$0xf] }
 0x1ec   :  { %3109 = vmatpush.bf16.msra.mxu0 %v4143_v37  ;;  %3122 = vmatpush.bf16.msra.mxu1 %v4399_v2  ;;  %v4012_v18 = vld [vmem:[#allocation8 + $0xa8] sm:$0xf0]  ;;  %v5338_v14 = vld [vmem:[#allocation8 + $0x7ac] sm:$0xf0] }
 0x1ed   :  { %3135 = vmatpush.bf16.msra.mxu2 %v4655_v43  ;;  %v5173_v21 = vld [vmem:[#allocation8 + $0x28c] sm:$0xf]  ;;  %v4015_v42 = vor.u32 %v5109_v17, %v4012_v18  ;;  %v4114_v17 = vld [vmem:[#allocation8 + $0x150] sm:$0xf] }
 0x1ee   :  { %3148 = vmatpush.bf16.msra.mxu3 %v4911_v61  ;;  %v4268_v22 = vld [vmem:[#allocation8 + $0x2a8] sm:$0xf0]  ;;  %v5138_v18 = vld [vmem:[#allocation8 + $0x16c] sm:$0xf0] }
 0x1ef   :  { %v5237_v23 = vld [vmem:[#allocation8 + $0x48c] sm:$0xf]  ;;  %v4271_v24 = vor.u32 %v5173_v21, %v4268_v22  ;;  %v4370_v21 = vld [vmem:[#allocation8 + $0x350] sm:$0xf] }
 0x1f0   :  { %3110 = vmatpush.bf16.msra.mxu0 %v4111_v51  ;;  %3123 = vmatpush.bf16.msra.mxu1 %v4367_v5  ;;  %v4524_v44 = vld [vmem:[#allocation8 + $0x4a8] sm:$0xf0]  ;;  %v4178_v51 = vld [vmem:[#allocation8 + $0x1d0] sm:$0xf] }
 0x1f1   :  { %3136 = vmatpush.bf16.msra.mxu2 %v4623_v57  ;;  %v5301_v60 = vld [vmem:[#allocation8 + $0x68c] sm:$0xf]  ;;  %v4527_v27 = vor.u32 %v5237_v23, %v4524_v44  ;;  %v5154_v5 = vld [vmem:[#allocation8 + $0x1ec] sm:$0xf0] }
 0x1f2   :  { %3149 = vmatpush.bf16.msra.mxu3 %v4879_v58  ;;  %v4780_v7 = vld [vmem:[#allocation8 + $0x6a8] sm:$0xf0]  ;;  %v4690_v57 = vld [vmem:[#allocation8 + $0x5d0] sm:$0xf] }
 0x1f3   :  { %v5101_v25 = vld [vmem:[#allocation8 + $0x4c] sm:$0xf]  ;;  %v4783_v28 = vor.u32 %v5301_v60, %v4780_v7  ;;  %v5202_v22 = vld [vmem:[#allocation8 + $0x36c] sm:$0xf0] }
 0x1f4   :  { %3111 = vmatpush.bf16.msra.mxu0 %v4079_v45  ;;  %3124 = vmatpush.bf16.msra.mxu1 %v4335_v1  ;;  %v3980_v26 = vld [vmem:[#allocation8 + $0x68] sm:$0xf0]  ;;  %v4179_v45 = vor.u32 %v5154_v5, %v4178_v51  ;;  %v4435_v1 = vor.u32 %v5218_v54, %v4434_v53  ;;  %v4626_v23 = vld [vmem:[#allocation8 + $0x550] sm:$0xf] }
 0x1f5   :  { %3137 = vmatpush.bf16.msra.mxu2 %v4591_v40  ;;  %v5165_v29 = vld [vmem:[#allocation8 + $0x24c] sm:$0xf]  ;;  %v3983_v2 = vor.u32 %v5101_v25, %v3980_v26  ;;  %v4691_v40 = vor.u32 %v5282_v50, %v4690_v57  ;;  %v5266_v44 = vld [vmem:[#allocation8 + $0x56c] sm:$0xf0] }
 0x1f6   :  { %3150 = vmatpush.bf16.msra.mxu3 %v4847_v63  ;;  %v4236_v30 = vld [vmem:[#allocation8 + $0x268] sm:$0xf0]  ;;  %v4947_v63 = vor.u32 %v5346_v62, %v4946_v59  ;;  %v4882_v60 = vld [vmem:[#allocation8 + $0x750] sm:$0xf] }
 0x1f7   :  { %v5229_v31 = vld [vmem:[#allocation8 + $0x44c] sm:$0xf]  ;;  %v4239_v38 = vor.u32 %v5165_v29, %v4236_v30  ;;  %v5330_v7 = vld [vmem:[#allocation8 + $0x76c] sm:$0xf0] }
 0x1f8   :  { %3112 = vmatpush.bf16.msra.mxu0 %v4047_v4  ;;  %3125 = vmatpush.bf16.msra.mxu1 %v4303_v16  ;;  %v4492_v32 = vld [vmem:[#allocation8 + $0x468] sm:$0xf0]  ;;  %v4147_v4 = vor.u32 %v5146_v35, %v4146_v3  ;;  %v4403_v16 = vor.u32 %v5210_v8, %v4402_v6  ;;  %v4082_v25 = vld [vmem:[#allocation8 + $0x110] sm:$0xf] }
 0x1f9   :  { %3138 = vmatpush.bf16.msra.mxu2 %v4559_v19  ;;  %v5293_v33 = vld [vmem:[#allocation8 + $0x64c] sm:$0xf]  ;;  %v4495_v39 = vor.u32 %v5229_v31, %v4492_v32  ;;  %v4659_v19 = vor.u32 %v5274_v12, %v4658_v9  ;;  %v5130_v26 = vld [vmem:[#allocation8 + $0x12c] sm:$0xf0] }
 0x1fa   :  { %3151 = vmatpush.bf16.msra.mxu3 %v4815_v20  ;;  %v4748_v34 = vld [vmem:[#allocation8 + $0x668] sm:$0xf0]  ;;  %v4915_v20 = vor.u32 %v5338_v14, %v4914_v13  ;;  %v4338_v29 = vld [vmem:[#allocation8 + $0x310] sm:$0xf] }
 0x1fb   :  { %v5093_v37 = vld [vmem:[#allocation8 + $0xc] sm:$0xf]  ;;  %v4751_v41 = vor.u32 %v5293_v33, %v4748_v34  ;;  %v5194_v30 = vld [vmem:[#allocation8 + $0x32c] sm:$0xf0] }
 0x1fc   :  { %3113 = vmatpush.bf16.msra.mxu0 %v4015_v42  ;;  %3126 = vmatpush.bf16.msra.mxu1 %v4271_v24  ;;  %v3948_v15 = vld [vmem:[#allocation8 + $0x28] sm:$0xf0]  ;;  %v4115_v42 = vor.u32 %v5138_v18, %v4114_v17  ;;  %v4371_v24 = vor.u32 %v5202_v22, %v4370_v21  ;;  %v4594_v31 = vld [vmem:[#allocation8 + $0x510] sm:$0xf] }
 0x1fd   :  { %v5157_v43 = vld [vmem:[#allocation8 + $0x20c] sm:$0xf]  ;;  %3139 = vmatpush.bf16.msra.mxu2 %v4527_v27  ;;  %v3951_v58 = vor.u32 %v5093_v37, %v3948_v15  ;;  %v4627_v27 = vor.u32 %v5266_v44, %v4626_v23  ;;  %v5258_v32 = vld [vmem:[#allocation8 + $0x52c] sm:$0xf0]  ;;  %v4083_v37 = vor.u32 %v5130_v26, %v4082_v25  ;;  %v5214_v25 = vld [vmem:[#allocation8 + $0x3d4] sm:$0xf] }
 0x1fe   :  { %v4204_v61 = vld [vmem:[#allocation8 + $0x228] sm:$0xf0]  ;;  %3152 = vmatpush.bf16.msra.mxu3 %v4783_v28  ;;  %v4883_v28 = vor.u32 %v5330_v7, %v4882_v60  ;;  %v4850_v33 = vld [vmem:[#allocation8 + $0x710] sm:$0xf]  ;;  %v4436_v26 = vld [vmem:[#allocation8 + $0x3f0] sm:$0xf0] }
 0x1ff   :  { %v5221_v46 = vld [vmem:[#allocation8 + $0x40c] sm:$0xf]  ;;  %v4207_v10 = vor.u32 %v5157_v43, %v4204_v61  ;;  %v5322_v34 = vld [vmem:[#allocation8 + $0x72c] sm:$0xf0]  ;;  %v4595_v43 = vor.u32 %v5258_v32, %v4594_v31  ;;  %v5342_v31 = vld [vmem:[#allocation8 + $0x7d4] sm:$0xf] }
 0x200   :  { %v4460_v47 = vld [vmem:[#allocation8 + $0x428] sm:$0xf0]  ;;  %3114 = vmatpush.bf16.msra.mxu0 %v3983_v2  ;;  %3127 = vmatpush.bf16.msra.mxu1 %v4239_v38  ;;  %v4339_v2 = vor.u32 %v5194_v30, %v4338_v29  ;;  %v4050_v38 = vld [vmem:[#allocation8 + $0xd0] sm:$0xf]  ;;  %v4851_v61 = vor.u32 %v5322_v34, %v4850_v33  ;;  %v4692_v30 = vld [vmem:[#allocation8 + $0x5f0] sm:$0xf0] }
 0x201   :  { %v5285_v48 = vld [vmem:[#allocation8 + $0x60c] sm:$0xf]  ;;  %3140 = vmatpush.bf16.msra.mxu2 %v4495_v39  ;;  %v4463_v0 = vor.u32 %v5221_v46, %v4460_v47  ;;  %v5122_v15 = vld [vmem:[#allocation8 + $0xec] sm:$0xf0]  ;;  %v4948_v32 = vld [vmem:[#allocation8 + $0x7f0] sm:$0xf0] }
 0x202   :  { %v4716_v49 = vld [vmem:[#allocation8 + $0x628] sm:$0xf0]  ;;  %3153 = vmatpush.bf16.msra.mxu3 %v4751_v41  ;;  %v4306_v39 = vld [vmem:[#allocation8 + $0x2d0] sm:$0xf]  ;;  %v4051_v51 = vor.u32 %v5122_v15, %v4050_v38  ;;  %v5142_v38 = vld [vmem:[#allocation8 + $0x194] sm:$0xf] }
 0x203   :  { %v4719_v11 = vor.u32 %v5285_v48, %v4716_v49  ;;  %v5186_v41 = vld [vmem:[#allocation8 + $0x2ec] sm:$0xf0]  ;;  %v4148_v15 = vld [vmem:[#allocation8 + $0x1b0] sm:$0xf0] }
 0x204   :  { %3115 = vmatpush.bf16.msra.mxu0 %v3951_v58  ;;  %3128 = vmatpush.bf16.msra.mxu1 %v4207_v10  ;;  %v4562_v46 = vld [vmem:[#allocation8 + $0x4d0] sm:$0xf]  ;;  %v4307_v5 = vor.u32 %v5186_v41, %v4306_v39  ;;  %v5206_v39 = vld [vmem:[#allocation8 + $0x394] sm:$0xf] }
 0x205   :  { %3141 = vmatpush.bf16.msra.mxu2 %v4463_v0  ;;  %v5250_v47 = vld [vmem:[#allocation8 + $0x4ec] sm:$0xf0]  ;;  %v4404_v41 = vld [vmem:[#allocation8 + $0x3b0] sm:$0xf0] }
 0x206   :  { %3154 = vmatpush.bf16.msra.mxu3 %v4719_v11  ;;  %v4818_v48 = vld [vmem:[#allocation8 + $0x6d0] sm:$0xf]  ;;  %v4563_v57 = vor.u32 %v5250_v47, %v4562_v46  ;;  %v5270_v46 = vld [vmem:[#allocation8 + $0x594] sm:$0xf] }
 0x207   :  { %3116 = vmatmul.bf16.vlgmr.msra.gmra.mxu0 %v5774_v52  ;;  %3129 = vmatmul.bf16.vlgmr.msra.gmra.mxu1 %v5776_v36  ;;  %v5314_v49 = vld [vmem:[#allocation8 + $0x6ec] sm:$0xf0]  ;;  %v4660_v47 = vld [vmem:[#allocation8 + $0x5b0] sm:$0xf0] }
 0x208   :  { %3160 = vmatpush.bf16.msrb.mxu0 %v4179_v45  ;;  %3173 = vmatpush.bf16.msrb.mxu1 %v4435_v1  ;;  %v4018_v53 = vld [vmem:[#allocation8 + $0x90] sm:$0xf]  ;;  %v4819_v58 = vor.u32 %v5314_v49, %v4818_v48  ;;  %v5334_v48 = vld [vmem:[#allocation8 + $0x794] sm:$0xf] }
 0x209   :  { %3186 = vmatpush.bf16.msrb.mxu2 %v4691_v40  ;;  %3155 = vmatmul.bf16.vlgmr.msra.gmra.mxu3 %v5778_v55  ;;  %v5114_v54 = vld [vmem:[#allocation8 + $0xac] sm:$0xf0]  ;;  %v4916_v49 = vld [vmem:[#allocation8 + $0x7b0] sm:$0xf0] }
 0x20a   :  { %3199 = vmatpush.bf16.msrb.mxu3 %v4947_v63  ;;  %3142 = vmatmul.bf16.vlgmr.msra.gmra.mxu2 %v5780_v56  ;;  %v4274_v10 = vld [vmem:[#allocation8 + $0x290] sm:$0xf]  ;;  %v4019_v45 = vor.u32 %v5114_v54, %v4018_v53  ;;  %v5134_v53 = vld [vmem:[#allocation8 + $0x154] sm:$0xf] }
 0x20b   :  { %v5178_v50 = vld [vmem:[#allocation8 + $0x2ac] sm:$0xf0]  ;;  %v4116_v54 = vld [vmem:[#allocation8 + $0x170] sm:$0xf0] }
 0x20c   :  { %3161 = vmatpush.bf16.msrb.mxu0 %v4147_v4  ;;  %3174 = vmatpush.bf16.msrb.mxu1 %v4403_v16  ;;  %v4530_v59 = vld [vmem:[#allocation8 + $0x490] sm:$0xf]  ;;  %v4275_v1 = vor.u32 %v5178_v50, %v4274_v10  ;;  %v5198_v10 = vld [vmem:[#allocation8 + $0x354] sm:$0xf] }
 0x20d   :  { %3187 = vmatpush.bf16.msrb.mxu2 %v4659_v19  ;;  %v5242_v62 = vld [vmem:[#allocation8 + $0x4ac] sm:$0xf0]  ;;  %v4372_v50 = vld [vmem:[#allocation8 + $0x370] sm:$0xf0] }
 0x20e   :  { %3200 = vmatpush.bf16.msrb.mxu3 %v4915_v20  ;;  %v4786_v0 = vld [vmem:[#allocation8 + $0x690] sm:$0xf]  ;;  %v4531_v40 = vor.u32 %v5242_v62, %v4530_v59  ;;  %v5262_v59 = vld [vmem:[#allocation8 + $0x554] sm:$0xf] }
 0x20f   :  { %v5306_v11 = vld [vmem:[#allocation8 + $0x6ac] sm:$0xf0]  ;;  %v4628_v62 = vld [vmem:[#allocation8 + $0x570] sm:$0xf0] }
 0x210   :  { %3162 = vmatpush.bf16.msrb.mxu0 %v4115_v42  ;;  %3175 = vmatpush.bf16.msrb.mxu1 %v4371_v24  ;;  %v3986_v3 = vld [vmem:[#allocation8 + $0x50] sm:$0xf]  ;;  %v4787_v63 = vor.u32 %v5306_v11, %v4786_v0  ;;  %v5150_v42 = vld [vmem:[#allocation8 + $0x1d4] sm:$0xf] }
 0x211   :  { %3188 = vmatpush.bf16.msrb.mxu2 %v4627_v27  ;;  %v5106_v35 = vld [vmem:[#allocation8 + $0x6c] sm:$0xf0]  ;;  %v4180_v24 = vld [vmem:[#allocation8 + $0x1f0] sm:$0xf0] }
 0x212   :  { %3201 = vmatpush.bf16.msrb.mxu3 %v4883_v28  ;;  %v4242_v6 = vld [vmem:[#allocation8 + $0x250] sm:$0xf]  ;;  %v3987_v16 = vor.u32 %v5106_v35, %v3986_v3  ;;  %v5278_v27 = vld [vmem:[#allocation8 + $0x5d4] sm:$0xf] }
 0x213   :  { %v5170_v8 = vld [vmem:[#allocation8 + $0x26c] sm:$0xf0]  ;;  %v5326_v0 = vld [vmem:[#allocation8 + $0x754] sm:$0xf] }
 0x214   :  { %3163 = vmatpush.bf16.msrb.mxu0 %v4083_v37  ;;  %3176 = vmatpush.bf16.msrb.mxu1 %v4339_v2  ;;  %v4498_v9 = vld [vmem:[#allocation8 + $0x450] sm:$0xf]  ;;  %v4243_v17 = vor.u32 %v5170_v8, %v4242_v6  ;;  %v4183_v37 = vor.u32 %v5150_v42, %v4180_v24  ;;  %v4439_v2 = vor.u32 %v5214_v25, %v4436_v26  ;;  %v4884_v11 = vld [vmem:[#allocation8 + $0x770] sm:$0xf0] }
 0x215   :  { %3189 = vmatpush.bf16.msrb.mxu2 %v4595_v43  ;;  %v5234_v12 = vld [vmem:[#allocation8 + $0x46c] sm:$0xf0]  ;;  %v4695_v43 = vor.u32 %v5278_v27, %v4692_v30  ;;  %v5126_v3 = vld [vmem:[#allocation8 + $0x114] sm:$0xf] }
 0x216   :  { %3202 = vmatpush.bf16.msrb.mxu3 %v4851_v61  ;;  %v4754_v13 = vld [vmem:[#allocation8 + $0x650] sm:$0xf]  ;;  %v4499_v21 = vor.u32 %v5234_v12, %v4498_v9  ;;  %v4951_v61 = vor.u32 %v5342_v31, %v4948_v32  ;;  %v4084_v35 = vld [vmem:[#allocation8 + $0x130] sm:$0xf0] }
 0x217   :  { %v5298_v14 = vld [vmem:[#allocation8 + $0x66c] sm:$0xf0]  ;;  %v5190_v6 = vld [vmem:[#allocation8 + $0x314] sm:$0xf] }
 0x218   :  { %3164 = vmatpush.bf16.msrb.mxu0 %v4051_v51  ;;  %3177 = vmatpush.bf16.msrb.mxu1 %v4307_v5  ;;  %v3954_v4 = vld [vmem:[#allocation8 + $0x10] sm:$0xf]  ;;  %v4755_v22 = vor.u32 %v5298_v14, %v4754_v13  ;;  %v4151_v51 = vor.u32 %v5142_v38, %v4148_v15  ;;  %v4407_v5 = vor.u32 %v5206_v39, %v4404_v41  ;;  %v4340_v8 = vld [vmem:[#allocation8 + $0x330] sm:$0xf0] }
 0x219   :  { %3190 = vmatpush.bf16.msrb.mxu2 %v4563_v57  ;;  %v5098_v18 = vld [vmem:[#allocation8 + $0x2c] sm:$0xf0]  ;;  %v4663_v57 = vor.u32 %v5270_v46, %v4660_v47  ;;  %v5254_v9 = vld [vmem:[#allocation8 + $0x514] sm:$0xf] }
 0x21a   :  { %3203 = vmatpush.bf16.msrb.mxu3 %v4819_v58  ;;  %v4210_v19 = vld [vmem:[#allocation8 + $0x210] sm:$0xf]  ;;  %v3955_v28 = vor.u32 %v5098_v18, %v3954_v4  ;;  %v4919_v58 = vor.u32 %v5334_v48, %v4916_v49  ;;  %v4596_v12 = vld [vmem:[#allocation8 + $0x530] sm:$0xf0]  ;;  %v4087_v4 = vor.u32 %v5126_v3, %v4084_v35  ;;  %v4442_v3 = vld [vmem:[#allocation8 + $0x3d8] sm:$0xf] }
 0x21b   :  { %v5162_v20 = vld [vmem:[#allocation8 + $0x22c] sm:$0xf0]  ;;  %v5318_v13 = vld [vmem:[#allocation8 + $0x714] sm:$0xf]  ;;  %v5219_v35 = vld [vmem:[#allocation8 + $0x3f4] sm:$0xf0] }
 0x21c   :  { %3165 = vmatpush.bf16.msrb.mxu0 %v4019_v45  ;;  %3178 = vmatpush.bf16.msrb.mxu1 %v4275_v1  ;;  %v4466_v23 = vld [vmem:[#allocation8 + $0x410] sm:$0xf]  ;;  %v4211_v29 = vor.u32 %v5162_v20, %v4210_v19  ;;  %v4119_v45 = vor.u32 %v5134_v53, %v4116_v54  ;;  %v4375_v1 = vor.u32 %v5198_v10, %v4372_v50  ;;  %v4852_v14 = vld [vmem:[#allocation8 + $0x730] sm:$0xf0] }
 0x21d   :  { %3191 = vmatpush.bf16.msrb.mxu2 %v4531_v40  ;;  %v5226_v44 = vld [vmem:[#allocation8 + $0x42c] sm:$0xf0]  ;;  %v4631_v40 = vor.u32 %v5262_v59, %v4628_v62  ;;  %v4052_v18 = vld [vmem:[#allocation8 + $0xf0] sm:$0xf0]  ;;  %v4599_v19 = vor.u32 %v5254_v9, %v4596_v12  ;;  %v4855_v20 = vor.u32 %v5318_v13, %v4852_v14  ;;  %v4954_v9 = vld [vmem:[#allocation8 + $0x7d8] sm:$0xf] }
 0x21e   :  { %3204 = vmatpush.bf16.msrb.mxu3 %v4787_v63  ;;  %v4722_v60 = vld [vmem:[#allocation8 + $0x610] sm:$0xf]  ;;  %v4467_v33 = vor.u32 %v5226_v44, %v4466_v23  ;;  %v4887_v63 = vor.u32 %v5326_v0, %v4884_v11  ;;  %v5246_v23 = vld [vmem:[#allocation8 + $0x4d4] sm:$0xf]  ;;  %v5347_v12 = vld [vmem:[#allocation8 + $0x7f4] sm:$0xf0] }
 0x21f   :  { %v5290_v7 = vld [vmem:[#allocation8 + $0x62c] sm:$0xf0]  ;;  %v4564_v44 = vld [vmem:[#allocation8 + $0x4f0] sm:$0xf0] }
 0x220   :  { %3166 = vmatpush.bf16.msrb.mxu0 %v3987_v16  ;;  %3179 = vmatpush.bf16.msrb.mxu1 %v4243_v17  ;;  %v4723_v34 = vor.u32 %v5290_v7, %v4722_v60  ;;  %v4343_v16 = vor.u32 %v5190_v6, %v4340_v8  ;;  %v5118_v17 = vld [vmem:[#allocation8 + $0xd4] sm:$0xf]  ;;  %v4567_v27 = vor.u32 %v5246_v23, %v4564_v44  ;;  %v5283_v8 = vld [vmem:[#allocation8 + $0x5f4] sm:$0xf0] }
 0x221   :  { %3192 = vmatpush.bf16.msrb.mxu2 %v4499_v21  ;;  %v5182_v21 = vld [vmem:[#allocation8 + $0x2d4] sm:$0xf]  ;;  %v4055_v42 = vor.u32 %v5118_v17, %v4052_v18  ;;  %v4154_v17 = vld [vmem:[#allocation8 + $0x198] sm:$0xf] }
 0x222   :  { %3205 = vmatpush.bf16.msrb.mxu3 %v4755_v22  ;;  %v4308_v22 = vld [vmem:[#allocation8 + $0x2f0] sm:$0xf0]  ;;  %v5147_v18 = vld [vmem:[#allocation8 + $0x1b4] sm:$0xf0] }
 0x223   :  { %v5310_v60 = vld [vmem:[#allocation8 + $0x6d4] sm:$0xf]  ;;  %v4311_v24 = vor.u32 %v5182_v21, %v4308_v22  ;;  %v4955_v21 = vor.u32 %v5347_v12, %v4954_v9  ;;  %v5211_v22 = vld [vmem:[#allocation8 + $0x3b4] sm:$0xf0] }
 0x224   :  { %3167 = vmatpush.bf16.msrb.mxu0 %v3955_v28  ;;  %3180 = vmatpush.bf16.msrb.mxu1 %v4211_v29  ;;  %v4820_v7 = vld [vmem:[#allocation8 + $0x6f0] sm:$0xf0]  ;;  %v4666_v23 = vld [vmem:[#allocation8 + $0x598] sm:$0xf] }
 0x225   :  { %3193 = vmatpush.bf16.msrb.mxu2 %v4467_v33  ;;  %v5110_v25 = vld [vmem:[#allocation8 + $0x94] sm:$0xf]  ;;  %v4823_v28 = vor.u32 %v5310_v60, %v4820_v7  ;;  %v5275_v44 = vld [vmem:[#allocation8 + $0x5b4] sm:$0xf0] }
 0x226   :  { %3206 = vmatpush.bf16.msrb.mxu3 %v4723_v34  ;;  %v4020_v26 = vld [vmem:[#allocation8 + $0xb0] sm:$0xf0]  ;;  %v4922_v60 = vld [vmem:[#allocation8 + $0x798] sm:$0xf] }
 0x227   :  { %3168 = vmatmul.bf16.vlgmr.msrb.gmra.mxu0 %v5774_v52  ;;  %3181 = vmatmul.bf16.vlgmr.msrb.gmra.mxu1 %v5776_v36  ;;  %v5174_v29 = vld [vmem:[#allocation8 + $0x294] sm:$0xf]  ;;  %v5339_v7 = vld [vmem:[#allocation8 + $0x7b4] sm:$0xf0] }
 0x228   :  { %3212 = vmatpush.bf16.msra.mxu0 %v4183_v37  ;;  %3225 = vmatpush.bf16.msra.mxu1 %v4439_v2  ;;  %v4276_v30 = vld [vmem:[#allocation8 + $0x2b0] sm:$0xf0]  ;;  %v4023_v37 = vor.u32 %v5110_v25, %v4020_v26  ;;  %v4122_v26 = vld [vmem:[#allocation8 + $0x158] sm:$0xf] }
 0x229   :  { %3238 = vmatpush.bf16.msra.mxu2 %v4695_v43  ;;  %3207 = vmatmul.bf16.vlgmr.msrb.gmra.mxu3 %v5778_v55  ;;  %v5238_v31 = vld [vmem:[#allocation8 + $0x494] sm:$0xf]  ;;  %v4279_v2 = vor.u32 %v5174_v29, %v4276_v30  ;;  %v4667_v29 = vor.u32 %v5275_v44, %v4666_v23  ;;  %v4923_v30 = vor.u32 %v5339_v7, %v4922_v60  ;;  %v4538_v23 = vld [vmem:[#allocation8 + $0x498] sm:$0xf] }
 0x22a   :  { %3251 = vmatpush.bf16.msra.mxu3 %v4951_v61  ;;  %3194 = vmatmul.bf16.vlgmr.msrb.gmra.mxu2 %v5780_v56  ;;  %v4532_v32 = vld [vmem:[#allocation8 + $0x4b0] sm:$0xf0]  ;;  %v5243_v44 = vld [vmem:[#allocation8 + $0x4b4] sm:$0xf0] }
 0x22b   :  { %v5302_v33 = vld [vmem:[#allocation8 + $0x694] sm:$0xf]  ;;  %v4535_v43 = vor.u32 %v5238_v31, %v4532_v32  ;;  %v5203_v31 = vld [vmem:[#allocation8 + $0x374] sm:$0xf0] }
 0x22c   :  { %3213 = vmatpush.bf16.msra.mxu0 %v4151_v51  ;;  %3226 = vmatpush.bf16.msra.mxu1 %v4407_v5  ;;  %v4788_v34 = vld [vmem:[#allocation8 + $0x6b0] sm:$0xf0]  ;;  %v4634_v32 = vld [vmem:[#allocation8 + $0x558] sm:$0xf] }
 0x22d   :  { %3239 = vmatpush.bf16.msra.mxu2 %v4663_v57  ;;  %v5102_v38 = vld [vmem:[#allocation8 + $0x54] sm:$0xf]  ;;  %v4791_v61 = vor.u32 %v5302_v33, %v4788_v34  ;;  %v5267_v34 = vld [vmem:[#allocation8 + $0x574] sm:$0xf0] }
 0x22e   :  { %3252 = vmatpush.bf16.msra.mxu3 %v4919_v58  ;;  %v3988_v15 = vld [vmem:[#allocation8 + $0x70] sm:$0xf0]  ;;  %v4794_v60 = vld [vmem:[#allocation8 + $0x698] sm:$0xf] }
 0x22f   :  { %v5166_v39 = vld [vmem:[#allocation8 + $0x254] sm:$0xf]  ;;  %v3991_v5 = vor.u32 %v5102_v38, %v3988_v15  ;;  %v5307_v7 = vld [vmem:[#allocation8 + $0x6b4] sm:$0xf0] }
 0x230   :  { %3214 = vmatpush.bf16.msra.mxu0 %v4119_v45  ;;  %3227 = vmatpush.bf16.msra.mxu1 %v4375_v1  ;;  %v4244_v41 = vld [vmem:[#allocation8 + $0x270] sm:$0xf0]  ;;  %v4186_v45 = vld [vmem:[#allocation8 + $0x1d8] sm:$0xf] }
 0x231   :  { %3240 = vmatpush.bf16.msra.mxu2 %v4631_v40  ;;  %v5230_v46 = vld [vmem:[#allocation8 + $0x454] sm:$0xf]  ;;  %v4247_v53 = vor.u32 %v5166_v39, %v4244_v41  ;;  %v5155_v1 = vld [vmem:[#allocation8 + $0x1f4] sm:$0xf0] }
 0x232   :  { %3253 = vmatpush.bf16.msra.mxu3 %v4887_v63  ;;  %v4500_v47 = vld [vmem:[#allocation8 + $0x470] sm:$0xf0]  ;;  %v4698_v40 = vld [vmem:[#allocation8 + $0x5d8] sm:$0xf] }
 0x233   :  { %v5294_v48 = vld [vmem:[#allocation8 + $0x654] sm:$0xf]  ;;  %v4503_v10 = vor.u32 %v5230_v46, %v4500_v47  ;;  %v4090_v39 = vld [vmem:[#allocation8 + $0x118] sm:$0xf]  ;;  %v4635_v46 = vor.u32 %v5267_v34, %v4634_v32 }
 0x234   :  { %3215 = vmatpush.bf16.msra.mxu0 %v4087_v4  ;;  %3228 = vmatpush.bf16.msra.mxu1 %v4343_v16  ;;  %v4756_v49 = vld [vmem:[#allocation8 + $0x670] sm:$0xf0]  ;;  %v4187_v4 = vor.u32 %v5155_v1, %v4186_v45  ;;  %v4443_v16 = vor.u32 %v5219_v35, %v4442_v3  ;;  %v5131_v41 = vld [vmem:[#allocation8 + $0x134] sm:$0xf0] }
 0x235   :  { %3241 = vmatpush.bf16.msra.mxu2 %v4599_v19  ;;  %v5094_v51 = vld [vmem:[#allocation8 + $0x14] sm:$0xf]  ;;  %v4759_v50 = vor.u32 %v5294_v48, %v4756_v49  ;;  %v4410_v19 = vld [vmem:[#allocation8 + $0x398] sm:$0xf] }
 0x236   :  { %3254 = vmatpush.bf16.msra.mxu3 %v4855_v20  ;;  %v3956_v54 = vld [vmem:[#allocation8 + $0x30] sm:$0xf0]  ;;  %v4699_v20 = vor.u32 %v5283_v8, %v4698_v40  ;;  %v4411_v25 = vor.u32 %v5211_v22, %v4410_v19  ;;  %v4346_v49 = vld [vmem:[#allocation8 + $0x318] sm:$0xf] }
 0x237   :  { %v5158_v57 = vld [vmem:[#allocation8 + $0x214] sm:$0xf]  ;;  %v3959_v63 = vor.u32 %v5094_v51, %v3956_v54  ;;  %v5195_v51 = vld [vmem:[#allocation8 + $0x334] sm:$0xf0] }
 0x238   :  { %3216 = vmatpush.bf16.msra.mxu0 %v4055_v42  ;;  %3229 = vmatpush.bf16.msra.mxu1 %v4311_v24  ;;  %v4212_v58 = vld [vmem:[#allocation8 + $0x230] sm:$0xf0]  ;;  %v4155_v24 = vor.u32 %v5147_v18, %v4154_v17  ;;  %v4858_v54 = vld [vmem:[#allocation8 + $0x718] sm:$0xf] }
 0x239   :  { %3242 = vmatpush.bf16.msra.mxu2 %v4567_v27  ;;  %v5222_v59 = vld [vmem:[#allocation8 + $0x414] sm:$0xf]  ;;  %v4215_v6 = vor.u32 %v5158_v57, %v4212_v58  ;;  %v5139_v27 = vld [vmem:[#allocation8 + $0x174] sm:$0xf0]  ;;  %v4091_v58 = vor.u32 %v5131_v41, %v4090_v39 }
 0x23a   :  { %3255 = vmatpush.bf16.msra.mxu3 %v4823_v28  ;;  %v4468_v62 = vld [vmem:[#allocation8 + $0x430] sm:$0xf0]  ;;  %v4378_v28 = vld [vmem:[#allocation8 + $0x358] sm:$0xf] }
 0x23b   :  { %v5286_v0 = vld [vmem:[#allocation8 + $0x614] sm:$0xf]  ;;  %v4471_v13 = vor.u32 %v5222_v59, %v4468_v62  ;;  %v5323_v57 = vld [vmem:[#allocation8 + $0x734] sm:$0xf0] }
 0x23c   :  { %3217 = vmatpush.bf16.msra.mxu0 %v4023_v37  ;;  %3230 = vmatpush.bf16.msra.mxu1 %v4279_v2  ;;  %v4724_v11 = vld [vmem:[#allocation8 + $0x630] sm:$0xf0]  ;;  %v4890_v37 = vld [vmem:[#allocation8 + $0x758] sm:$0xf] }
 0x23d   :  { %3243 = vmatpush.bf16.msra.mxu2 %v4535_v43  ;;  %v4727_v14 = vor.u32 %v5286_v0, %v4724_v11  ;;  %v5802_v42 = vld [vmem:[#allocation11] sm:$0xff]  ;;  %v5331_v2 = vld [vmem:[#allocation8 + $0x774] sm:$0xf0]  ;;  %v4123_v43 = vor.u32 %v5139_v27, %v4122_v26  ;;  %v4859_v11 = vor.u32 %v5323_v57, %v4858_v54 }
 0x23e   :  { %3256 = vmatpush.bf16.msra.mxu3 %v4791_v61  ;;  %v1656_v33 = vperm.slane %v5802_v42, 0  ;;  %v4379_v61 = vor.u32 %v5203_v31, %v4378_v28  ;;  %v4891_v47 = vor.u32 %v5331_v2, %v4890_v37  ;;  %v5123_v59 = vld [vmem:[#allocation8 + $0xf4] sm:$0xf0] }
 0x23f   :  { %v4314_v45 = vld [vmem:[#allocation8 + $0x2d8] sm:$0xf] }
 0x240   :  { %3218 = vmatpush.bf16.msra.mxu0 %v3991_v5  ;;  %3231 = vmatpush.bf16.msra.mxu1 %v4247_v53  ;;  %v4602_v5 = vld [vmem:[#allocation8 + $0x518] sm:$0xf] }
 0x241   :  { %3244 = vmatpush.bf16.msra.mxu2 %v4503_v10  ;;  %v5259_v53 = vld [vmem:[#allocation8 + $0x534] sm:$0xf0]  ;;  %v4347_v10 = vor.u32 %v5195_v51, %v4346_v49 }
 0x242   :  { %3257 = vmatpush.bf16.msra.mxu3 %v4759_v50  ;;  %v4058_v50 = vld [vmem:[#allocation8 + $0xd8] sm:$0xf]  ;;  %v4603_v0 = vor.u32 %v5259_v53, %v4602_v5 }
 0x243   :  { %v2961_v38 = vpop.f32.mrf.mxu0  ;;  %v2974_v15 = vpop.f32.mrf.mxu1  ;;  %v5187_v1 = vld [vmem:[#allocation8 + $0x2f4] sm:$0xf0] }
 0x244   :  { %3219 = vmatpush.bf16.msra.mxu0 %v3959_v63  ;;  %3232 = vmatpush.bf16.msra.mxu1 %v4215_v6  ;;  %v2962_v48 = vadd.f32 %v2961_v38, %v1656_v33  ;;  %v4570_v3 = vld [vmem:[#allocation8 + $0x4d8] sm:$0xf]  ;;  %v1657_v33 = vperm.slane %v5802_v42, 1 }
 0x245   :  { %3245 = vmatpush.bf16.msra.mxu2 %v4471_v13  ;;  %v5251_v63 = vld [vmem:[#allocation8 + $0x4f4] sm:$0xf0] }
 0x246   :  { %3258 = vmatpush.bf16.msra.mxu3 %v4727_v14  ;;  %v2975_v62 = vadd.f32 %v2974_v15, %v2962_v48  ;;  %v4826_v6 = vld [vmem:[#allocation8 + $0x6d8] sm:$0xf]  ;;  %v4059_v14 = vor.u32 %v5123_v59, %v4058_v50  ;;  %v4571_v19 = vor.u32 %v5251_v63, %v4570_v3  ;;  %v5151_v59 = vld [vmem:[#allocation8 + $0x1dc] sm:$0xf] }
 0x247   :  { %3220 = vmatmul.bf16.vlgmr.msra.gmra.mxu0 %v5774_v52  ;;  %3233 = vmatmul.bf16.vlgmr.msra.gmra.mxu1 %v5776_v36  ;;  %v5315_v8 = vld [vmem:[#allocation8 + $0x6f4] sm:$0xf0]  ;;  %v4956_v63 = vld [vmem:[#allocation8 + $0x7f8] sm:$0xf0] }
 0x248   :  { %3264 = vmatpush.bf16.msrb.mxu0 %v4187_v4  ;;  %3277 = vmatpush.bf16.msrb.mxu1 %v4443_v16  ;;  %v4315_v4 = vor.u32 %v5187_v1, %v4314_v45  ;;  %v4026_v16 = vld [vmem:[#allocation8 + $0x98] sm:$0xf]  ;;  %v5279_v45 = vld [vmem:[#allocation8 + $0x5dc] sm:$0xf] }
 0x249   :  { %3290 = vmatpush.bf16.msrb.mxu2 %v4699_v20  ;;  %3259 = vmatmul.bf16.vlgmr.msra.gmra.mxu3 %v5778_v55  ;;  %v5115_v17 = vld [vmem:[#allocation8 + $0xb4] sm:$0xf0]  ;;  %v4827_v20 = vor.u32 %v5315_v8, %v4826_v6 }
 0x24a   :  { %3303 = vmatpush.bf16.msrb.mxu3 %v4955_v21  ;;  %3246 = vmatmul.bf16.vlgmr.msra.gmra.mxu2 %v5780_v56  ;;  %v2987_v35 = vpop.f32.mrf.mxu2  ;;  %v3000_v40 = vpop.f32.mrf.mxu3  ;;  %v4282_v21 = vld [vmem:[#allocation8 + $0x298] sm:$0xf] }
 0x24b   :  { %v2988_v9 = vadd.f32 %v2987_v35, %v2975_v62  ;;  %v2963_v12 = vpop.f32.mrf.mxu0  ;;  %v2976_v13 = vpop.f32.mrf.mxu1  ;;  %v5179_v22 = vld [vmem:[#allocation8 + $0x2b4] sm:$0xf0]  ;;  %v4188_v62 = vld [vmem:[#allocation8 + $0x1f8] sm:$0xf0] }
 0x24c   :  { %3265 = vmatpush.bf16.msrb.mxu0 %v4155_v24  ;;  %3278 = vmatpush.bf16.msrb.mxu1 %v4411_v25  ;;  %v4027_v24 = vor.u32 %v5115_v17, %v4026_v16  ;;  %v4283_v25 = vor.u32 %v5179_v22, %v4282_v21  ;;  %v3994_v26 = vld [vmem:[#allocation8 + $0x58] sm:$0xf]  ;;  %v4700_v35 = vld [vmem:[#allocation8 + $0x5f8] sm:$0xf0]  ;;  %v4191_v12 = vor.u32 %v5151_v59, %v4188_v62 }
 0x24d   :  { %3291 = vmatpush.bf16.msrb.mxu2 %v4667_v29  ;;  %v3001_v18 = vadd.f32 %v3000_v40, %v2988_v9  ;;  %v5107_v27 = vld [vmem:[#allocation8 + $0x74] sm:$0xf0]  ;;  %v4539_v29 = vor.u32 %v5243_v44, %v4538_v23  ;;  %v5343_v40 = vld [vmem:[#allocation8 + $0x7dc] sm:$0xf] }
 0x24e   :  { %3304 = vmatpush.bf16.msrb.mxu3 %v4923_v30  ;;  %v4250_v28 = vld [vmem:[#allocation8 + $0x258] sm:$0xf]  ;;  %v4795_v30 = vor.u32 %v5307_v7, %v4794_v60  ;;  %v5143_v16 = vld [vmem:[#allocation8 + $0x19c] sm:$0xf] }
 0x24f   :  { %5370 = vtanh.f32 %v3001_v18  ;;  %v5171_v31 = vld [vmem:[#allocation8 + $0x274] sm:$0xf0]  ;;  %v4156_v17 = vld [vmem:[#allocation8 + $0x1b8] sm:$0xf0]  ;;  %v4703_v18 = vor.u32 %v5279_v45, %v4700_v35 }
 0x250   :  { %3266 = vmatpush.bf16.msrb.mxu0 %v4123_v43  ;;  %3279 = vmatpush.bf16.msrb.mxu1 %v4379_v61  ;;  %v4506_v32 = vld [vmem:[#allocation8 + $0x458] sm:$0xf]  ;;  %v5207_v23 = vld [vmem:[#allocation8 + $0x39c] sm:$0xf] }
 0x251   :  { %3292 = vmatpush.bf16.msrb.mxu2 %v4635_v46  ;;  %v5235_v2 = vld [vmem:[#allocation8 + $0x474] sm:$0xf0]  ;;  %v3995_v46 = vor.u32 %v5107_v27, %v3994_v26  ;;  %v4412_v44 = vld [vmem:[#allocation8 + $0x3b8] sm:$0xf0]  ;;  %v4159_v27 = vor.u32 %v5143_v16, %v4156_v17 }
 0x252   :  { %3305 = vmatpush.bf16.msrb.mxu3 %v4891_v47  ;;  %v2989_v34 = vpop.f32.mrf.mxu2  ;;  %v3002_v37 = vpop.f32.mrf.mxu3  ;;  %v4762_v38 = vld [vmem:[#allocation8 + $0x658] sm:$0xf]  ;;  %v4251_v47 = vor.u32 %v5171_v31, %v4250_v28  ;;  %v4507_v53 = vor.u32 %v5235_v2, %v4506_v32  ;;  %v5271_v60 = vld [vmem:[#allocation8 + $0x59c] sm:$0xf]  ;;  %v4415_v28 = vor.u32 %v5207_v23, %v4412_v44 }
 0x253   :  { %v5299_v15 = vld [vmem:[#allocation8 + $0x674] sm:$0xf0]  ;;  %v3013_v43 = vpop.f32.mrf.mxu0  ;;  %v3026_v61 = vpop.f32.mrf.mxu1  ;;  %v4668_v7 = vld [vmem:[#allocation8 + $0x5b8] sm:$0xf0] }
 0x254   :  { %3267 = vmatpush.bf16.msrb.mxu0 %v4091_v58  ;;  %3280 = vmatpush.bf16.msrb.mxu1 %v4347_v10  ;;  %v3962_v39 = vld [vmem:[#allocation8 + $0x18] sm:$0xf]  ;;  %v4763_v54 = vor.u32 %v5299_v15, %v4762_v38  ;;  %v3014_v57 = vadd.f32 %v3013_v43, %v1657_v33  ;;  %v4671_v31 = vor.u32 %v5271_v60, %v4668_v7  ;;  %v5199_v33 = vld [vmem:[#allocation8 + $0x35c] sm:$0xf] }
 0x255   :  { %3293 = vmatpush.bf16.msrb.mxu2 %v4603_v0  ;;  %v5099_v41 = vld [vmem:[#allocation8 + $0x34] sm:$0xf0]  ;;  %v5371_v5 = vpop.eup %5370  ;;  %v5215_v0 = vld [vmem:[#allocation8 + $0x3dc] sm:$0xf] }
 0x256   :  { %3306 = vmatpush.bf16.msrb.mxu3 %v4859_v11  ;;  %v4218_v48 = vld [vmem:[#allocation8 + $0x218] sm:$0xf]  ;;  %3376 = vst [vmem:[#allocation13] sm:$0xff] %v5371_v5  ;;  %v4444_v11 = vld [vmem:[#allocation8 + $0x3f8] sm:$0xf0]  ;;  %v3963_v1 = vor.u32 %v5099_v41, %v3962_v39  ;;  %v3027_v6 = vadd.f32 %v3026_v61, %v3014_v57 }
 0x257   :  { %v5163_v49 = vld [vmem:[#allocation8 + $0x234] sm:$0xf0]  ;;  %v4447_v13 = vor.u32 %v5215_v0, %v4444_v11  ;;  %v4380_v34 = vld [vmem:[#allocation8 + $0x378] sm:$0xf0] }
 0x258   :  { %3268 = vmatpush.bf16.msrb.mxu0 %v4059_v14  ;;  %3281 = vmatpush.bf16.msrb.mxu1 %v4315_v4  ;;  %v4474_v51 = vld [vmem:[#allocation8 + $0x418] sm:$0xf]  ;;  %v4219_v3 = vor.u32 %v5163_v49, %v4218_v48  ;;  %v5263_v37 = vld [vmem:[#allocation8 + $0x55c] sm:$0xf]  ;;  %v4383_v61 = vor.u32 %v5199_v33, %v4380_v34 }
 0x259   :  { %3294 = vmatpush.bf16.msrb.mxu2 %v4571_v19  ;;  %v5227_v58 = vld [vmem:[#allocation8 + $0x434] sm:$0xf0]  ;;  %v4959_v19 = vor.u32 %v5343_v40, %v4956_v63  ;;  %v4636_v2 = vld [vmem:[#allocation8 + $0x578] sm:$0xf0] }
 0x25a   :  { %3307 = vmatpush.bf16.msrb.mxu3 %v4827_v20  ;;  %v4730_v10 = vld [vmem:[#allocation8 + $0x618] sm:$0xf]  ;;  %v4475_v8 = vor.u32 %v5227_v58, %v4474_v51  ;;  %v3039_v14 = vpop.f32.mrf.mxu2  ;;  %v3052_v4 = vpop.f32.mrf.mxu3  ;;  %v5327_v38 = vld [vmem:[#allocation8 + $0x75c] sm:$0xf]  ;;  %v4639_v49 = vor.u32 %v5263_v37, %v4636_v2 }
 0x25b   :  { %v5291_v50 = vld [vmem:[#allocation8 + $0x634] sm:$0xf0]  ;;  %v3040_v20 = vadd.f32 %v3039_v14, %v3027_v6  ;;  %v3015_v21 = vpop.f32.mrf.mxu0  ;;  %v3028_v22 = vpop.f32.mrf.mxu1  ;;  %v4892_v15 = vld [vmem:[#allocation8 + $0x778] sm:$0xf0] }
 0x25c   :  { %3269 = vmatpush.bf16.msrb.mxu0 %v4027_v24  ;;  %3282 = vmatpush.bf16.msrb.mxu1 %v4283_v25  ;;  %v4731_v9 = vor.u32 %v5291_v50, %v4730_v10  ;;  %v5335_v24 = vld [vmem:[#allocation8 + $0x79c] sm:$0xf]  ;;  %v4895_v51 = vor.u32 %v5327_v38, %v4892_v15 }
 0x25d   :  { %3295 = vmatpush.bf16.msrb.mxu2 %v4539_v29  ;;  %v4924_v25 = vld [vmem:[#allocation8 + $0x7b8] sm:$0xf0]  ;;  %v3053_v26 = vadd.f32 %v3052_v4, %v3040_v20 }
 0x25e   :  { %3308 = vmatpush.bf16.msrb.mxu3 %v4795_v30  ;;  %v5135_v29 = vld [vmem:[#allocation8 + $0x15c] sm:$0xf]  ;;  %v4927_v32 = vor.u32 %v5335_v24, %v4924_v25 }
 0x25f   :  { %v4124_v30 = vld [vmem:[#allocation8 + $0x178] sm:$0xf0]  ;;  %5372 = vtanh.f32 %v3053_v26 }
 0x260   :  { %3270 = vmatpush.bf16.msrb.mxu0 %v3995_v46  ;;  %3283 = vmatpush.bf16.msrb.mxu1 %v4251_v47  ;;  %v4127_v43 = vor.u32 %v5135_v29, %v4124_v30  ;;  %v1658_v46 = vperm.slane %v5802_v42, 2  ;;  %v5127_v47 = vld [vmem:[#allocation8 + $0x11c] sm:$0xf] }
 0x261   :  { %3296 = vmatpush.bf16.msrb.mxu2 %v4507_v53  ;;  %v4092_v48 = vld [vmem:[#allocation8 + $0x138] sm:$0xf0] }
 0x262   :  { %3309 = vmatpush.bf16.msrb.mxu3 %v4763_v54  ;;  %v3041_v39 = vpop.f32.mrf.mxu2  ;;  %v3054_v41 = vpop.f32.mrf.mxu3  ;;  %v5191_v5 = vld [vmem:[#allocation8 + $0x31c] sm:$0xf]  ;;  %v4095_v0 = vor.u32 %v5127_v47, %v4092_v48 }
 0x263   :  { %v4348_v53 = vld [vmem:[#allocation8 + $0x338] sm:$0xf0] }
 0x264   :  { %3271 = vmatpush.bf16.msrb.mxu0 %v3963_v1  ;;  %3284 = vmatpush.bf16.msrb.mxu1 %v4219_v3  ;;  %v5255_v54 = vld [vmem:[#allocation8 + $0x51c] sm:$0xf]  ;;  %v3065_v59 = vpop.f32.mrf.mxu0  ;;  %v3078_v62 = vpop.f32.mrf.mxu1  ;;  %v4351_v11 = vor.u32 %v5191_v5, %v4348_v53 }
 0x265   :  { %3297 = vmatpush.bf16.msrb.mxu2 %v4475_v8  ;;  %v4604_v57 = vld [vmem:[#allocation8 + $0x538] sm:$0xf0]  ;;  %v5373_v50 = vpop.eup %5372  ;;  %v3066_v3 = vadd.f32 %v3065_v59, %v1658_v46 }
 0x266   :  { %3310 = vmatpush.bf16.msrb.mxu3 %v4731_v9  ;;  %v5319_v58 = vld [vmem:[#allocation8 + $0x71c] sm:$0xf]  ;;  %3377 = vst [vmem:[#allocation13 + $0x8] sm:$0xff] %v5373_v50  ;;  %v4607_v35 = vor.u32 %v5255_v54, %v4604_v57 }
 0x267   :  { %3272 = vmatmul.bf16.vlgmr.msrb.gmra.mxu0 %v5774_v52  ;;  %3285 = vmatmul.bf16.vlgmr.msrb.gmra.mxu1 %v5776_v36  ;;  %v4860_v10 = vld [vmem:[#allocation8 + $0x738] sm:$0xf0] }
 0x268   :  { %3316 = vmatpush.bf16.msra.mxu0 %v4191_v12  ;;  %3329 = vmatpush.bf16.msra.mxu1 %v4447_v13  ;;  %v5119_v45 = vld [vmem:[#allocation8 + $0xdc] sm:$0xf]  ;;  %v4863_v40 = vor.u32 %v5319_v58, %v4860_v10 }
 0x269   :  { %3342 = vmatpush.bf16.msra.mxu2 %v4703_v18  ;;  %3311 = vmatmul.bf16.vlgmr.msrb.gmra.mxu3 %v5778_v55  ;;  %v4060_v1 = vld [vmem:[#allocation8 + $0xf8] sm:$0xf0]  ;;  %v3079_v18 = vadd.f32 %v3078_v62, %v3066_v3  ;;  %v1659_v3 = vperm.slane %v5802_v42, 3 }
 0x26a   :  { %3355 = vmatpush.bf16.msra.mxu3 %v4959_v19  ;;  %3298 = vmatmul.bf16.vlgmr.msrb.gmra.mxu2 %v5780_v56  ;;  %v5183_v63 = vld [vmem:[#allocation8 + $0x2dc] sm:$0xf]  ;;  %v4063_v14 = vor.u32 %v5119_v45, %v4060_v1 }
 0x26b   :  { %v4316_v6 = vld [vmem:[#allocation8 + $0x2f8] sm:$0xf0] }
 0x26c   :  { %3317 = vmatpush.bf16.msra.mxu0 %v4159_v27  ;;  %3330 = vmatpush.bf16.msra.mxu1 %v4415_v28  ;;  %v5247_v8 = vld [vmem:[#allocation8 + $0x4dc] sm:$0xf]  ;;  %v4319_v4 = vor.u32 %v5183_v63, %v4316_v6  ;;  %v3104_v60 = vpop.f32.mrf.mxu3  ;;  %v3067_v27 = vpop.f32.mrf.mxu0 }
 0x26d   :  { %3343 = vmatpush.bf16.msra.mxu2 %v4671_v31  ;;  %v4572_v9 = vld [vmem:[#allocation8 + $0x4f8] sm:$0xf0]  ;;  %v3091_v44 = vpop.f32.mrf.mxu2  ;;  %v3080_v28 = vpop.f32.mrf.mxu1 }
 0x26e   :  { %3356 = vmatpush.bf16.msra.mxu3 %v4927_v32  ;;  %v5311_v12 = vld [vmem:[#allocation8 + $0x6dc] sm:$0xf]  ;;  %v4575_v19 = vor.u32 %v5247_v8, %v4572_v9  ;;  %v3092_v26 = vadd.f32 %v3091_v44, %v3079_v18 }
 0x26f   :  { %v4828_v13 = vld [vmem:[#allocation8 + $0x6f8] sm:$0xf0] }
 0x270   :  { %3318 = vmatpush.bf16.msra.mxu0 %v4127_v43  ;;  %3331 = vmatpush.bf16.msra.mxu1 %v4383_v61  ;;  %v5111_v16 = vld [vmem:[#allocation8 + $0x9c] sm:$0xf]  ;;  %v4831_v20 = vor.u32 %v5311_v12, %v4828_v13  ;;  %v3105_v33 = vadd.f32 %v3104_v60, %v3092_v26  ;;  %v1661_v26 = vperm.slane %v5802_v42, 5 }
 0x271   :  { %3344 = vmatpush.bf16.msra.mxu2 %v4639_v49  ;;  %v4028_v17 = vld [vmem:[#allocation8 + $0xb8] sm:$0xf0] }
 0x272   :  { %3357 = vmatpush.bf16.msra.mxu3 %v4895_v51  ;;  %v5175_v21 = vld [vmem:[#allocation8 + $0x29c] sm:$0xf]  ;;  %v4031_v29 = vor.u32 %v5111_v16, %v4028_v17  ;;  %5374 = vtanh.f32 %v3105_v33 }
 0x273   :  { %v4284_v22 = vld [vmem:[#allocation8 + $0x2b8] sm:$0xf0] }
 0x274   :  { %3319 = vmatpush.bf16.msra.mxu0 %v4095_v0  ;;  %3332 = vmatpush.bf16.msra.mxu1 %v4351_v11  ;;  %v5239_v23 = vld [vmem:[#allocation8 + $0x49c] sm:$0xf]  ;;  %v4287_v30 = vor.u32 %v5175_v21, %v4284_v22  ;;  %v3106_v58 = vpop.f32.mrf.mxu3 }
 0x275   :  { %3345 = vmatpush.bf16.msra.mxu2 %v4607_v35  ;;  %v4540_v7 = vld [vmem:[#allocation8 + $0x4b8] sm:$0xf0]  ;;  %v3093_v57 = vpop.f32.mrf.mxu2 }
 0x276   :  { %3358 = vmatpush.bf16.msra.mxu3 %v4863_v40  ;;  %v5303_v24 = vld [vmem:[#allocation8 + $0x69c] sm:$0xf]  ;;  %v4543_v34 = vor.u32 %v5239_v23, %v4540_v7 }
 0x277   :  { %v4796_v25 = vld [vmem:[#allocation8 + $0x6b8] sm:$0xf0] }
 0x278   :  { %3320 = vmatpush.bf16.msra.mxu0 %v4063_v14  ;;  %3333 = vmatpush.bf16.msra.mxu1 %v4319_v4  ;;  %v5103_v31 = vld [vmem:[#allocation8 + $0x5c] sm:$0xf]  ;;  %v4799_v37 = vor.u32 %v5303_v24, %v4796_v25  ;;  %v5375_v11 = vpop.eup %5374 }
 0x279   :  { %v3996_v32 = vld [vmem:[#allocation8 + $0x78] sm:$0xf0]  ;;  %3346 = vmatpush.bf16.msra.mxu2 %v4575_v19  ;;  %3378 = vst [vmem:[#allocation13 + $0x10] sm:$0xff] %v5375_v11 }
 0x27a   :  { %3359 = vmatpush.bf16.msra.mxu3 %v4831_v20  ;;  %v5167_v2 = vld [vmem:[#allocation8 + $0x25c] sm:$0xf]  ;;  %v3999_v41 = vor.u32 %v5103_v31, %v3996_v32 }
 0x27b   :  { %v4252_v38 = vld [vmem:[#allocation8 + $0x278] sm:$0xf0] }
 0x27c   :  { %v5231_v15 = vld [vmem:[#allocation8 + $0x45c] sm:$0xf]  ;;  %3321 = vmatpush.bf16.msra.mxu0 %v4031_v29  ;;  %3334 = vmatpush.bf16.msra.mxu1 %v4287_v30  ;;  %v4255_v46 = vor.u32 %v5167_v2, %v4252_v38 }
 0x27d   :  { %v4508_v43 = vld [vmem:[#allocation8 + $0x478] sm:$0xf0]  ;;  %3347 = vmatpush.bf16.msra.mxu2 %v4543_v34 }
 0x27e   :  { %v5295_v61 = vld [vmem:[#allocation8 + $0x65c] sm:$0xf]  ;;  %3360 = vmatpush.bf16.msra.mxu3 %v4799_v37  ;;  %v4511_v49 = vor.u32 %v5231_v15, %v4508_v43 }
 0x27f   :  { %v4764_v39 = vld [vmem:[#allocation8 + $0x678] sm:$0xf0] }
 0x280   :  { %v5095_v47 = vld [vmem:[#allocation8 + $0x1c] sm:$0xf]  ;;  %v4767_v51 = vor.u32 %v5295_v61, %v4764_v39  ;;  %3322 = vmatpush.bf16.msra.mxu0 %v3999_v41  ;;  %3335 = vmatpush.bf16.msra.mxu1 %v4255_v46  ;;  %v1662_v61 = vperm.slane %v5802_v42, 6 }
 0x281   :  { %v3964_v48 = vld [vmem:[#allocation8 + $0x38] sm:$0xf0]  ;;  %3348 = vmatpush.bf16.msra.mxu2 %v4511_v49 }
 0x282   :  { %v5159_v5 = vld [vmem:[#allocation8 + $0x21c] sm:$0xf]  ;;  %v3967_v62 = vor.u32 %v5095_v47, %v3964_v48  ;;  %3361 = vmatpush.bf16.msra.mxu3 %v4767_v51 }
 0x283   :  { %v4220_v53 = vld [vmem:[#allocation8 + $0x238] sm:$0xf0] }
 0x284   :  { %v5223_v54 = vld [vmem:[#allocation8 + $0x41c] sm:$0xf]  ;;  %v4223_v0 = vor.u32 %v5159_v5, %v4220_v53  ;;  %3323 = vmatpush.bf16.msra.mxu0 %v3967_v62  ;;  %v3117_v35 = vpop.f32.mrf.mxu0  ;;  %v3130_v40 = vpop.f32.mrf.mxu1 }
 0x285   :  { %v4476_v10 = vld [vmem:[#allocation8 + $0x438] sm:$0xf0]  ;;  %v3118_v63 = vadd.f32 %v3117_v35, %v1659_v3 }
 0x286   :  { %v5287_v50 = vld [vmem:[#allocation8 + $0x61c] sm:$0xf]  ;;  %v4479_v45 = vor.u32 %v5223_v54, %v4476_v10  ;;  %3336 = vmatpush.bf16.msra.mxu1 %v4223_v0 }
 0x287   :  { %v4732_v59 = vld [vmem:[#allocation8 + $0x638] sm:$0xf0]  ;;  %3324 = vmatmul.bf16.vlgmr.msra.gmra.mxu0 %v5774_v52  ;;  %v3131_v6 = vadd.f32 %v3130_v40, %v3118_v63 }
 0x288   :  { %v4735_v1 = vor.u32 %v5287_v50, %v4732_v59  ;;  %3349 = vmatpush.bf16.msra.mxu2 %v4479_v45  ;;  %v1663_v50 = vperm.slane %v5802_v42, 7 }
 0x289   :  { %3337 = vmatmul.bf16.vlgmr.msra.gmra.mxu1 %v5776_v36 }
 0x28a   :  { %3362 = vmatpush.bf16.msra.mxu3 %v4735_v1 }
 0x28b   :  { %3350 = vmatmul.bf16.vlgmr.msra.gmra.mxu2 %v5780_v56  ;;  %v1660_v56 = vperm.slane %v5802_v42, 4 }
 0x28c   :  { %v3156_v9 = vpop.f32.mrf.mxu3  ;;  %v3119_v13 = vpop.f32.mrf.mxu0 }
 0x28d   :  { %3363 = vmatmul.bf16.vlgmr.msra.gmra.mxu3 %v5778_v55  ;;  %v3143_v8 = vpop.f32.mrf.mxu2  ;;  %v3132_v14 = vpop.f32.mrf.mxu1 }
 0x28e   :  { %v3144_v12 = vadd.f32 %v3143_v8, %v3131_v6 }
 0x290   :  { %v3157_v4 = vadd.f32 %v3156_v9, %v3144_v12 }
 0x292   :  { %5376 = vtanh.f32 %v3157_v4 }
 0x294   :  { %v3158_v16 = vpop.f32.mrf.mxu3 }
 0x295   :  { %v3145_v52 = vpop.f32.mrf.mxu2 }
 0x298   :  { %v5377_v36 = vpop.eup %5376 }
 0x299   :  { %3379 = vst [vmem:[#allocation13 + $0x18] sm:$0xff] %v5377_v36 }
 0x2a4   :  { %v3169_v55 = vpop.f32.mrf.mxu0  ;;  %v3182_v17 = vpop.f32.mrf.mxu1 }
 0x2a5   :  { %v3170_v18 = vadd.f32 %v3169_v55, %v1660_v56 }
 0x2a7   :  { %v3183_v19 = vadd.f32 %v3182_v17, %v3170_v18 }
 0x2ac   :  { %v3208_v21 = vpop.f32.mrf.mxu3  ;;  %v3171_v23 = vpop.f32.mrf.mxu0 }
 0x2ad   :  { %v3195_v20 = vpop.f32.mrf.mxu2  ;;  %v3184_v44 = vpop.f32.mrf.mxu1 }
 0x2ae   :  { %v3196_v22 = vadd.f32 %v3195_v20, %v3183_v19 }
 0x2b0   :  { %v3209_v60 = vadd.f32 %v3208_v21, %v3196_v22 }
 0x2b2   :  { %5378 = vtanh.f32 %v3209_v60 }
 0x2b4   :  { %v3210_v24 = vpop.f32.mrf.mxu3 }
 0x2b5   :  { %v3197_v7 = vpop.f32.mrf.mxu2 }
 0x2b8   :  { %v5379_v25 = vpop.eup %5378 }
 0x2b9   :  { %3380 = vst [vmem:[#allocation13 + $0x20] sm:$0xff] %v5379_v25 }
 0x2c4   :  { %v3221_v27 = vpop.f32.mrf.mxu0  ;;  %v3234_v28 = vpop.f32.mrf.mxu1 }
 0x2c5   :  { %v3222_v29 = vadd.f32 %v3221_v27, %v1661_v26 }
 0x2c7   :  { %v3235_v30 = vadd.f32 %v3234_v28, %v3222_v29 }
 0x2cc   :  { %v3260_v32 = vpop.f32.mrf.mxu3  ;;  %v3223_v34 = vpop.f32.mrf.mxu0 }
 0x2cd   :  { %v3247_v31 = vpop.f32.mrf.mxu2  ;;  %v3236_v37 = vpop.f32.mrf.mxu1 }
 0x2ce   :  { %v3248_v33 = vadd.f32 %v3247_v31, %v3235_v30 }
 0x2d0   :  { %v3261_v2 = vadd.f32 %v3260_v32, %v3248_v33 }
 0x2d2   :  { %5380 = vtanh.f32 %v3261_v2 }
 0x2d4   :  { %v3262_v15 = vpop.f32.mrf.mxu3 }
 0x2d5   :  { %v3249_v38 = vpop.f32.mrf.mxu2 }
 0x2d8   :  { %v5381_v43 = vpop.eup %5380 }
 0x2d9   :  { %3381 = vst [vmem:[#allocation13 + $0x28] sm:$0xff] %v5381_v43 }
 0x2e4   :  { %v3273_v39 = vpop.f32.mrf.mxu0  ;;  %v3286_v41 = vpop.f32.mrf.mxu1 }
 0x2e5   :  { %v3274_v46 = vadd.f32 %v3273_v39, %v1662_v61 }
 0x2e7   :  { %v3287_v47 = vadd.f32 %v3286_v41, %v3274_v46 }
 0x2ec   :  { %v3312_v49 = vpop.f32.mrf.mxu3  ;;  %v3275_v5 = vpop.f32.mrf.mxu0 }
 0x2ed   :  { %v3299_v48 = vpop.f32.mrf.mxu2  ;;  %v3288_v53 = vpop.f32.mrf.mxu1 }
 0x2ee   :  { %v3300_v51 = vadd.f32 %v3299_v48, %v3287_v47 }
 0x2f0   :  { %v3313_v54 = vadd.f32 %v3312_v49, %v3300_v51 }
 0x2f2   :  { %5382 = vtanh.f32 %v3313_v54 }
 0x2f4   :  { %v3314_v58 = vpop.f32.mrf.mxu3 }
 0x2f5   :  { %v3301_v57 = vpop.f32.mrf.mxu2 }
 0x2f8   :  { %v5383_v10 = vpop.eup %5382 }
 0x2f9   :  { %3382 = vst [vmem:[#allocation13 + $0x30] sm:$0xff] %v5383_v10 }
 0x304   :  { %v3325_v59 = vpop.f32.mrf.mxu0 }
 0x305   :  { %v3326_v0 = vadd.f32 %v3325_v59, %v1663_v50 }
 0x306   :  { %v3338_v62 = vpop.f32.mrf.mxu1 }
 0x307   :  { %v3339_v11 = vadd.f32 %v3338_v62, %v3326_v0 }
 0x30c   :  { %v3327_v35 = vpop.f32.mrf.mxu0 }
 0x30e   :  { %v3351_v45 = vpop.f32.mrf.mxu2  ;;  %v3340_v40 = vpop.f32.mrf.mxu1 }
 0x30f   :  { %v3352_v3 = vadd.f32 %v3351_v45, %v3339_v11 }
 0x310   :  { %v3364_v1 = vpop.f32.mrf.mxu3 }
 0x311   :  { %v3365_v63 = vadd.f32 %v3364_v1, %v3352_v3 }
 0x313   :  { %5384 = vtanh.f32 %v3365_v63 }
 0x316   :  { %v3353_v6 = vpop.f32.mrf.mxu2 }
 0x318   :  { %v3366_v8 = vpop.f32.mrf.mxu3 }
 0x319   :  { %v5385_v42 = vpop.eup %5384 }
 0x31a   :  { %3383 = vst [vmem:[#allocation13 + $0x38] sm:$0xff] %v5385_v42 }
 0x31b   :  { %3394 = dma.vmem_to_hbm [thread:$0]  %s3390_s5, 1024, %s3392_s29, [#allocation4]  }
 0x31c   :  { %5562 = dma.done.wait [#allocation4], 1024  }
 0x31d   :  { %5563 = vsyncadd [#allocation4], 4294966272 }
 0x31e   :  { %3399 = vsyncpa [#allocation3], 1 }
 0x31f   :  { %3400 = vsyncpa [#allocation6], 1 }
 0x320   :  { %3401 = vsyncpa [#allocation9], 1 }
 0x321   :  { %3402 = vsyncpa [#allocation12], 1 }
 0x322   :  { %3403 = vsyncpa [#allocation4], 1 }

</bundles_post_ra>
